<compile_context>
chip_gen: v6e
topology: v6e:2x2x1
jax: 0.10.0
libtpu: 0.0.40
codegen_flags: <defaults>
</compile_context>

<pallas_src>
import jax
import jax.numpy as jnp
from jax.experimental import pallas as pl
from jax.experimental.pallas import tpu as pltpu

# ----------------------- model hyper-parameters (RV_RNN_conv defaults) ------------------
N_DIFF = 2            # n_diff
PROJ_DIM = 32         # proj_dim
HIDDEN = 32           # rnn_hidden_size
NUM_LAYERS = 2        # rnn_num_layer (constructor argument; chosen = 2)
INPUT_SCALER = 10000.0

_UNROLL_MAX_STEPS = 64   # fully unroll the time loop up to this L, else fori_loop

assert NUM_LAYERS == 2   # wavefront fusion below is written for exactly 2 layers


# ------------------------------------- kernel -------------------------------------------
def _rv_rnn_kernel(x_ref, misc_ref, wbig_ref, o_ref, add_ref):
    # x_ref   : (L*bp, 1) time-major scaled-input column, row r = t*bp + b (b >= B zero pad)
    # misc_ref: (8, 2H) packed slab (see _pack_params)
    # wbig_ref: (2H, 2H) block-bidiagonal fused recurrence weight
    # add_ref : ((L+1)*bp, 2H) VMEM scratch holding per-step additive terms
    rows = x_ref.shape[0]
    bp = o_ref.shape[0]
    L = rows // bp
    H2 = wbig_ref.shape[0]                              # 2 * HIDDEN

    wf0 = misc_ref[0:1, :]                              # [wf'[0] | 0]
    wf1 = misc_ref[1:2, :]                              # [wf'[1] | 0]
    wf2 = misc_ref[2:3, :]                              # [wf'[2] | 0]
    bfold = misc_ref[3:4, :]                            # [bf@W0ih + b0 | 0]
    bvec = misc_ref[4:5, :]                             # [0 | b1]
    woutp = misc_ref[5:6, :]                            # [0 | wout]
    bout = misc_ref[6:7, 0:1]                           # (1,1) scalar bias of output head

    # frozen_diff_conv (kernel [-1,1]): forward differences along time, right zero-padded;
    # 2nd difference taken on the UNPADDED 1st difference (matches the PyTorch module).
    xs = x_ref[...] * INPUT_SCALER                      # (rows, 1)
    zpad = jnp.zeros((bp, 1), jnp.float32)
    d1c = xs[bp:, :] - xs[:-bp, :]                      # ((L-1)*bp, 1)
    d2c = d1c[bp:, :] - d1c[:-bp, :]                    # ((L-2)*bp, 1)
    d1 = jnp.concatenate([d1c, zpad], axis=0)           # (rows, 1)
    d2 = jnp.concatenate([d2c, zpad, zpad], axis=0)     # (rows, 1)

    # layer-0 input->hidden for ALL timesteps, with linear_proj_input folded in.
    # h1-half lanes are exactly zero (weights/bias packed with zero h1 halves).
    ihfull = xs * wf0 + d1 * wf1 + d2 * wf2 + bfold     # (rows, 2H)

    # Per-step additive terms for the fused recurrence, rows s*bp..: [ih0_s | b1]
    # (row-block L: [0 | b1]).  Step 0 is taken from `ihfull` directly (no b1), so the
    # h1 half of the carry stays exactly zero after step 0 (tanh(0) == 0).
    add_ref[...] = (jnp.concatenate([ihfull, jnp.zeros((bp, H2), jnp.float32)], axis=0)
                    + bvec)

    hcat = jnp.tanh(ihfull[0:bp, :])                    # step 0: [h0_0 | 0]
    acc = jnp.zeros((bp, H2), jnp.float32)              # sums [junk | sum_t h1_t]
    wbig = wbig_ref[...]

    # Wavefront-fused recurrence: at step s the single matmul produces both
    # h0_s (lanes 0..H-1) and h1_{s-1} (lanes H..2H-1).
    if L <= _UNROLL_MAX_STEPS:
        for s in range(1, L + 1):
            z = jnp.dot(hcat, wbig, preferred_element_type=jnp.float32,
                        precision=jax.lax.Precision.HIGHEST)
            hcat = jnp.tanh(z + add_ref[s * bp:(s + 1) * bp, :])
            acc = acc + hcat
    else:
        def body(s, carry):
            h, a = carry
            z = jnp.dot(h, wbig, preferred_element_type=jnp.float32,
                        precision=jax.lax.Precision.HIGHEST)
            r0 = pl.multiple_of(s * bp, bp)
            h = jnp.tanh(z + add_ref[pl.ds(r0, bp), :])
            return (h, a + h)
        hcat, acc = jax.lax.fori_loop(1, L + 1, body, (hcat, acc), unroll=4)

    # linear_post_rnn (H -> 1) + sum over time, reordered: reduce over time first, then a
    # lane reduction against [0 | wout] (the junk h0 half is multiplied by zero).
    y = jnp.sum(acc * woutp, axis=1, keepdims=True)     # (bp, 1)
    o_ref[...] = (y + float(L) * bout) * (1.0 / INPUT_SCALER)


# -------------------------------- parameter packing ---------------------------------------
def _pack_params(p):
    """Fold/stack the 7 small tensors into one (8,2H) slab + one (2H,2H) weight."""
    H = HIDDEN
    H2 = 2 * H
    hp = jax.lax.Precision.HIGHEST
    wih0, wih1 = p["wih"][0], p["wih"][1]               # (H,H) each (== weight_ih.T)
    whh0, whh1 = p["whh"][0], p["whh"][1]               # (H,H) each (== weight_hh.T)
    b0, b1 = p["brnn"][0], p["brnn"][1]                 # (1,H) each (== b_ih + b_hh)

    wf_fold = jnp.matmul(p["wf"], wih0, precision=hp)            # (3, H)
    bf_fold = jnp.matmul(p["bf"], wih0, precision=hp) + b0       # (1, H)

    misc = jnp.zeros((8, H2), jnp.float32)
    misc = misc.at[0:3, :H].set(wf_fold)                # rows 0-2: folded feature weights
    misc = misc.at[3, :H].set(bf_fold[0])               # row 3: folded layer-0 bias
    misc = misc.at[4, H:].set(b1[0])                    # row 4: layer-1 bias (h1 half)
    misc = misc.at[5, H:].set(p["wout"][0])             # row 5: output weights (h1 half)
    misc = misc.at[6, :].set(p["bout"][0, 0])           # row 6: output bias (broadcast)

    wbig = jnp.zeros((H2, H2), jnp.float32)             # [[W0hh, W1ih], [0, W1hh]]
    wbig = wbig.at[:H, :H].set(whh0)
    wbig = wbig.at[:H, H:].set(wih1)
    wbig = wbig.at[H:, H:].set(whh1)
    return misc, wbig


# ------------------------------------ wrapper ---------------------------------------------
def rv_rnn_conv_forward(x, params):
    """x: (B, L) float32 -> (B, 1) float32 (return_sum=True path)."""
    B, L = x.shape
    assert L > N_DIFF
    bp = max(8, ((B + 7) // 8) * 8)                     # batch padded to the sublane tile
    rows = L * bp
    H2 = 2 * HIDDEN

    # time-major, batch-padded column: row r = t*bp + b
    x_tm = jnp.zeros((L, bp), jnp.float32).at[:, :B].set(x.T.astype(jnp.float32))
    x_col = x_tm.reshape(rows, 1)
    misc, wbig = _pack_params(params)

    out_pad = pl.pallas_call(
        _rv_rnn_kernel,
        out_shape=jax.ShapeDtypeStruct((bp, 1), jnp.float32),
        grid=(1,),
        in_specs=[
            pl.BlockSpec((rows, 1), lambda i: (0, 0)),
            pl.BlockSpec((8, H2), lambda i: (0, 0)),
            pl.BlockSpec((H2, H2), lambda i: (0, 0)),
        ],
        out_specs=pl.BlockSpec((bp, 1), lambda i: (0, 0)),
        scratch_shapes=[pltpu.VMEM(((L + 1) * bp, H2), jnp.float32)],
        compiler_params=pltpu.CompilerParams(dimension_semantics=("arbitrary",)),
    )(x_col, misc, wbig)
    return out_pad[:B, :]


# --------------------------------- parameter init ----------------------------------------
def init_params(key):
    def nrm(k, shape, s):
        return (s * jax.random.normal(k, shape)).astype(jnp.float32)

    ks = jax.random.split(key, 7)
    return {
        # linear_proj_input: weight.T (3, PROJ_DIM), bias (1, PROJ_DIM)
        "wf":   nrm(ks[0], (N_DIFF + 1, PROJ_DIM), 0.3),
        "bf":   nrm(ks[1], (1, PROJ_DIM), 0.1),
        # RNN: per-layer weight_ih.T / weight_hh.T stacked; biases b_ih + b_hh combined
        "wih":  nrm(ks[2], (NUM_LAYERS, HIDDEN, HIDDEN), 0.15),
        "whh":  nrm(ks[3], (NUM_LAYERS, HIDDEN, HIDDEN), 0.15),
        "brnn": nrm(ks[4], (NUM_LAYERS, 1, HIDDEN), 0.1),
        # linear_post_rnn: weight (1, HIDDEN), bias (1, 1)
        "wout": nrm(ks[5], (1, HIDDEN), 0.2),
        "bout": nrm(ks[6], (1, 1), 0.1),
    }


# ------------------------------- pure-JAX reference --------------------------------------
def reference_forward(x, p):
    B, L = x.shape
    xs = x * INPUT_SCALER
    d1u = xs[:, 1:] - xs[:, :-1]                        # unpadded 1st diff
    d2u = d1u[:, 1:] - d1u[:, :-1]                      # 2nd diff on unpadded 1st diff
    d1 = jnp.pad(d1u, ((0, 0), (0, 1)))
    d2 = jnp.pad(d2u, ((0, 0), (0, 2)))
    feat = jnp.stack([xs, d1, d2], axis=-1)             # (B, L, 3)
    cur = feat @ p["wf"] + p["bf"]                      # (B, L, PROJ_DIM)
    for l in range(NUM_LAYERS):
        h = jnp.zeros((B, HIDDEN), jnp.float32)
        outs = []
        for t in range(L):
            h = jnp.tanh(cur[:, t, :] @ p["wih"][l] + p["brnn"][l] + h @ p["whh"][l])
            outs.append(h)
        cur = jnp.stack(outs, axis=1)                   # (B, L, HIDDEN)
    y = cur @ p["wout"].T + p["bout"]                   # (B, L, 1)
    return jnp.sum(y, axis=1) / INPUT_SCALER            # (B, 1)


# -------------------------------------- main ----------------------------------------------
if __name__ == "__main__":
    B, L = 2, 16
    key = jax.random.PRNGKey(0)
    kx, kp = jax.random.split(key)
    # small raw values so input_scaler * x is O(1), as intended by the module
    x = (1e-4 * jax.random.normal(kx, (B, L))).astype(jnp.float32)
    params = init_params(kp)

    out = jax.block_until_ready(rv_rnn_conv_forward(x, params))
    assert out.shape == (B, 1)

    ref = reference_forward(x, params)
    if not bool(jnp.allclose(out, ref, rtol=2e-2, atol=2e-5)):
        raise SystemExit(f"mismatch: pallas={out} ref={ref}")

    print("KERNEL_OK")
</pallas_src>

<mosaic_0001>
module attributes {stable_mosaic.version = 11 : i64} {
  func.func @_rv_rnn_kernel(%arg0: i32, %arg1: memref<128x1xf32, #tpu.memory_space<vmem>>, %arg2: memref<8x64xf32, #tpu.memory_space<vmem>>, %arg3: memref<64x64xf32, #tpu.memory_space<vmem>>, %arg4: memref<8x1xf32, #tpu.memory_space<vmem>>, %arg5: memref<136x64xf32, #tpu.memory_space<vmem>>) attributes {dimension_semantics = [#tpu.dimension_semantics<arbitrary>], iteration_bounds = array<i64: 1>, scalar_prefetch = 0 : i64, scratch_operands = 1 : i64, tpu.core_type = #tpu.core_type<tc>, window_params = [{pipeline_mode = #tpu.pipeline_mode<synchronous>, transform_indices = @transform_0, window_bounds = array<i64: 128, 1>}, {pipeline_mode = #tpu.pipeline_mode<synchronous>, transform_indices = @transform_1, window_bounds = array<i64: 8, 64>}, {pipeline_mode = #tpu.pipeline_mode<synchronous>, transform_indices = @transform_2, window_bounds = array<i64: 64, 64>}, {pipeline_mode = #tpu.pipeline_mode<synchronous>, transform_indices = @transform_3, window_bounds = array<i64: 8, 1>}]} {
    %c0 = arith.constant 0 : index
    %c0_0 = arith.constant 0 : index
    %0 = vector.load %arg2[%c0, %c0_0] : memref<8x64xf32, #tpu.memory_space<vmem>>, vector<1x64xf32>
    %c1 = arith.constant 1 : index
    %c0_1 = arith.constant 0 : index
    %1 = vector.load %arg2[%c1, %c0_1] : memref<8x64xf32, #tpu.memory_space<vmem>>, vector<1x64xf32>
    %c2 = arith.constant 2 : index
    %c0_2 = arith.constant 0 : index
    %2 = vector.load %arg2[%c2, %c0_2] : memref<8x64xf32, #tpu.memory_space<vmem>>, vector<1x64xf32>
    %c3 = arith.constant 3 : index
    %c0_3 = arith.constant 0 : index
    %3 = vector.load %arg2[%c3, %c0_3] : memref<8x64xf32, #tpu.memory_space<vmem>>, vector<1x64xf32>
    %c4 = arith.constant 4 : index
    %c0_4 = arith.constant 0 : index
    %4 = vector.load %arg2[%c4, %c0_4] : memref<8x64xf32, #tpu.memory_space<vmem>>, vector<1x64xf32>
    %c5 = arith.constant 5 : index
    %c0_5 = arith.constant 0 : index
    %5 = vector.load %arg2[%c5, %c0_5] : memref<8x64xf32, #tpu.memory_space<vmem>>, vector<1x64xf32>
    %c6 = arith.constant 6 : index
    %c0_6 = arith.constant 0 : index
    %6 = vector.load %arg2[%c6, %c0_6] : memref<8x64xf32, #tpu.memory_space<vmem>>, vector<1x1xf32>
    %c0_7 = arith.constant 0 : index
    %c0_8 = arith.constant 0 : index
    %7 = vector.load %arg1[%c0_7, %c0_8] : memref<128x1xf32, #tpu.memory_space<vmem>>, vector<128x1xf32>
    %cst = arith.constant 1.000000e+04 : f32
    %8 = vector.broadcast %cst : f32 to vector<128x1xf32>
    %9 = arith.mulf %7, %8 : vector<128x1xf32>
    %cst_9 = arith.constant 0.000000e+00 : f32
    %10 = vector.broadcast %cst_9 : f32 to vector<8x1xf32>
    %11 = vector.extract_strided_slice %9 {offsets = [8, 0], sizes = [120, 1], strides = [1, 1]} : vector<128x1xf32> to vector<120x1xf32>
    %12 = vector.extract_strided_slice %9 {offsets = [0, 0], sizes = [120, 1], strides = [1, 1]} : vector<128x1xf32> to vector<120x1xf32>
    %13 = arith.subf %11, %12 : vector<120x1xf32>
    %14 = vector.extract_strided_slice %13 {offsets = [8, 0], sizes = [112, 1], strides = [1, 1]} : vector<120x1xf32> to vector<112x1xf32>
    %15 = vector.extract_strided_slice %13 {offsets = [0, 0], sizes = [112, 1], strides = [1, 1]} : vector<120x1xf32> to vector<112x1xf32>
    %16 = arith.subf %14, %15 : vector<112x1xf32>
    %17 = tpu.concatenate %13, %10 in 0 : vector<120x1xf32>, vector<8x1xf32> -> vector<128x1xf32>
    %18 = tpu.concatenate %16, %10, %10 in 0 : vector<112x1xf32>, vector<8x1xf32>, vector<8x1xf32> -> vector<128x1xf32>
    %19 = vector.broadcast %9 : vector<128x1xf32> to vector<128x64xf32>
    %20 = vector.broadcast %0 : vector<1x64xf32> to vector<128x64xf32>
    %21 = arith.mulf %19, %20 : vector<128x64xf32>
    %22 = vector.broadcast %17 : vector<128x1xf32> to vector<128x64xf32>
    %23 = vector.broadcast %1 : vector<1x64xf32> to vector<128x64xf32>
    %24 = arith.mulf %22, %23 : vector<128x64xf32>
    %25 = arith.addf %21, %24 : vector<128x64xf32>
    %26 = vector.broadcast %18 : vector<128x1xf32> to vector<128x64xf32>
    %27 = vector.broadcast %2 : vector<1x64xf32> to vector<128x64xf32>
    %28 = arith.mulf %26, %27 : vector<128x64xf32>
    %29 = arith.addf %25, %28 : vector<128x64xf32>
    %30 = vector.broadcast %3 : vector<1x64xf32> to vector<128x64xf32>
    %31 = arith.addf %29, %30 : vector<128x64xf32>
    %cst_10 = arith.constant 0.000000e+00 : f32
    %32 = vector.broadcast %cst_10 : f32 to vector<8x64xf32>
    %33 = tpu.concatenate %31, %32 in 0 : vector<128x64xf32>, vector<8x64xf32> -> vector<136x64xf32>
    %34 = vector.broadcast %4 : vector<1x64xf32> to vector<136x64xf32>
    %35 = arith.addf %33, %34 : vector<136x64xf32>
    %c0_11 = arith.constant 0 : index
    %c0_12 = arith.constant 0 : index
    %36 = vector.load %arg5[%c0_11, %c0_12] : memref<136x64xf32, #tpu.memory_space<vmem>>, vector<136x64xf32>
    tpu.vector_store %arg5[%c0_11, %c0_12], %35 {strides = array<i32>} : memref<136x64xf32, #tpu.memory_space<vmem>>, vector<136x64xf32>,
    %37 = vector.extract_strided_slice %31 {offsets = [0, 0], sizes = [8, 64], strides = [1, 1]} : vector<128x64xf32> to vector<8x64xf32>
    %38 = math.tanh %37 : vector<8x64xf32>
    %cst_13 = arith.constant 0.000000e+00 : f32
    %39 = vector.broadcast %cst_13 : f32 to vector<8x64xf32>
    %c0_14 = arith.constant 0 : index
    %c0_15 = arith.constant 0 : index
    %40 = vector.load %arg3[%c0_14, %c0_15] : memref<64x64xf32, #tpu.memory_space<vmem>>, vector<64x64xf32>
    %cst_16 = arith.constant dense<0.000000e+00> : vector<8x64xf32>
    %41 = tpu.matmul %38, %40, %cst_16 {dimension_numbers = #tpu.dot_dimension_numbers<[1], [0], [0], [1], [0, 0, 1, 1], [], []>, precision = #tpu.contract_precision<fp32>} : vector<8x64xf32>, vector<64x64xf32>, vector<8x64xf32> -> vector<8x64xf32>
    %c8 = arith.constant 8 : index
    %c0_17 = arith.constant 0 : index
    %42 = vector.load %arg5[%c8, %c0_17] : memref<136x64xf32, #tpu.memory_space<vmem>>, vector<8x64xf32>
    %43 = arith.addf %41, %42 : vector<8x64xf32>
    %44 = math.tanh %43 : vector<8x64xf32>
    %45 = arith.addf %39, %44 : vector<8x64xf32>
    %cst_18 = arith.constant dense<0.000000e+00> : vector<8x64xf32>
    %46 = tpu.matmul %44, %40, %cst_18 {dimension_numbers = #tpu.dot_dimension_numbers<[1], [0], [0], [1], [0, 0, 1, 1], [], []>, precision = #tpu.contract_precision<fp32>} : vector<8x64xf32>, vector<64x64xf32>, vector<8x64xf32> -> vector<8x64xf32>
    %c16 = arith.constant 16 : index
    %c0_19 = arith.constant 0 : index
    %47 = vector.load %arg5[%c16, %c0_19] : memref<136x64xf32, #tpu.memory_space<vmem>>, vector<8x64xf32>
    %48 = arith.addf %46, %47 : vector<8x64xf32>
    %49 = math.tanh %48 : vector<8x64xf32>
    %50 = arith.addf %45, %49 : vector<8x64xf32>
    %cst_20 = arith.constant dense<0.000000e+00> : vector<8x64xf32>
    %51 = tpu.matmul %49, %40, %cst_20 {dimension_numbers = #tpu.dot_dimension_numbers<[1], [0], [0], [1], [0, 0, 1, 1], [], []>, precision = #tpu.contract_precision<fp32>} : vector<8x64xf32>, vector<64x64xf32>, vector<8x64xf32> -> vector<8x64xf32>
    %c24 = arith.constant 24 : index
    %c0_21 = arith.constant 0 : index
    %52 = vector.load %arg5[%c24, %c0_21] : memref<136x64xf32, #tpu.memory_space<vmem>>, vector<8x64xf32>
    %53 = arith.addf %51, %52 : vector<8x64xf32>
    %54 = math.tanh %53 : vector<8x64xf32>
    %55 = arith.addf %50, %54 : vector<8x64xf32>
    %cst_22 = arith.constant dense<0.000000e+00> : vector<8x64xf32>
    %56 = tpu.matmul %54, %40, %cst_22 {dimension_numbers = #tpu.dot_dimension_numbers<[1], [0], [0], [1], [0, 0, 1, 1], [], []>, precision = #tpu.contract_precision<fp32>} : vector<8x64xf32>, vector<64x64xf32>, vector<8x64xf32> -> vector<8x64xf32>
    %c32 = arith.constant 32 : index
    %c0_23 = arith.constant 0 : index
    %57 = vector.load %arg5[%c32, %c0_23] : memref<136x64xf32, #tpu.memory_space<vmem>>, vector<8x64xf32>
    %58 = arith.addf %56, %57 : vector<8x64xf32>
    %59 = math.tanh %58 : vector<8x64xf32>
    %60 = arith.addf %55, %59 : vector<8x64xf32>
    %cst_24 = arith.constant dense<0.000000e+00> : vector<8x64xf32>
    %61 = tpu.matmul %59, %40, %cst_24 {dimension_numbers = #tpu.dot_dimension_numbers<[1], [0], [0], [1], [0, 0, 1, 1], [], []>, precision = #tpu.contract_precision<fp32>} : vector<8x64xf32>, vector<64x64xf32>, vector<8x64xf32> -> vector<8x64xf32>
    %c40 = arith.constant 40 : index
    %c0_25 = arith.constant 0 : index
    %62 = vector.load %arg5[%c40, %c0_25] : memref<136x64xf32, #tpu.memory_space<vmem>>, vector<8x64xf32>
    %63 = arith.addf %61, %62 : vector<8x64xf32>
    %64 = math.tanh %63 : vector<8x64xf32>
    %65 = arith.addf %60, %64 : vector<8x64xf32>
    %cst_26 = arith.constant dense<0.000000e+00> : vector<8x64xf32>
    %66 = tpu.matmul %64, %40, %cst_26 {dimension_numbers = #tpu.dot_dimension_numbers<[1], [0], [0], [1], [0, 0, 1, 1], [], []>, precision = #tpu.contract_precision<fp32>} : vector<8x64xf32>, vector<64x64xf32>, vector<8x64xf32> -> vector<8x64xf32>
    %c48 = arith.constant 48 : index
    %c0_27 = arith.constant 0 : index
    %67 = vector.load %arg5[%c48, %c0_27] : memref<136x64xf32, #tpu.memory_space<vmem>>, vector<8x64xf32>
    %68 = arith.addf %66, %67 : vector<8x64xf32>
    %69 = math.tanh %68 : vector<8x64xf32>
    %70 = arith.addf %65, %69 : vector<8x64xf32>
    %cst_28 = arith.constant dense<0.000000e+00> : vector<8x64xf32>
    %71 = tpu.matmul %69, %40, %cst_28 {dimension_numbers = #tpu.dot_dimension_numbers<[1], [0], [0], [1], [0, 0, 1, 1], [], []>, precision = #tpu.contract_precision<fp32>} : vector<8x64xf32>, vector<64x64xf32>, vector<8x64xf32> -> vector<8x64xf32>
    %c56 = arith.constant 56 : index
    %c0_29 = arith.constant 0 : index
    %72 = vector.load %arg5[%c56, %c0_29] : memref<136x64xf32, #tpu.memory_space<vmem>>, vector<8x64xf32>
    %73 = arith.addf %71, %72 : vector<8x64xf32>
    %74 = math.tanh %73 : vector<8x64xf32>
    %75 = arith.addf %70, %74 : vector<8x64xf32>
    %cst_30 = arith.constant dense<0.000000e+00> : vector<8x64xf32>
    %76 = tpu.matmul %74, %40, %cst_30 {dimension_numbers = #tpu.dot_dimension_numbers<[1], [0], [0], [1], [0, 0, 1, 1], [], []>, precision = #tpu.contract_precision<fp32>} : vector<8x64xf32>, vector<64x64xf32>, vector<8x64xf32> -> vector<8x64xf32>
    %c64 = arith.constant 64 : index
    %c0_31 = arith.constant 0 : index
    %77 = vector.load %arg5[%c64, %c0_31] : memref<136x64xf32, #tpu.memory_space<vmem>>, vector<8x64xf32>
    %78 = arith.addf %76, %77 : vector<8x64xf32>
    %79 = math.tanh %78 : vector<8x64xf32>
    %80 = arith.addf %75, %79 : vector<8x64xf32>
    %cst_32 = arith.constant dense<0.000000e+00> : vector<8x64xf32>
    %81 = tpu.matmul %79, %40, %cst_32 {dimension_numbers = #tpu.dot_dimension_numbers<[1], [0], [0], [1], [0, 0, 1, 1], [], []>, precision = #tpu.contract_precision<fp32>} : vector<8x64xf32>, vector<64x64xf32>, vector<8x64xf32> -> vector<8x64xf32>
    %c72 = arith.constant 72 : index
    %c0_33 = arith.constant 0 : index
    %82 = vector.load %arg5[%c72, %c0_33] : memref<136x64xf32, #tpu.memory_space<vmem>>, vector<8x64xf32>
    %83 = arith.addf %81, %82 : vector<8x64xf32>
    %84 = math.tanh %83 : vector<8x64xf32>
    %85 = arith.addf %80, %84 : vector<8x64xf32>
    %cst_34 = arith.constant dense<0.000000e+00> : vector<8x64xf32>
    %86 = tpu.matmul %84, %40, %cst_34 {dimension_numbers = #tpu.dot_dimension_numbers<[1], [0], [0], [1], [0, 0, 1, 1], [], []>, precision = #tpu.contract_precision<fp32>} : vector<8x64xf32>, vector<64x64xf32>, vector<8x64xf32> -> vector<8x64xf32>
    %c80 = arith.constant 80 : index
    %c0_35 = arith.constant 0 : index
    %87 = vector.load %arg5[%c80, %c0_35] : memref<136x64xf32, #tpu.memory_space<vmem>>, vector<8x64xf32>
    %88 = arith.addf %86, %87 : vector<8x64xf32>
    %89 = math.tanh %88 : vector<8x64xf32>
    %90 = arith.addf %85, %89 : vector<8x64xf32>
    %cst_36 = arith.constant dense<0.000000e+00> : vector<8x64xf32>
    %91 = tpu.matmul %89, %40, %cst_36 {dimension_numbers = #tpu.dot_dimension_numbers<[1], [0], [0], [1], [0, 0, 1, 1], [], []>, precision = #tpu.contract_precision<fp32>} : vector<8x64xf32>, vector<64x64xf32>, vector<8x64xf32> -> vector<8x64xf32>
    %c88 = arith.constant 88 : index
    %c0_37 = arith.constant 0 : index
    %92 = vector.load %arg5[%c88, %c0_37] : memref<136x64xf32, #tpu.memory_space<vmem>>, vector<8x64xf32>
    %93 = arith.addf %91, %92 : vector<8x64xf32>
    %94 = math.tanh %93 : vector<8x64xf32>
    %95 = arith.addf %90, %94 : vector<8x64xf32>
    %cst_38 = arith.constant dense<0.000000e+00> : vector<8x64xf32>
    %96 = tpu.matmul %94, %40, %cst_38 {dimension_numbers = #tpu.dot_dimension_numbers<[1], [0], [0], [1], [0, 0, 1, 1], [], []>, precision = #tpu.contract_precision<fp32>} : vector<8x64xf32>, vector<64x64xf32>, vector<8x64xf32> -> vector<8x64xf32>
    %c96 = arith.constant 96 : index
    %c0_39 = arith.constant 0 : index
    %97 = vector.load %arg5[%c96, %c0_39] : memref<136x64xf32, #tpu.memory_space<vmem>>, vector<8x64xf32>
    %98 = arith.addf %96, %97 : vector<8x64xf32>
    %99 = math.tanh %98 : vector<8x64xf32>
    %100 = arith.addf %95, %99 : vector<8x64xf32>
    %cst_40 = arith.constant dense<0.000000e+00> : vector<8x64xf32>
    %101 = tpu.matmul %99, %40, %cst_40 {dimension_numbers = #tpu.dot_dimension_numbers<[1], [0], [0], [1], [0, 0, 1, 1], [], []>, precision = #tpu.contract_precision<fp32>} : vector<8x64xf32>, vector<64x64xf32>, vector<8x64xf32> -> vector<8x64xf32>
    %c104 = arith.constant 104 : index
    %c0_41 = arith.constant 0 : index
    %102 = vector.load %arg5[%c104, %c0_41] : memref<136x64xf32, #tpu.memory_space<vmem>>, vector<8x64xf32>
    %103 = arith.addf %101, %102 : vector<8x64xf32>
    %104 = math.tanh %103 : vector<8x64xf32>
    %105 = arith.addf %100, %104 : vector<8x64xf32>
    %cst_42 = arith.constant dense<0.000000e+00> : vector<8x64xf32>
    %106 = tpu.matmul %104, %40, %cst_42 {dimension_numbers = #tpu.dot_dimension_numbers<[1], [0], [0], [1], [0, 0, 1, 1], [], []>, precision = #tpu.contract_precision<fp32>} : vector<8x64xf32>, vector<64x64xf32>, vector<8x64xf32> -> vector<8x64xf32>
    %c112 = arith.constant 112 : index
    %c0_43 = arith.constant 0 : index
    %107 = vector.load %arg5[%c112, %c0_43] : memref<136x64xf32, #tpu.memory_space<vmem>>, vector<8x64xf32>
    %108 = arith.addf %106, %107 : vector<8x64xf32>
    %109 = math.tanh %108 : vector<8x64xf32>
    %110 = arith.addf %105, %109 : vector<8x64xf32>
    %cst_44 = arith.constant dense<0.000000e+00> : vector<8x64xf32>
    %111 = tpu.matmul %109, %40, %cst_44 {dimension_numbers = #tpu.dot_dimension_numbers<[1], [0], [0], [1], [0, 0, 1, 1], [], []>, precision = #tpu.contract_precision<fp32>} : vector<8x64xf32>, vector<64x64xf32>, vector<8x64xf32> -> vector<8x64xf32>
    %c120 = arith.constant 120 : index
    %c0_45 = arith.constant 0 : index
    %112 = vector.load %arg5[%c120, %c0_45] : memref<136x64xf32, #tpu.memory_space<vmem>>, vector<8x64xf32>
    %113 = arith.addf %111, %112 : vector<8x64xf32>
    %114 = math.tanh %113 : vector<8x64xf32>
    %115 = arith.addf %110, %114 : vector<8x64xf32>
    %cst_46 = arith.constant dense<0.000000e+00> : vector<8x64xf32>
    %116 = tpu.matmul %114, %40, %cst_46 {dimension_numbers = #tpu.dot_dimension_numbers<[1], [0], [0], [1], [0, 0, 1, 1], [], []>, precision = #tpu.contract_precision<fp32>} : vector<8x64xf32>, vector<64x64xf32>, vector<8x64xf32> -> vector<8x64xf32>
    %c128 = arith.constant 128 : index
    %c0_47 = arith.constant 0 : index
    %117 = vector.load %arg5[%c128, %c0_47] : memref<136x64xf32, #tpu.memory_space<vmem>>, vector<8x64xf32>
    %118 = arith.addf %116, %117 : vector<8x64xf32>
    %119 = math.tanh %118 : vector<8x64xf32>
    %120 = arith.addf %115, %119 : vector<8x64xf32>
    %121 = vector.broadcast %5 : vector<1x64xf32> to vector<8x64xf32>
    %122 = arith.mulf %120, %121 : vector<8x64xf32>
    %cst_48 = arith.constant dense<0.000000e+00> : vector<8xf32>
    %123 = vector.multi_reduction <add>, %122, %cst_48 [1] : vector<8x64xf32> to vector<8xf32>
    %124 = vector.shape_cast %123 : vector<8xf32> to vector<8x1xf32>
    %cst_49 = arith.constant 1.600000e+01 : f32
    %125 = vector.broadcast %cst_49 : f32 to vector<1x1xf32>
    %126 = arith.mulf %125, %6 : vector<1x1xf32>
    %127 = vector.broadcast %126 : vector<1x1xf32> to vector<8x1xf32>
    %128 = arith.addf %124, %127 : vector<8x1xf32>
    %cst_50 = arith.constant 9.99999974E-5 : f32
    %129 = vector.broadcast %cst_50 : f32 to vector<8x1xf32>
    %130 = arith.mulf %128, %129 : vector<8x1xf32>
    %c0_51 = arith.constant 0 : index
    %c0_52 = arith.constant 0 : index
    %131 = vector.load %arg4[%c0_51, %c0_52] : memref<8x1xf32, #tpu.memory_space<vmem>>, vector<8x1xf32>
    tpu.vector_store %arg4[%c0_51, %c0_52], %130 {strides = array<i32>} : memref<8x1xf32, #tpu.memory_space<vmem>>, vector<8x1xf32>,
    return
  }
  func.func @transform_0(%arg0: i32) -> (i32, i32) {
    %c0_i32 = arith.constant 0 : i32
    %c0_i32_0 = arith.constant 0 : i32
    %c0_i32_1 = arith.constant 0 : i32
    return %c0_i32, %c0_i32_0 : i32, i32
  }
  func.func @transform_1(%arg0: i32) -> (i32, i32) {
    %c0_i32 = arith.constant 0 : i32
    %c0_i32_0 = arith.constant 0 : i32
    %c0_i32_1 = arith.constant 0 : i32
    return %c0_i32, %c0_i32_0 : i32, i32
  }
  func.func @transform_2(%arg0: i32) -> (i32, i32) {
    %c0_i32 = arith.constant 0 : i32
    %c0_i32_0 = arith.constant 0 : i32
    %c0_i32_1 = arith.constant 0 : i32
    return %c0_i32, %c0_i32_0 : i32, i32
  }
  func.func @transform_3(%arg0: i32) -> (i32, i32) {
    %c0_i32 = arith.constant 0 : i32
    %c0_i32_0 = arith.constant 0 : i32
    %c0_i32_1 = arith.constant 0 : i32
    return %c0_i32, %c0_i32_0 : i32, i32
  }
}

</mosaic_0001>

<bundles_post_ra>
// kernel: tpu_custom_call.1
= control target key start
LH: loop header
LB: loop body
LE: loop exit
PB: predicated region body
PF: predicated region fallthrough
CT: control target
= control target key end

     0   :  { %v11913_v0 = vmov 0   ;;  %vm444_vm0 = vcmask 523264   ;;  %v11914_v24 = vmov 0.0   ;;  %vm11915_vm1 = vmmov 0   ;;  %s14151_s0 = inlined_call_operand.vmem [shape: f32[128,1], index: 0, kind: input, shape index: {}]   ;;  %s14152_s2 = inlined_call_operand.vmem [shape: f32[64,64], index: 2, kind: input, shape index: {}]   ;;  %s14153_s1 = inlined_call_operand.vmem [shape: f32[8,64], index: 1, kind: input, shape index: {}]   ;;  %s14154_s3 = inlined_call_operand.vmem [shape: f32[8,1], index: 3, kind: output, shape index: {}]  }
   0x1   :  { %11877 = vset.pattern.permute.xlu0 %v11913_v0  ;;  %v21_v1 = vld [vmem:[%s14151_s0] sm:$0xff]  ;;  %v22_v2 = vld [vmem:[%s14151_s0 + $0x8] sm:$0xff]  ;;  %11878 = vset.pattern.permute.xlu1 %v11913_v0  ;;  %v23_v3 = vld [vmem:[%s14151_s0 + $0x10] sm:$0xff]  ;;  %vm9174_vm2 = vcmask 7168  }
   0x2   :  { %v37_v4 = vmul.f32 10000.0, %v21_v1  ;;  %v38_v5 = vmul.f32 10000.0, %v22_v2  ;;  %v39_v6 = vmul.f32 10000.0, %v23_v3  ;;  %v24_v7 = vld [vmem:[%s14151_s0 + $0x18] sm:$0xff]  ;;  %v25_v11 = vld [vmem:[%s14151_s0 + $0x20] sm:$0xff]  ;;  %v469_v17 = vld [vmem:[%s14152_s2 + $0x30] sm:$0xff]  ;;  %10069 = vmatprep.subr.mxu1 %v11914_v24  ;;  %10050 = vmatprep.subr.mxu0 %v11914_v24 }
   0x3   :  { %v11948_v10 = vmul.f32 10000.0, %v24_v7  ;;  %v11954_v14 = vmul.f32 10000.0, %v25_v11  ;;  %v470_v15 = vld [vmem:[%s14152_s2 + $0x38] sm:$0xff]  ;;  %v11962_v16 = vld [vmem:[%s14153_s1 + $0x4] ss:$0 sm:$0xff]  ;;  %v468_v18 = vld [vmem:[%s14152_s2 + $0x28] sm:$0xff]  ;;  %10085 = vmatprep.mubr.msk.f32.mxu1 %vm11915_vm1, %v11914_v24  ;;  %10066 = vmatprep.mubr.msk.f32.mxu0 %vm11915_vm1, %v11914_v24 }
   0x4   :  { %84 = vperm.xlu0 %11877, %v37_v4   ;;  %v53_v8 = vsub.f32 %v38_v5, %v37_v4  ;;  %v54_v9 = vsub.f32 %v39_v6, %v38_v5  ;;  %461 = vst.msk [vmem:[#allocation2 + $0x80] sm:$0xff] %vm444_vm0, %v11962_v16  ;;  %v467_v21 = vld [vmem:[%s14152_s2 + $0x20] sm:$0xff]  ;;  %v466_v22 = vld [vmem:[%s14152_s2 + $0x18] sm:$0xff]  ;;  %v26_v23 = vld [vmem:[%s14151_s0 + $0x28] sm:$0xff]  ;;  %v11986_v25 = vand.u32 4294901760, %v470_v15  ;;  %v11989_v26 = vand.u32 4294901760, %v469_v17 }
   0x5   :  { %v55_v13 = vsub.f32 %v11948_v10, %v39_v6  ;;  %v11972_v20 = vsub.f32 %v11954_v14, %v11948_v10  ;;  %v11991_v27 = vand.u32 4294901760, %v468_v18  ;;  %v465_v28 = vld [vmem:[%s14152_s2 + $0x10] sm:$0xff]  ;;  %v11999_v30 = vand.u32 4294901760, %v467_v21  ;;  %v464_v36 = vld [vmem:[%s14152_s2 + $0x8] sm:$0xff]  ;;  %v463_v47 = vld [vmem:[%s14152_s2] sm:$0xff] }
   0x6   :  { %v68_v12 = vsub.f32 %v54_v9, %v53_v8  ;;  %v11997_v29 = vsub.f32 %v470_v15, %v11986_v25  ;;  %10051 = vmatpush3.msra.mxu0 %v11986_v25  ;;  %v12002_v31 = vand.u32 4294901760, %v466_v22  ;;  %v12005_v33 = vmul.f32 10000.0, %v26_v23  ;;  %v27_v37 = vld [vmem:[%s14151_s0 + $0x30] sm:$0xff]  ;;  %v28_v61 = vld [vmem:[%s14151_s0 + $0x38] sm:$0xff] }
   0x7   :  { %v69_v19 = vsub.f32 %v55_v13, %v54_v9  ;;  %v70_v32 = vsub.f32 %v11972_v20, %v55_v13  ;;  %v12008_v34 = vsub.f32 %v469_v17, %v11989_v26  ;;  %v12011_v35 = vsub.f32 %v468_v18, %v11991_v27  ;;  %10052 = vmatprep.subr.mxu0 %v11914_v24  ;;  %v31_v23 = vld [vmem:[%s14151_s0 + $0x50] sm:$0xff] }
   0x8   :  { %184 = vperm.xlu0 %11877, %v53_v8   ;;  %300 = vperm.xlu1 %11878, %v68_v12   ;;  %v12020_v38 = vand.u32 4294901760, %v11997_v29  ;;  %v12023_v39 = vsub.f32 %v467_v21, %v11999_v30  ;;  %v12026_v40 = vand.u32 4294901760, %v465_v28  ;;  %v12035_v43 = vsub.f32 %v466_v22, %v12002_v31 }
   0x9   :  { %v12029_v41 = vand.u32 4294901760, %v12008_v34  ;;  %v12032_v42 = vand.u32 4294901760, %v12011_v35  ;;  %10053 = vmatpush3.msra.mxu0 %v11989_v26  ;;  %v12044_v46 = vand.u32 4294901760, %v464_v36  ;;  %v57_v48 = vsub.f32 %v12005_v33, %v11954_v14 }
   0xa   :  { %v578_v44 = vsub.f32 %v11997_v29, %v12020_v38  ;;  %v12041_v45 = vand.u32 4294901760, %v12023_v39  ;;  %10054 = vmatprep.subr.mxu0 %v11914_v24  ;;  %v12051_v49 = vmul.f32 10000.0, %v27_v37  ;;  %v12060_v53 = vsub.f32 %v465_v28, %v12026_v40  ;;  %v32_v37 = vld [vmem:[%s14151_s0 + $0x58] sm:$0xff] }
   0xb   :  { %v585_v50 = vsub.f32 %v12008_v34, %v12029_v41  ;;  %v592_v52 = vsub.f32 %v12011_v35, %v12032_v42  ;;  %10055 = vmatpush3.msra.mxu0 %v11991_v27  ;;  %v12066_v55 = vand.u32 4294901760, %v12035_v43  ;;  %v12069_v56 = vand.u32 4294901760, %v463_v47 }
   0xc   :  { %189 = vperm.xlu0 %11877, %v54_v9   ;;  %89 = vperm.xlu1 %11878, %v38_v5   ;;  %v12055_v51 = vand.u32 4294901760, %v578_v44  ;;  %v599_v57 = vsub.f32 %v12023_v39, %v12041_v45  ;;  %v12075_v58 = vsub.f32 %v464_v36, %v12044_v46  ;;  %v71_v59 = vsub.f32 %v57_v48, %v11972_v20 }
   0xd   :  { %v12063_v54 = vand.u32 4294901760, %v585_v50  ;;  %10056 = vmatprep.subr.mxu0 %v11914_v24  ;;  %v58_v60 = vsub.f32 %v12051_v49, %v12005_v33  ;;  %v12087_v62 = vand.u32 4294901760, %v592_v52  ;;  %v12090_v63 = vand.u32 4294901760, %v12060_v53 }
   0xe   :  { %10070 = vmatpush3.msra.mxu1 %v12055_v51  ;;  %10057 = vmatpush3.msra.mxu0 %v11999_v30  ;;  %v606_v0 = vsub.f32 %v12035_v43, %v12066_v55  ;;  %v12097_v1 = vsub.f32 %v463_v47, %v12069_v56  ;;  %v12101_v2 = vand.u32 4294901760, %v599_v57  ;;  %v12104_v3 = vand.u32 4294901760, %v12075_v58 }
   0xf   :  { %10071 = vmatprep.subr.mxu1 %v11914_v24  ;;  %10058 = vmatprep.subr.mxu0 %v11914_v24  ;;  %v72_v4 = vsub.f32 %v58_v60, %v57_v48  ;;  %v44_v5 = vmul.f32 10000.0, %v28_v61  ;;  %v613_v7 = vsub.f32 %v12060_v53, %v12090_v63  ;;  %v48_v47 = vmul.f32 10000.0, %v32_v37 }
  0x10   :  { %94 = vperm.xlu0 %11877, %v39_v6   ;;  %305 = vperm.xlu1 %11878, %v69_v19   ;;  %v29_v6 = vld [vmem:[%s14151_s0 + $0x40] sm:$0xff]  ;;  %v12117_v8 = vand.u32 4294901760, %v606_v0  ;;  %v12120_v9 = vand.u32 4294901760, %v12097_v1  ;;  %v30_v19 = vld [vmem:[%s14151_s0 + $0x48] sm:$0xff]  ;;  %v35_v0 = vld [vmem:[%s14151_s0 + $0x70] sm:$0xff] }
  0x11   :  { %10072 = vmatpush3.msra.mxu1 %v12063_v54  ;;  %10059 = vmatpush3.msra.mxu0 %v12002_v31  ;;  %v59_v11 = vsub.f32 %v44_v5, %v12051_v49  ;;  %v45_v12 = vmul.f32 10000.0, %v29_v6  ;;  %v46_v22 = vmul.f32 10000.0, %v30_v19  ;;  %v12177_v19 = vld [vmem:[%s14153_s1] ss:$0 sm:$0xff] }
  0x12   :  { %10073 = vmatprep.subr.mxu1 %v11914_v24  ;;  %10060 = vmatprep.subr.mxu0 %v11914_v24 }
  0x13   :  { %10074 = vmatpush3.msra.mxu1 %v12087_v62  ;;  %10061 = vmatpush3.msra.mxu0 %v12026_v40  ;;  %v73_v17 = vsub.f32 %v59_v11, %v58_v60  ;;  %v60_v18 = vsub.f32 %v45_v12, %v44_v5  ;;  %v61_v28 = vsub.f32 %v46_v22, %v45_v12 }
  0x14   :  { %310 = vperm.xlu0 %11877, %v70_v32   ;;  %194 = vperm.xlu1 %11878, %v55_v13   ;;  %v12129_v13 = vand.u32 4294901760, %v613_v7  ;;  %v47_v32 = vmul.f32 10000.0, %v31_v23 }
  0x15   :  { %10075 = vmatprep.subr.mxu1 %v11914_v24  ;;  %10062 = vmatprep.subr.mxu0 %v11914_v24  ;;  %v74_v21 = vsub.f32 %v60_v18, %v59_v11 }
  0x16   :  { %10076 = vmatpush3.msra.mxu1 %v12101_v2  ;;  %10063 = vmatpush3.msra.mxu0 %v12044_v46  ;;  %v62_v36 = vsub.f32 %v47_v32, %v46_v22 }
  0x17   :  { %10077 = vmatprep.subr.mxu1 %v11914_v24  ;;  %10064 = vmatprep.subr.mxu0 %v11914_v24 }
  0x18   :  { %199 = vperm.xlu0 %11877, %v11972_v20   ;;  %99 = vperm.xlu1 %11878, %v11948_v10   ;;  %v620_v10 = vsub.f32 %v12075_v58, %v12104_v3  ;;  %v76_v44 = vsub.f32 %v62_v36, %v61_v28 }
  0x19   :  { %10078 = vmatpush3.msra.mxu1 %v12117_v8  ;;  %10065 = vmatpush3.msra.mxu0 %v12069_v56 }
  0x1a   :  { %10079 = vmatprep.subr.mxu1 %v11914_v24  ;;  %v12137_v15 = vand.u32 4294901760, %v620_v10  ;;  %10088 = vmatprep.subr.mxu0 %v11914_v24  ;;  %v36_v10 = vld [vmem:[%s14151_s0 + $0x78] sm:$0xff] }
  0x1b   :  { %10080 = vmatpush3.msra.mxu1 %v12129_v13 }
  0x1c   :  { %104 = vperm.xlu0 %11877, %v11954_v14   ;;  %315 = vperm.xlu1 %11878, %v71_v59   ;;  %v627_v14 = vsub.f32 %v12097_v1, %v12120_v9  ;;  %v34_v59 = vld [vmem:[%s14151_s0 + $0x68] sm:$0xff] }
  0x1d   :  { %10081 = vmatprep.subr.mxu1 %v11914_v24  ;;  %v50_v61 = vmul.f32 10000.0, %v34_v59 }
  0x1e   :  { %v12148_v20 = vand.u32 4294901760, %v627_v14  ;;  %10082 = vmatpush3.msra.mxu1 %v12137_v15 }
  0x1f   :  { %10083 = vmatprep.subr.mxu1 %v11914_v24 }
  0x20   :  { %320 = vperm.xlu0 %11877, %v72_v4   ;;  %204 = vperm.xlu1 %11878, %v57_v48   ;;  %v33_v48 = vld [vmem:[%s14151_s0 + $0x60] sm:$0xff] }
  0x21   :  { %10084 = vmatpush3.msra.mxu1 %v12148_v20  ;;  %v49_v50 = vmul.f32 10000.0, %v33_v48 }
  0x22   :  { %10107 = vmatprep.subr.mxu1 %v11914_v24 }
  0x23   :  { %v64_v57 = vsub.f32 %v49_v50, %v48_v47  ;;  %v65_v4 = vsub.f32 %v50_v61, %v49_v50 }
  0x24   :  { %209 = vperm.xlu0 %11877, %v58_v60   ;;  %109 = vperm.xlu1 %11878, %v12005_v33   ;;  %v75_v33 = vsub.f32 %v61_v28, %v60_v18 }
  0x25   :  { %v79_v6 = vsub.f32 %v65_v4, %v64_v57 }
  0x28   :  { %114 = vperm.xlu0 %11877, %v12051_v49   ;;  %325 = vperm.xlu1 %11878, %v73_v17   ;;  %v63_v49 = vsub.f32 %v48_v47, %v47_v32 }
  0x2a   :  { %v77_v52 = vsub.f32 %v63_v49, %v62_v36  ;;  %v78_v60 = vsub.f32 %v64_v57, %v63_v49 }
  0x2c   :  { %330 = vperm.xlu0 %11877, %v74_v21   ;;  %214 = vperm.xlu1 %11878, %v59_v11   ;;  %v12182_v21 = vld [vmem:[%s14153_s1 + $0x1] ss:$0 sm:$0xff] }
  0x30   :  { %219 = vperm.xlu0 %11877, %v60_v18   ;;  %119 = vperm.xlu1 %11878, %v44_v5   ;;  %v51_v5 = vmul.f32 10000.0, %v35_v0 }
  0x32   :  { %v66_v7 = vsub.f32 %v51_v5, %v50_v61 }
  0x34   :  { %124 = vperm.xlu0 %11877, %v45_v12   ;;  %335 = vperm.xlu1 %11878, %v75_v33   ;;  %v80_v11 = vsub.f32 %v66_v7, %v65_v4  ;;  %v52_v12 = vmul.f32 10000.0, %v36_v10 }
  0x36   :  { %v67_v14 = vsub.f32 %v52_v12, %v51_v5 }
  0x38   :  { %340 = vperm.xlu0 %11877, %v76_v44   ;;  %224 = vperm.xlu1 %11878, %v61_v28   ;;  %v81_v17 = vsub.f32 %v67_v14, %v66_v7  ;;  %v12195_v44 = vld [vmem:[%s14153_s1 + $0x3] ss:$0 sm:$0xff] }
  0x3c   :  { %229 = vperm.xlu0 %11877, %v62_v36   ;;  %129 = vperm.xlu1 %11878, %v46_v22   ;;  %v12187_v22 = vld [vmem:[%s14153_s1 + $0x2] ss:$0 sm:$0xff] }
  0x40   :  { %134 = vperm.xlu0 %11877, %v47_v32   ;;  %345 = vperm.xlu1 %11878, %v77_v52  }
  0x44   :  { %350 = vperm.xlu0 %11877, %v78_v60   ;;  %234 = vperm.xlu1 %11878, %v63_v49  }
  0x48   :  { %239 = vperm.xlu0 %11877, %v64_v57   ;;  %139 = vperm.xlu1 %11878, %v48_v47  }
  0x4c   :  { %144 = vperm.xlu0 %11877, %v49_v50   ;;  %355 = vperm.xlu1 %11878, %v79_v6  }
  0x50   :  { %360 = vperm.xlu0 %11877, %v80_v11   ;;  %244 = vperm.xlu1 %11878, %v65_v4  }
  0x54   :  { %249 = vperm.xlu0 %11877, %v66_v7   ;;  %149 = vperm.xlu1 %11878, %v50_v61  }
  0x58   :  { %154 = vperm.xlu0 %11877, %v51_v5   ;;  %365 = vperm.xlu1 %11878, %v81_v17  }
  0x5c   :  { %159 = vperm.xlu0 %11877, %v52_v12   ;;  %254 = vperm.xlu1 %11878, %v67_v14  }
  0x7f   :  { %v85_v18 = vpop.permute.xlu0 %84 }
  0x80   :  { %v166_v32 = vmul.f32 %v12177_v19, %v85_v18 }
  0x83   :  { %v185_v23 = vpop.permute.xlu0 %184  ;;  %v301_v28 = vpop.permute.xlu1 %300 }
  0x84   :  { %v266_v33 = vmul.f32 %v12182_v21, %v185_v23  ;;  %v372_v36 = vmul.f32 %v12187_v22, %v301_v28 }
  0x86   :  { %v282_v37 = vadd.f32 %v266_v33, %v166_v32 }
  0x87   :  { %v190_v47 = vpop.permute.xlu0 %189  ;;  %v90_v48 = vpop.permute.xlu1 %89 }
  0x88   :  { %v387_v49 = vadd.f32 %v372_v36, %v282_v37  ;;  %v267_v50 = vmul.f32 %v12182_v21, %v190_v47  ;;  %v167_v52 = vmul.f32 %v12177_v19, %v90_v48 }
  0x8a   :  { %v407_v57 = vadd.f32 %v12195_v44, %v387_v49  ;;  %v283_v61 = vadd.f32 %v267_v50, %v167_v52 }
  0x8b   :  { %v95_v59 = vpop.permute.xlu0 %94  ;;  %v306_v60 = vpop.permute.xlu1 %305 }
  0x8c   :  { %11879 = vtanh.f32 %v407_v57  ;;  %v373_v0 = vmul.f32 %v12187_v22, %v306_v60  ;;  %v168_v7 = vmul.f32 %v12177_v19, %v95_v59 }
  0x8e   :  { %v388_v4 = vadd.f32 %v373_v0, %v283_v61 }
  0x8f   :  { %v311_v5 = vpop.permute.xlu0 %310  ;;  %v195_v6 = vpop.permute.xlu1 %194 }
  0x90   :  { %v408_v10 = vadd.f32 %v12195_v44, %v388_v4  ;;  %v268_v11 = vmul.f32 %v12182_v21, %v195_v6  ;;  %v374_v14 = vmul.f32 %v12187_v22, %v311_v5 }
  0x92   :  { %v428_v12 = vadd.f32 %v11962_v16, %v408_v10  ;;  %v284_v17 = vadd.f32 %v268_v11, %v168_v7 }
  0x93   :  { %v200_v18 = vpop.permute.xlu0 %199  ;;  %v100_v23 = vpop.permute.xlu1 %99 }
  0x94   :  { %446 = vst.msk [vmem:[#allocation2 + $0x8] sm:$0xff] %vm444_vm0, %v428_v12  ;;  %v389_v28 = vadd.f32 %v374_v14, %v284_v17  ;;  %v269_v32 = vmul.f32 %v12182_v21, %v200_v18  ;;  %v169_v33 = vmul.f32 %v12177_v19, %v100_v23 }
  0x96   :  { %v409_v36 = vadd.f32 %v12195_v44, %v389_v28  ;;  %v285_v49 = vadd.f32 %v269_v32, %v169_v33 }
  0x97   :  { %v105_v37 = vpop.permute.xlu0 %104  ;;  %v316_v47 = vpop.permute.xlu1 %315 }
  0x98   :  { %v429_v48 = vadd.f32 %v11962_v16, %v409_v36  ;;  %v375_v50 = vmul.f32 %v12187_v22, %v316_v47  ;;  %v170_v4 = vmul.f32 %v12177_v19, %v105_v37 }
  0x99   :  { %v11880_v52 = vpop.eup %11879 }
  0x9a   :  { %447 = vst.msk [vmem:[#allocation2 + $0x10] sm:$0xff] %vm444_vm0, %v429_v48  ;;  %v390_v57 = vadd.f32 %v375_v50, %v285_v49  ;;  %v473_v59 = vsel %vm444_vm0, %v11880_v52, 0 }
  0x9b   :  { %v321_v60 = vpop.permute.xlu0 %320  ;;  %v205_v61 = vpop.permute.xlu1 %204  ;;  %v12214_v0 = vand.u32 4294901760, %v473_v59 }
  0x9c   :  { %v410_v5 = vadd.f32 %v12195_v44, %v390_v57  ;;  %v270_v6 = vmul.f32 %v12182_v21, %v205_v61  ;;  %v376_v11 = vmul.f32 %v12187_v22, %v321_v60 }
  0x9d   :  { %10086 = vmatmul.mubr.f32.vlgmr.msra.gmra.mxu1 %v12214_v0  ;;  %v12221_v7 = vsub.f32 %v473_v59, %v12214_v0 }
  0x9e   :  { %v430_v10 = vadd.f32 %v11962_v16, %v410_v5  ;;  %v286_v12 = vadd.f32 %v270_v6, %v170_v4  ;;  %10108 = vmatpush3.msra.mxu1 %v11986_v25  ;;  %10123 = vmatprep.mubr.msk.f32.mxu1 %vm11915_vm1, %v11914_v24 }
  0x9f   :  { %10109 = vmatprep.subr.mxu1 %v11914_v24  ;;  %v210_v14 = vpop.permute.xlu0 %209  ;;  %v110_v17 = vpop.permute.xlu1 %109  ;;  %v550_v18 = vand.u32 4294901760, %v12221_v7 }
  0xa0   :  { %448 = vst.msk [vmem:[#allocation2 + $0x18] sm:$0xff] %vm444_vm0, %v430_v10  ;;  %v391_v23 = vadd.f32 %v376_v11, %v286_v12  ;;  %v271_v28 = vmul.f32 %v12182_v21, %v210_v14  ;;  %10110 = vmatpush3.msra.mxu1 %v11989_v26  ;;  %v171_v32 = vmul.f32 %v12177_v19, %v110_v17 }
  0xa1   :  { %10111 = vmatprep.subr.mxu1 %v11914_v24  ;;  %v551_v33 = vsub.f32 %v12221_v7, %v550_v18 }
  0xa2   :  { %v411_v36 = vadd.f32 %v12195_v44, %v391_v23  ;;  %10112 = vmatpush3.msra.mxu1 %v11991_v27  ;;  %v287_v50 = vadd.f32 %v271_v28, %v171_v32 }
  0xa3   :  { %10113 = vmatprep.subr.mxu1 %v11914_v24  ;;  %v115_v37 = vpop.permute.xlu0 %114  ;;  %v326_v47 = vpop.permute.xlu1 %325  ;;  %v552_v48 = vand.u32 4294901760, %v551_v33 }
  0xa4   :  { %v431_v49 = vadd.f32 %v11962_v16, %v411_v36  ;;  %10114 = vmatpush3.msra.mxu1 %v11999_v30  ;;  %v377_v52 = vmul.f32 %v12187_v22, %v326_v47  ;;  %v172_v61 = vmul.f32 %v12177_v19, %v115_v37 }
  0xa5   :  { %10115 = vmatprep.subr.mxu1 %v11914_v24  ;;  %10067 = vmatmul.mubr.f32.vlgmr.msra.gmra.mxu0 %v552_v48 }
  0xa6   :  { %449 = vst.msk [vmem:[#allocation2 + $0x20] sm:$0xff] %vm444_vm0, %v431_v49  ;;  %v392_v57 = vadd.f32 %v377_v52, %v287_v50  ;;  %10089 = vmatpush3.msra.mxu0 %v11997_v29  ;;  %10116 = vmatpush3.msra.mxu1 %v12002_v31 }
  0xa7   :  { %10090 = vmatprep.subr.mxu0 %v11914_v24  ;;  %10117 = vmatprep.subr.mxu1 %v11914_v24  ;;  %v331_v59 = vpop.permute.xlu0 %330  ;;  %v215_v60 = vpop.permute.xlu1 %214 }
  0xa8   :  { %v412_v4 = vadd.f32 %v12195_v44, %v392_v57  ;;  %10091 = vmatpush3.msra.mxu0 %v12008_v34  ;;  %10118 = vmatpush3.msra.mxu1 %v12026_v40  ;;  %v272_v5 = vmul.f32 %v12182_v21, %v215_v60  ;;  %v378_v10 = vmul.f32 %v12187_v22, %v331_v59 }
  0xa9   :  { %10092 = vmatprep.subr.mxu0 %v11914_v24  ;;  %10119 = vmatprep.subr.mxu1 %v11914_v24 }
  0xaa   :  { %v432_v6 = vadd.f32 %v11962_v16, %v412_v4  ;;  %v288_v11 = vadd.f32 %v272_v5, %v172_v61  ;;  %10093 = vmatpush3.msra.mxu0 %v12011_v35  ;;  %10120 = vmatpush3.msra.mxu1 %v12044_v46 }
  0xab   :  { %10094 = vmatprep.subr.mxu0 %v11914_v24  ;;  %10121 = vmatprep.subr.mxu1 %v11914_v24  ;;  %v220_v12 = vpop.permute.xlu0 %219  ;;  %v120_v14 = vpop.permute.xlu1 %119 }
  0xac   :  { %450 = vst.msk [vmem:[#allocation2 + $0x28] sm:$0xff] %vm444_vm0, %v432_v6  ;;  %v393_v17 = vadd.f32 %v378_v10, %v288_v11  ;;  %v273_v23 = vmul.f32 %v12182_v21, %v220_v12  ;;  %10095 = vmatpush3.msra.mxu0 %v12023_v39  ;;  %10122 = vmatpush3.msra.mxu1 %v12069_v56 }
  0xad   :  { %v173_v28 = vmul.f32 %v12177_v19, %v120_v14  ;;  %10096 = vmatprep.subr.mxu0 %v11914_v24  ;;  %10124 = vmatmul.mubr.f32.vlgmr.msra.gmra.mxu1 %v550_v18 }
  0xae   :  { %v413_v32 = vadd.f32 %v12195_v44, %v393_v17  ;;  %10145 = vmatprep.subr.mxu1 %v11914_v24  ;;  %10097 = vmatpush3.msra.mxu0 %v12035_v43 }
  0xaf   :  { %10146 = vmatpush3.msra.mxu1 %v11986_v25  ;;  %10098 = vmatprep.subr.mxu0 %v11914_v24  ;;  %v125_v33 = vpop.permute.xlu0 %124  ;;  %v336_v36 = vpop.permute.xlu1 %335  ;;  %v289_v47 = vadd.f32 %v273_v23, %v173_v28 }
  0xb0   :  { %v433_v37 = vadd.f32 %v11962_v16, %v413_v32  ;;  %10147 = vmatprep.subr.mxu1 %v11914_v24  ;;  %10099 = vmatpush3.msra.mxu0 %v12060_v53  ;;  %v379_v18 = vmul.f32 %v12187_v22, %v336_v36  ;;  %v174_v52 = vmul.f32 %v12177_v19, %v125_v33 }
  0xb1   :  { %10148 = vmatpush3.msra.mxu1 %v11989_v26  ;;  %10100 = vmatprep.subr.mxu0 %v11914_v24 }
  0xb2   :  { %451 = vst.msk [vmem:[#allocation2 + $0x30] sm:$0xff] %vm444_vm0, %v433_v37  ;;  %v394_v48 = vadd.f32 %v379_v18, %v289_v47  ;;  %10149 = vmatprep.subr.mxu1 %v11914_v24  ;;  %10101 = vmatpush3.msra.mxu0 %v12075_v58 }
  0xb3   :  { %10150 = vmatpush3.msra.mxu1 %v11991_v27  ;;  %10102 = vmatprep.subr.mxu0 %v11914_v24  ;;  %v341_v49 = vpop.permute.xlu0 %340  ;;  %v225_v50 = vpop.permute.xlu1 %224 }
  0xb4   :  { %v414_v57 = vadd.f32 %v12195_v44, %v394_v48  ;;  %10151 = vmatprep.subr.mxu1 %v11914_v24  ;;  %10103 = vmatpush3.msra.mxu0 %v12097_v1  ;;  %v274_v59 = vmul.f32 %v12182_v21, %v225_v50  ;;  %v380_v61 = vmul.f32 %v12187_v22, %v341_v49 }
  0xb5   :  { %10104 = vmatprep.mubr.msk.f32.mxu0 %vm11915_vm1, %v11914_v24  ;;  %10152 = vmatpush3.msra.mxu1 %v11999_v30 }
  0xb6   :  { %v434_v60 = vadd.f32 %v11962_v16, %v414_v57  ;;  %v290_v4 = vadd.f32 %v274_v59, %v174_v52  ;;  %10105 = vmatmul.mubr.f32.vlgmr.msra.gmra.mxu0 %v12221_v7  ;;  %10126 = vmatprep.subr.mxu0 %v11914_v24 }
  0xb7   :  { %10153 = vmatprep.subr.mxu1 %v11914_v24  ;;  %10127 = vmatpush3.msra.mxu0 %v12020_v38  ;;  %v230_v5 = vpop.permute.xlu0 %229  ;;  %v130_v6 = vpop.permute.xlu1 %129 }
  0xb8   :  { %452 = vst.msk [vmem:[#allocation2 + $0x38] sm:$0xff] %vm444_vm0, %v434_v60  ;;  %v395_v10 = vadd.f32 %v380_v61, %v290_v4  ;;  %10154 = vmatpush3.msra.mxu1 %v12002_v31  ;;  %10128 = vmatprep.subr.mxu0 %v11914_v24  ;;  %v275_v11 = vmul.f32 %v12182_v21, %v230_v5 }
  0xb9   :  { %v175_v12 = vmul.f32 %v12177_v19, %v130_v6  ;;  %10155 = vmatprep.subr.mxu1 %v11914_v24  ;;  %10129 = vmatpush3.msra.mxu0 %v12029_v41 }
  0xba   :  { %v415_v7 = vadd.f32 %v12195_v44, %v395_v10  ;;  %10156 = vmatpush3.msra.mxu1 %v12026_v40  ;;  %10130 = vmatprep.subr.mxu0 %v11914_v24 }
  0xbb   :  { %10157 = vmatprep.subr.mxu1 %v11914_v24  ;;  %10131 = vmatpush3.msra.mxu0 %v12032_v42  ;;  %v135_v14 = vpop.permute.xlu0 %134  ;;  %v346_v17 = vpop.permute.xlu1 %345  ;;  %v291_v28 = vadd.f32 %v275_v11, %v175_v12 }
  0xbc   :  { %v435_v23 = vadd.f32 %v11962_v16, %v415_v7  ;;  %10158 = vmatpush3.msra.mxu1 %v12044_v46  ;;  %10132 = vmatprep.subr.mxu0 %v11914_v24  ;;  %v381_v32 = vmul.f32 %v12187_v22, %v346_v17  ;;  %v176_v47 = vmul.f32 %v12177_v19, %v135_v14 }
  0xbd   :  { %10159 = vmatprep.subr.mxu1 %v11914_v24  ;;  %10133 = vmatpush3.msra.mxu0 %v12041_v45 }
  0xbe   :  { %453 = vst.msk [vmem:[#allocation2 + $0x40] sm:$0xff] %vm444_vm0, %v435_v23  ;;  %10160 = vmatpush3.msra.mxu1 %v12069_v56  ;;  %10161 = vmatprep.mubr.msk.f32.mxu1 %vm11915_vm1, %v11914_v24  ;;  %v396_v33 = vadd.f32 %v381_v32, %v291_v28 }
  0xbf   :  { %10134 = vmatprep.subr.mxu0 %v11914_v24  ;;  %10162 = vmatmul.mubr.f32.vlgmr.msra.gmra.mxu1 %v12214_v0  ;;  %v351_v36 = vpop.permute.xlu0 %350  ;;  %v235_v37 = vpop.permute.xlu1 %234 }
  0xc0   :  { %v416_v18 = vadd.f32 %v12195_v44, %v396_v33  ;;  %10135 = vmatpush3.msra.mxu0 %v12066_v55  ;;  %v276_v48 = vmul.f32 %v12182_v21, %v235_v37  ;;  %10142 = vmatprep.mubr.msk.f32.mxu0 %vm11915_vm1, %v11914_v24  ;;  %v382_v50 = vmul.f32 %v12187_v22, %v351_v36 }
  0xc1   :  { %10136 = vmatprep.subr.mxu0 %v11914_v24  ;;  %10183 = vmatprep.subr.mxu1 %v11914_v24 }
  0xc2   :  { %v436_v49 = vadd.f32 %v11962_v16, %v416_v18  ;;  %10137 = vmatpush3.msra.mxu0 %v12090_v63  ;;  %v292_v52 = vadd.f32 %v276_v48, %v176_v47  ;;  %10184 = vmatpush3.msra.mxu1 %v12055_v51 }
  0xc3   :  { %10138 = vmatprep.subr.mxu0 %v11914_v24  ;;  %v240_v57 = vpop.permute.xlu0 %239  ;;  %v140_v59 = vpop.permute.xlu1 %139  ;;  %10185 = vmatprep.subr.mxu1 %v11914_v24 }
  0xc4   :  { %454 = vst.msk [vmem:[#allocation2 + $0x48] sm:$0xff] %vm444_vm0, %v436_v49  ;;  %v397_v60 = vadd.f32 %v382_v50, %v292_v52  ;;  %10139 = vmatpush3.msra.mxu0 %v12104_v3  ;;  %v277_v61 = vmul.f32 %v12182_v21, %v240_v57  ;;  %v177_v4 = vmul.f32 %v12177_v19, %v140_v59 }
  0xc5   :  { %10186 = vmatpush3.msra.mxu1 %v12063_v54  ;;  %10140 = vmatprep.subr.mxu0 %v11914_v24 }
  0xc6   :  { %10187 = vmatprep.subr.mxu1 %v11914_v24  ;;  %v417_v5 = vadd.f32 %v12195_v44, %v397_v60  ;;  %10141 = vmatpush3.msra.mxu0 %v12120_v9  ;;  %v293_v12 = vadd.f32 %v277_v61, %v177_v4 }
  0xc7   :  { %10188 = vmatpush3.msra.mxu1 %v12087_v62  ;;  %10143 = vmatmul.mubr.f32.vlgmr.msra.gmra.mxu0 %v12214_v0  ;;  %v145_v6 = vpop.permute.xlu0 %144  ;;  %v356_v10 = vpop.permute.xlu1 %355 }
  0xc8   :  { %10189 = vmatprep.subr.mxu1 %v11914_v24  ;;  %v437_v11 = vadd.f32 %v11962_v16, %v417_v5  ;;  %v383_v7 = vmul.f32 %v12187_v22, %v356_v10  ;;  %10164 = vmatprep.subr.mxu0 %v11914_v24  ;;  %v178_v23 = vmul.f32 %v12177_v19, %v145_v6  ;;  %v281_v6 = vmul.f32 0.0, %v12182_v21 }
  0xc9   :  { %10190 = vmatpush3.msra.mxu1 %v12101_v2  ;;  %10165 = vmatpush3.msra.mxu0 %v11986_v25  ;;  %v386_v10 = vmul.f32 0.0, %v12187_v22 }
  0xca   :  { %10191 = vmatprep.subr.mxu1 %v11914_v24  ;;  %455 = vst.msk [vmem:[#allocation2 + $0x50] sm:$0xff] %vm444_vm0, %v437_v11  ;;  %v398_v0 = vadd.f32 %v383_v7, %v293_v12  ;;  %10166 = vmatprep.subr.mxu0 %v11914_v24 }
  0xcb   :  { %10192 = vmatpush3.msra.mxu1 %v12117_v8  ;;  %v361_v14 = vpop.permute.xlu0 %360  ;;  %v245_v17 = vpop.permute.xlu1 %244  ;;  %10167 = vmatpush3.msra.mxu0 %v11989_v26 }
  0xcc   :  { %10193 = vmatprep.subr.mxu1 %v11914_v24  ;;  %v418_v28 = vadd.f32 %v12195_v44, %v398_v0  ;;  %v278_v32 = vmul.f32 %v12182_v21, %v245_v17  ;;  %10168 = vmatprep.subr.mxu0 %v11914_v24  ;;  %v384_v36 = vmul.f32 %v12187_v22, %v361_v14 }
  0xcd   :  { %10194 = vmatpush3.msra.mxu1 %v12129_v13  ;;  %10169 = vmatpush3.msra.mxu0 %v11991_v27 }
  0xce   :  { %10195 = vmatprep.subr.mxu1 %v11914_v24  ;;  %v438_v33 = vadd.f32 %v11962_v16, %v418_v28  ;;  %v294_v37 = vadd.f32 %v278_v32, %v178_v23  ;;  %10170 = vmatprep.subr.mxu0 %v11914_v24 }
  0xcf   :  { %10196 = vmatpush3.msra.mxu1 %v12137_v15  ;;  %v250_v47 = vpop.permute.xlu0 %249  ;;  %v150_v18 = vpop.permute.xlu1 %149  ;;  %10171 = vmatpush3.msra.mxu0 %v11999_v30 }
  0xd0   :  { %10197 = vmatprep.subr.mxu1 %v11914_v24  ;;  %456 = vst.msk [vmem:[#allocation2 + $0x58] sm:$0xff] %vm444_vm0, %v438_v33  ;;  %v399_v48 = vadd.f32 %v384_v36, %v294_v37  ;;  %v279_v49 = vmul.f32 %v12182_v21, %v250_v47  ;;  %v179_v50 = vmul.f32 %v12177_v19, %v150_v18 }
  0xd1   :  { %10198 = vmatpush3.msra.mxu1 %v12148_v20  ;;  %10172 = vmatprep.subr.mxu0 %v11914_v24 }
  0xd2   :  { %10199 = vmatprep.mubr.msk.f32.mxu1 %vm11915_vm1, %v11914_v24  ;;  %10221 = vmatprep.subr.mxu1 %v11914_v24  ;;  %v419_v52 = vadd.f32 %v12195_v44, %v399_v48  ;;  %v295_v61 = vadd.f32 %v279_v49, %v179_v50 }
  0xd3   :  { %10173 = vmatpush3.msra.mxu0 %v12002_v31  ;;  %10180 = vmatprep.mubr.msk.f32.mxu0 %vm11915_vm1, %v11914_v24  ;;  %v155_v57 = vpop.permute.xlu0 %154  ;;  %v366_v59 = vpop.permute.xlu1 %365 }
  0xd4   :  { %10174 = vmatprep.subr.mxu0 %v11914_v24  ;;  %v439_v60 = vadd.f32 %v11962_v16, %v419_v52  ;;  %v385_v4 = vmul.f32 %v12187_v22, %v366_v59  ;;  %v180_v7 = vmul.f32 %v12177_v19, %v155_v57 }
  0xd5   :  { %10175 = vmatpush3.msra.mxu0 %v12026_v40 }
  0xd6   :  { %10176 = vmatprep.subr.mxu0 %v11914_v24  ;;  %457 = vst.msk [vmem:[#allocation2 + $0x60] sm:$0xff] %vm444_vm0, %v439_v60  ;;  %v400_v5 = vadd.f32 %v385_v4, %v295_v61  ;;  %v471_v60 = vld [vmem:[#allocation2 + $0x8] sm:$0xff] }
  0xd7   :  { %10177 = vmatpush3.msra.mxu0 %v12044_v46  ;;  %v160_v11 = vpop.permute.xlu0 %159  ;;  %v255_v12 = vpop.permute.xlu1 %254 }
  0xd8   :  { %10178 = vmatprep.subr.mxu0 %v11914_v24  ;;  %v420_v0 = vadd.f32 %v12195_v44, %v400_v5  ;;  %v181_v14 = vmul.f32 %v12177_v19, %v160_v11  ;;  %v280_v17 = vmul.f32 %v12182_v21, %v255_v12 }
  0xd9   :  { %10179 = vmatpush3.msra.mxu0 %v12069_v56 }
  0xda   :  { %10202 = vmatprep.subr.mxu0 %v11914_v24  ;;  %v440_v23 = vadd.f32 %v11962_v16, %v420_v0  ;;  %v297_v28 = vadd.f32 %v281_v6, %v181_v14  ;;  %v296_v22 = vadd.f32 %v280_v17, %v180_v7 }
  0xdc   :  { %458 = vst.msk [vmem:[#allocation2 + $0x68] sm:$0xff] %vm444_vm0, %v440_v23  ;;  %v402_v32 = vadd.f32 %v386_v10, %v297_v28  ;;  %v401_v33 = vadd.f32 %v386_v10, %v296_v22 }
  0xde   :  { %v422_v36 = vadd.f32 %v12195_v44, %v402_v32  ;;  %v421_v37 = vadd.f32 %v12195_v44, %v401_v33 }
  0xe0   :  { %v442_v19 = vadd.f32 %v11962_v16, %v422_v36  ;;  %v441_v21 = vadd.f32 %v11962_v16, %v421_v37 }
  0xe2   :  { %460 = vst.msk [vmem:[#allocation2 + $0x78] sm:$0xff] %vm444_vm0, %v442_v19  ;;  %459 = vst.msk [vmem:[#allocation2 + $0x70] sm:$0xff] %vm444_vm0, %v441_v21 }
 0x15d   :  { %v665_v47 = vpop.f32.mrf.mxu1 }
 0x15f   :  { %v10087_v18 = vpop.f32.mrf.mxu1 }
 0x165   :  { %v554_v48 = vpop.f32.mrf.mxu0 }
 0x166   :  { %v555_v61 = vadd.f32 %v554_v48, %v471_v60 }
 0x167   :  { %v10068_v49 = vpop.f32.mrf.mxu0 }
 0x168   :  { %v666_v44 = vadd.f32 %v665_v47, %v555_v61  ;;  %v1014_v49 = vld [vmem:[#allocation2 + $0x10] sm:$0xff] }
 0x16d   :  { %v834_v50 = vpop.f32.mrf.mxu1 }
 0x16f   :  { %v10125_v52 = vpop.f32.mrf.mxu1 }
 0x176   :  { %v753_v57 = vpop.f32.mrf.mxu0 }
 0x177   :  { %v754_v6 = vadd.f32 %v753_v57, %v666_v44 }
 0x178   :  { %v10106_v59 = vpop.f32.mrf.mxu0 }
 0x179   :  { %v835_v10 = vadd.f32 %v834_v50, %v754_v6 }
 0x17f   :  { %v1008_v4 = vpop.f32.mrf.mxu1 }
 0x181   :  { %v10163_v5 = vpop.f32.mrf.mxu1 }
 0x187   :  { %v929_v16 = vpop.f32.mrf.mxu0 }
 0x188   :  { %v930_v11 = vadd.f32 %v929_v16, %v835_v10 }
 0x189   :  { %v10144_v12 = vpop.f32.mrf.mxu0 }
 0x18a   :  { %v1009_v7 = vadd.f32 %v1008_v4, %v930_v11 }
 0x18c   :  { %11881 = vtanh.f32 %v1009_v7 }
 0x199   :  { %v12407_v0 = vpop.eup %11881 }
 0x19a   :  { %v1016_v14 = vsel %vm444_vm0, %v12407_v0, 0 }
 0x19b   :  { %v12411_v17 = vand.u32 4294901760, %v1016_v14 }
 0x19d   :  { %v1092_v23 = vsub.f32 %v1016_v14, %v12411_v17  ;;  %10200 = vmatmul.mubr.f32.vlgmr.msra.gmra.mxu1 %v12411_v17 }
 0x19e   :  { %10222 = vmatpush3.msra.mxu1 %v11986_v25  ;;  %10237 = vmatprep.mubr.msk.f32.mxu1 %vm11915_vm1, %v11914_v24 }
 0x19f   :  { %10223 = vmatprep.subr.mxu1 %v11914_v24  ;;  %v1093_v28 = vand.u32 4294901760, %v1092_v23 }
 0x1a0   :  { %10224 = vmatpush3.msra.mxu1 %v11989_v26 }
 0x1a1   :  { %10225 = vmatprep.subr.mxu1 %v11914_v24  ;;  %v1094_v22 = vsub.f32 %v1092_v23, %v1093_v28 }
 0x1a2   :  { %10226 = vmatpush3.msra.mxu1 %v11991_v27 }
 0x1a3   :  { %10227 = vmatprep.subr.mxu1 %v11914_v24  ;;  %v1095_v32 = vand.u32 4294901760, %v1094_v22 }
 0x1a4   :  { %10228 = vmatpush3.msra.mxu1 %v11999_v30 }
 0x1a5   :  { %10229 = vmatprep.subr.mxu1 %v11914_v24  ;;  %10181 = vmatmul.mubr.f32.vlgmr.msra.gmra.mxu0 %v1095_v32 }
 0x1a6   :  { %10203 = vmatpush3.msra.mxu0 %v11997_v29  ;;  %10230 = vmatpush3.msra.mxu1 %v12002_v31 }
 0x1a7   :  { %10204 = vmatprep.subr.mxu0 %v11914_v24  ;;  %10231 = vmatprep.subr.mxu1 %v11914_v24 }
 0x1a8   :  { %10205 = vmatpush3.msra.mxu0 %v12008_v34  ;;  %10232 = vmatpush3.msra.mxu1 %v12026_v40 }
 0x1a9   :  { %10206 = vmatprep.subr.mxu0 %v11914_v24  ;;  %10233 = vmatprep.subr.mxu1 %v11914_v24 }
 0x1aa   :  { %10207 = vmatpush3.msra.mxu0 %v12011_v35  ;;  %10234 = vmatpush3.msra.mxu1 %v12044_v46 }
 0x1ab   :  { %10208 = vmatprep.subr.mxu0 %v11914_v24  ;;  %10235 = vmatprep.subr.mxu1 %v11914_v24 }
 0x1ac   :  { %10209 = vmatpush3.msra.mxu0 %v12023_v39  ;;  %10236 = vmatpush3.msra.mxu1 %v12069_v56 }
 0x1ad   :  { %10210 = vmatprep.subr.mxu0 %v11914_v24  ;;  %10238 = vmatmul.mubr.f32.vlgmr.msra.gmra.mxu1 %v1093_v28 }
 0x1ae   :  { %10259 = vmatprep.subr.mxu1 %v11914_v24  ;;  %10211 = vmatpush3.msra.mxu0 %v12035_v43 }
 0x1af   :  { %10260 = vmatpush3.msra.mxu1 %v11986_v25  ;;  %10212 = vmatprep.subr.mxu0 %v11914_v24 }
 0x1b0   :  { %10261 = vmatprep.subr.mxu1 %v11914_v24  ;;  %10213 = vmatpush3.msra.mxu0 %v12060_v53 }
 0x1b1   :  { %10262 = vmatpush3.msra.mxu1 %v11989_v26  ;;  %10214 = vmatprep.subr.mxu0 %v11914_v24 }
 0x1b2   :  { %10263 = vmatprep.subr.mxu1 %v11914_v24  ;;  %10215 = vmatpush3.msra.mxu0 %v12075_v58 }
 0x1b3   :  { %10264 = vmatpush3.msra.mxu1 %v11991_v27  ;;  %10216 = vmatprep.subr.mxu0 %v11914_v24 }
 0x1b4   :  { %10265 = vmatprep.subr.mxu1 %v11914_v24  ;;  %10217 = vmatpush3.msra.mxu0 %v12097_v1 }
 0x1b5   :  { %10218 = vmatprep.mubr.msk.f32.mxu0 %vm11915_vm1, %v11914_v24  ;;  %10266 = vmatpush3.msra.mxu1 %v11999_v30 }
 0x1b6   :  { %10219 = vmatmul.mubr.f32.vlgmr.msra.gmra.mxu0 %v1092_v23  ;;  %10240 = vmatprep.subr.mxu0 %v11914_v24 }
 0x1b7   :  { %10267 = vmatprep.subr.mxu1 %v11914_v24  ;;  %10241 = vmatpush3.msra.mxu0 %v12020_v38 }
 0x1b8   :  { %10268 = vmatpush3.msra.mxu1 %v12002_v31  ;;  %10242 = vmatprep.subr.mxu0 %v11914_v24 }
 0x1b9   :  { %10269 = vmatprep.subr.mxu1 %v11914_v24  ;;  %10243 = vmatpush3.msra.mxu0 %v12029_v41 }
 0x1ba   :  { %10270 = vmatpush3.msra.mxu1 %v12026_v40  ;;  %10244 = vmatprep.subr.mxu0 %v11914_v24 }
 0x1bb   :  { %10271 = vmatprep.subr.mxu1 %v11914_v24  ;;  %10245 = vmatpush3.msra.mxu0 %v12032_v42 }
 0x1bc   :  { %10272 = vmatpush3.msra.mxu1 %v12044_v46  ;;  %10246 = vmatprep.subr.mxu0 %v11914_v24 }
 0x1bd   :  { %10273 = vmatprep.subr.mxu1 %v11914_v24  ;;  %10247 = vmatpush3.msra.mxu0 %v12041_v45 }
 0x1be   :  { %10274 = vmatpush3.msra.mxu1 %v12069_v56  ;;  %10275 = vmatprep.mubr.msk.f32.mxu1 %vm11915_vm1, %v11914_v24 }
 0x1bf   :  { %10248 = vmatprep.subr.mxu0 %v11914_v24  ;;  %10276 = vmatmul.mubr.f32.vlgmr.msra.gmra.mxu1 %v12411_v17 }
 0x1c0   :  { %10249 = vmatpush3.msra.mxu0 %v12066_v55  ;;  %10256 = vmatprep.mubr.msk.f32.mxu0 %vm11915_vm1, %v11914_v24 }
 0x1c1   :  { %10250 = vmatprep.subr.mxu0 %v11914_v24  ;;  %10297 = vmatprep.subr.mxu1 %v11914_v24 }
 0x1c2   :  { %10251 = vmatpush3.msra.mxu0 %v12090_v63  ;;  %10298 = vmatpush3.msra.mxu1 %v12055_v51 }
 0x1c3   :  { %10252 = vmatprep.subr.mxu0 %v11914_v24  ;;  %10299 = vmatprep.subr.mxu1 %v11914_v24 }
 0x1c4   :  { %10253 = vmatpush3.msra.mxu0 %v12104_v3  ;;  %10300 = vmatpush3.msra.mxu1 %v12063_v54 }
 0x1c5   :  { %10254 = vmatprep.subr.mxu0 %v11914_v24  ;;  %10301 = vmatprep.subr.mxu1 %v11914_v24 }
 0x1c6   :  { %10255 = vmatpush3.msra.mxu0 %v12120_v9  ;;  %10302 = vmatpush3.msra.mxu1 %v12087_v62 }
 0x1c7   :  { %10257 = vmatmul.mubr.f32.vlgmr.msra.gmra.mxu0 %v12411_v17  ;;  %10303 = vmatprep.subr.mxu1 %v11914_v24 }
 0x1c8   :  { %10304 = vmatpush3.msra.mxu1 %v12101_v2  ;;  %10278 = vmatprep.subr.mxu0 %v11914_v24 }
 0x1c9   :  { %10305 = vmatprep.subr.mxu1 %v11914_v24  ;;  %10279 = vmatpush3.msra.mxu0 %v11986_v25 }
 0x1ca   :  { %10306 = vmatpush3.msra.mxu1 %v12117_v8  ;;  %10280 = vmatprep.subr.mxu0 %v11914_v24 }
 0x1cb   :  { %10307 = vmatprep.subr.mxu1 %v11914_v24  ;;  %10281 = vmatpush3.msra.mxu0 %v11989_v26 }
 0x1cc   :  { %10308 = vmatpush3.msra.mxu1 %v12129_v13  ;;  %10282 = vmatprep.subr.mxu0 %v11914_v24 }
 0x1cd   :  { %10309 = vmatprep.subr.mxu1 %v11914_v24  ;;  %10283 = vmatpush3.msra.mxu0 %v11991_v27 }
 0x1ce   :  { %10310 = vmatpush3.msra.mxu1 %v12137_v15  ;;  %10284 = vmatprep.subr.mxu0 %v11914_v24 }
 0x1cf   :  { %10311 = vmatprep.subr.mxu1 %v11914_v24  ;;  %10285 = vmatpush3.msra.mxu0 %v11999_v30 }
 0x1d0   :  { %10312 = vmatpush3.msra.mxu1 %v12148_v20  ;;  %10286 = vmatprep.subr.mxu0 %v11914_v24 }
 0x1d1   :  { %10313 = vmatprep.mubr.msk.f32.mxu1 %vm11915_vm1, %v11914_v24  ;;  %10335 = vmatprep.subr.mxu1 %v11914_v24 }
 0x1d2   :  { %10287 = vmatpush3.msra.mxu0 %v12002_v31  ;;  %10294 = vmatprep.mubr.msk.f32.mxu0 %vm11915_vm1, %v11914_v24 }
 0x1d3   :  { %10288 = vmatprep.subr.mxu0 %v11914_v24 }
 0x1d4   :  { %10289 = vmatpush3.msra.mxu0 %v12026_v40 }
 0x1d5   :  { %10290 = vmatprep.subr.mxu0 %v11914_v24 }
 0x1d6   :  { %10291 = vmatpush3.msra.mxu0 %v12044_v46 }
 0x1d7   :  { %10292 = vmatprep.subr.mxu0 %v11914_v24 }
 0x1d8   :  { %10293 = vmatpush3.msra.mxu0 %v12069_v56 }
 0x1d9   :  { %10316 = vmatprep.subr.mxu0 %v11914_v24 }
 0x25d   :  { %v1208_v33 = vpop.f32.mrf.mxu1 }
 0x25f   :  { %v10201_v36 = vpop.f32.mrf.mxu1 }
 0x265   :  { %v1097_v37 = vpop.f32.mrf.mxu0 }
 0x266   :  { %v1098_v50 = vadd.f32 %v1097_v37, %v1014_v49 }
 0x267   :  { %v10182_v19 = vpop.f32.mrf.mxu0 }
 0x268   :  { %v1209_v57 = vadd.f32 %v1208_v33, %v1098_v50 }
 0x26d   :  { %v1377_v21 = vpop.f32.mrf.mxu1 }
 0x26f   :  { %v10239_v47 = vpop.f32.mrf.mxu1 }
 0x276   :  { %v1296_v18 = vpop.f32.mrf.mxu0 }
 0x277   :  { %v1297_v60 = vadd.f32 %v1296_v18, %v1209_v57 }
 0x278   :  { %v10220_v48 = vpop.f32.mrf.mxu0 }
 0x279   :  { %v1378_v61 = vadd.f32 %v1377_v21, %v1297_v60  ;;  %v1557_v21 = vld [vmem:[#allocation2 + $0x18] sm:$0xff] }
 0x27f   :  { %v1551_v52 = vpop.f32.mrf.mxu1 }
 0x281   :  { %v10277_v59 = vpop.f32.mrf.mxu1 }
 0x287   :  { %v1472_v4 = vpop.f32.mrf.mxu0 }
 0x288   :  { %v1473_v44 = vadd.f32 %v1472_v4, %v1378_v61 }
 0x289   :  { %v10258_v5 = vpop.f32.mrf.mxu0 }
 0x28a   :  { %v1552_v6 = vadd.f32 %v1551_v52, %v1473_v44 }
 0x28c   :  { %11883 = vtanh.f32 %v1552_v6 }
 0x299   :  { %v12525_v10 = vpop.eup %11883 }
 0x29a   :  { %v1559_v16 = vsel %vm444_vm0, %v12525_v10, 0  ;;  %v1556_v4 = vadd.f32 %v12525_v10, %v12407_v0 }
 0x29b   :  { %v12529_v11 = vand.u32 4294901760, %v1559_v16 }
 0x29d   :  { %v1635_v12 = vsub.f32 %v1559_v16, %v12529_v11  ;;  %10314 = vmatmul.mubr.f32.vlgmr.msra.gmra.mxu1 %v12529_v11 }
 0x29e   :  { %10336 = vmatpush3.msra.mxu1 %v11986_v25  ;;  %10351 = vmatprep.mubr.msk.f32.mxu1 %vm11915_vm1, %v11914_v24 }
 0x29f   :  { %10337 = vmatprep.subr.mxu1 %v11914_v24  ;;  %v1636_v7 = vand.u32 4294901760, %v1635_v12 }
 0x2a0   :  { %10338 = vmatpush3.msra.mxu1 %v11989_v26 }
 0x2a1   :  { %10339 = vmatprep.subr.mxu1 %v11914_v24  ;;  %v1637_v14 = vsub.f32 %v1635_v12, %v1636_v7 }
 0x2a2   :  { %10340 = vmatpush3.msra.mxu1 %v11991_v27 }
 0x2a3   :  { %10341 = vmatprep.subr.mxu1 %v11914_v24  ;;  %v1638_v17 = vand.u32 4294901760, %v1637_v14 }
 0x2a4   :  { %10342 = vmatpush3.msra.mxu1 %v11999_v30 }
 0x2a5   :  { %10343 = vmatprep.subr.mxu1 %v11914_v24  ;;  %10295 = vmatmul.mubr.f32.vlgmr.msra.gmra.mxu0 %v1638_v17 }
 0x2a6   :  { %10317 = vmatpush3.msra.mxu0 %v11997_v29  ;;  %10344 = vmatpush3.msra.mxu1 %v12002_v31 }
 0x2a7   :  { %10318 = vmatprep.subr.mxu0 %v11914_v24  ;;  %10345 = vmatprep.subr.mxu1 %v11914_v24 }
 0x2a8   :  { %10319 = vmatpush3.msra.mxu0 %v12008_v34  ;;  %10346 = vmatpush3.msra.mxu1 %v12026_v40 }
 0x2a9   :  { %10320 = vmatprep.subr.mxu0 %v11914_v24  ;;  %10347 = vmatprep.subr.mxu1 %v11914_v24 }
 0x2aa   :  { %10321 = vmatpush3.msra.mxu0 %v12011_v35  ;;  %10348 = vmatpush3.msra.mxu1 %v12044_v46 }
 0x2ab   :  { %10322 = vmatprep.subr.mxu0 %v11914_v24  ;;  %10349 = vmatprep.subr.mxu1 %v11914_v24 }
 0x2ac   :  { %10323 = vmatpush3.msra.mxu0 %v12023_v39  ;;  %10350 = vmatpush3.msra.mxu1 %v12069_v56 }
 0x2ad   :  { %10324 = vmatprep.subr.mxu0 %v11914_v24  ;;  %10352 = vmatmul.mubr.f32.vlgmr.msra.gmra.mxu1 %v1636_v7 }
 0x2ae   :  { %10373 = vmatprep.subr.mxu1 %v11914_v24  ;;  %10325 = vmatpush3.msra.mxu0 %v12035_v43 }
 0x2af   :  { %10374 = vmatpush3.msra.mxu1 %v11986_v25  ;;  %10326 = vmatprep.subr.mxu0 %v11914_v24 }
 0x2b0   :  { %10375 = vmatprep.subr.mxu1 %v11914_v24  ;;  %10327 = vmatpush3.msra.mxu0 %v12060_v53 }
 0x2b1   :  { %10376 = vmatpush3.msra.mxu1 %v11989_v26  ;;  %10328 = vmatprep.subr.mxu0 %v11914_v24 }
 0x2b2   :  { %10377 = vmatprep.subr.mxu1 %v11914_v24  ;;  %10329 = vmatpush3.msra.mxu0 %v12075_v58 }
 0x2b3   :  { %10378 = vmatpush3.msra.mxu1 %v11991_v27  ;;  %10330 = vmatprep.subr.mxu0 %v11914_v24 }
 0x2b4   :  { %10379 = vmatprep.subr.mxu1 %v11914_v24  ;;  %10331 = vmatpush3.msra.mxu0 %v12097_v1 }
 0x2b5   :  { %10332 = vmatprep.mubr.msk.f32.mxu0 %vm11915_vm1, %v11914_v24  ;;  %10380 = vmatpush3.msra.mxu1 %v11999_v30 }
 0x2b6   :  { %10333 = vmatmul.mubr.f32.vlgmr.msra.gmra.mxu0 %v1635_v12  ;;  %10354 = vmatprep.subr.mxu0 %v11914_v24 }
 0x2b7   :  { %10381 = vmatprep.subr.mxu1 %v11914_v24  ;;  %10355 = vmatpush3.msra.mxu0 %v12020_v38 }
 0x2b8   :  { %10382 = vmatpush3.msra.mxu1 %v12002_v31  ;;  %10356 = vmatprep.subr.mxu0 %v11914_v24 }
 0x2b9   :  { %10383 = vmatprep.subr.mxu1 %v11914_v24  ;;  %10357 = vmatpush3.msra.mxu0 %v12029_v41 }
 0x2ba   :  { %10384 = vmatpush3.msra.mxu1 %v12026_v40  ;;  %10358 = vmatprep.subr.mxu0 %v11914_v24 }
 0x2bb   :  { %10385 = vmatprep.subr.mxu1 %v11914_v24  ;;  %10359 = vmatpush3.msra.mxu0 %v12032_v42 }
 0x2bc   :  { %10386 = vmatpush3.msra.mxu1 %v12044_v46  ;;  %10360 = vmatprep.subr.mxu0 %v11914_v24 }
 0x2bd   :  { %10387 = vmatprep.subr.mxu1 %v11914_v24  ;;  %10361 = vmatpush3.msra.mxu0 %v12041_v45 }
 0x2be   :  { %10388 = vmatpush3.msra.mxu1 %v12069_v56  ;;  %10389 = vmatprep.mubr.msk.f32.mxu1 %vm11915_vm1, %v11914_v24 }
 0x2bf   :  { %10362 = vmatprep.subr.mxu0 %v11914_v24  ;;  %10390 = vmatmul.mubr.f32.vlgmr.msra.gmra.mxu1 %v12529_v11 }
 0x2c0   :  { %10363 = vmatpush3.msra.mxu0 %v12066_v55  ;;  %10370 = vmatprep.mubr.msk.f32.mxu0 %vm11915_vm1, %v11914_v24 }
 0x2c1   :  { %10364 = vmatprep.subr.mxu0 %v11914_v24  ;;  %10411 = vmatprep.subr.mxu1 %v11914_v24 }
 0x2c2   :  { %10365 = vmatpush3.msra.mxu0 %v12090_v63  ;;  %10412 = vmatpush3.msra.mxu1 %v12055_v51 }
 0x2c3   :  { %10366 = vmatprep.subr.mxu0 %v11914_v24  ;;  %10413 = vmatprep.subr.mxu1 %v11914_v24 }
 0x2c4   :  { %10367 = vmatpush3.msra.mxu0 %v12104_v3  ;;  %10414 = vmatpush3.msra.mxu1 %v12063_v54 }
 0x2c5   :  { %10368 = vmatprep.subr.mxu0 %v11914_v24  ;;  %10415 = vmatprep.subr.mxu1 %v11914_v24 }
 0x2c6   :  { %10369 = vmatpush3.msra.mxu0 %v12120_v9  ;;  %10416 = vmatpush3.msra.mxu1 %v12087_v62 }
 0x2c7   :  { %10371 = vmatmul.mubr.f32.vlgmr.msra.gmra.mxu0 %v12529_v11  ;;  %10417 = vmatprep.subr.mxu1 %v11914_v24 }
 0x2c8   :  { %10418 = vmatpush3.msra.mxu1 %v12101_v2  ;;  %10392 = vmatprep.subr.mxu0 %v11914_v24 }
 0x2c9   :  { %10419 = vmatprep.subr.mxu1 %v11914_v24  ;;  %10393 = vmatpush3.msra.mxu0 %v11986_v25 }
 0x2ca   :  { %10420 = vmatpush3.msra.mxu1 %v12117_v8  ;;  %10394 = vmatprep.subr.mxu0 %v11914_v24 }
 0x2cb   :  { %10421 = vmatprep.subr.mxu1 %v11914_v24  ;;  %10395 = vmatpush3.msra.mxu0 %v11989_v26 }
 0x2cc   :  { %10422 = vmatpush3.msra.mxu1 %v12129_v13  ;;  %10396 = vmatprep.subr.mxu0 %v11914_v24 }
 0x2cd   :  { %10423 = vmatprep.subr.mxu1 %v11914_v24  ;;  %10397 = vmatpush3.msra.mxu0 %v11991_v27 }
 0x2ce   :  { %10424 = vmatpush3.msra.mxu1 %v12137_v15  ;;  %10398 = vmatprep.subr.mxu0 %v11914_v24 }
 0x2cf   :  { %10425 = vmatprep.subr.mxu1 %v11914_v24  ;;  %10399 = vmatpush3.msra.mxu0 %v11999_v30 }
 0x2d0   :  { %10426 = vmatpush3.msra.mxu1 %v12148_v20  ;;  %10400 = vmatprep.subr.mxu0 %v11914_v24 }
 0x2d1   :  { %10427 = vmatprep.mubr.msk.f32.mxu1 %vm11915_vm1, %v11914_v24  ;;  %10449 = vmatprep.subr.mxu1 %v11914_v24 }
 0x2d2   :  { %10401 = vmatpush3.msra.mxu0 %v12002_v31  ;;  %10408 = vmatprep.mubr.msk.f32.mxu0 %vm11915_vm1, %v11914_v24 }
 0x2d3   :  { %10402 = vmatprep.subr.mxu0 %v11914_v24 }
 0x2d4   :  { %10403 = vmatpush3.msra.mxu0 %v12026_v40 }
 0x2d5   :  { %10404 = vmatprep.subr.mxu0 %v11914_v24 }
 0x2d6   :  { %10405 = vmatpush3.msra.mxu0 %v12044_v46 }
 0x2d7   :  { %10406 = vmatprep.subr.mxu0 %v11914_v24 }
 0x2d8   :  { %10407 = vmatpush3.msra.mxu0 %v12069_v56 }
 0x2d9   :  { %10430 = vmatprep.subr.mxu0 %v11914_v24 }
 0x35d   :  { %v1751_v23 = vpop.f32.mrf.mxu1 }
 0x35f   :  { %v10315_v28 = vpop.f32.mrf.mxu1 }
 0x365   :  { %v1640_v22 = vpop.f32.mrf.mxu0 }
 0x366   :  { %v1641_v47 = vadd.f32 %v1640_v22, %v1557_v21 }
 0x367   :  { %v10296_v32 = vpop.f32.mrf.mxu0 }
 0x368   :  { %v1752_v48 = vadd.f32 %v1751_v23, %v1641_v47 }
 0x36d   :  { %v1920_v33 = vpop.f32.mrf.mxu1 }
 0x36f   :  { %v10353_v36 = vpop.f32.mrf.mxu1 }
 0x370   :  { %v2100_v36 = vld [vmem:[#allocation2 + $0x20] sm:$0xff] }
 0x376   :  { %v1839_v37 = vpop.f32.mrf.mxu0 }
 0x377   :  { %v1840_v50 = vadd.f32 %v1839_v37, %v1752_v48 }
 0x378   :  { %v10334_v19 = vpop.f32.mrf.mxu0 }
 0x379   :  { %v1921_v52 = vadd.f32 %v1920_v33, %v1840_v50 }
 0x37f   :  { %v2094_v18 = vpop.f32.mrf.mxu1 }
 0x381   :  { %v10391_v49 = vpop.f32.mrf.mxu1 }
 0x387   :  { %v2015_v57 = vpop.f32.mrf.mxu0 }
 0x388   :  { %v2016_v59 = vadd.f32 %v2015_v57, %v1921_v52 }
 0x389   :  { %v10372_v60 = vpop.f32.mrf.mxu0 }
 0x38a   :  { %v2095_v61 = vadd.f32 %v2094_v18, %v2016_v59 }
 0x38c   :  { %11885 = vtanh.f32 %v2095_v61 }
 0x399   :  { %v11886_v44 = vpop.eup %11885 }
 0x39a   :  { %v12645_v5 = vadd.f32 %v11886_v44, %v1556_v4  ;;  %v2102_v6 = vsel %vm444_vm0, %v11886_v44, 0 }
 0x39b   :  { %v12648_v16 = vand.u32 4294901760, %v2102_v6 }
 0x39d   :  { %v2178_v11 = vsub.f32 %v2102_v6, %v12648_v16  ;;  %10428 = vmatmul.mubr.f32.vlgmr.msra.gmra.mxu1 %v12648_v16 }
 0x39e   :  { %10450 = vmatpush3.msra.mxu1 %v11986_v25  ;;  %10465 = vmatprep.mubr.msk.f32.mxu1 %vm11915_vm1, %v11914_v24 }
 0x39f   :  { %10451 = vmatprep.subr.mxu1 %v11914_v24  ;;  %v2179_v12 = vand.u32 4294901760, %v2178_v11 }
 0x3a0   :  { %10452 = vmatpush3.msra.mxu1 %v11989_v26 }
 0x3a1   :  { %10453 = vmatprep.subr.mxu1 %v11914_v24  ;;  %v2180_v0 = vsub.f32 %v2178_v11, %v2179_v12 }
 0x3a2   :  { %10454 = vmatpush3.msra.mxu1 %v11991_v27 }
 0x3a3   :  { %10455 = vmatprep.subr.mxu1 %v11914_v24  ;;  %v2181_v10 = vand.u32 4294901760, %v2180_v0 }
 0x3a4   :  { %10456 = vmatpush3.msra.mxu1 %v11999_v30 }
 0x3a5   :  { %10457 = vmatprep.subr.mxu1 %v11914_v24  ;;  %10409 = vmatmul.mubr.f32.vlgmr.msra.gmra.mxu0 %v2181_v10 }
 0x3a6   :  { %10431 = vmatpush3.msra.mxu0 %v11997_v29  ;;  %10458 = vmatpush3.msra.mxu1 %v12002_v31 }
 0x3a7   :  { %10432 = vmatprep.subr.mxu0 %v11914_v24  ;;  %10459 = vmatprep.subr.mxu1 %v11914_v24 }
 0x3a8   :  { %10433 = vmatpush3.msra.mxu0 %v12008_v34  ;;  %10460 = vmatpush3.msra.mxu1 %v12026_v40 }
 0x3a9   :  { %10434 = vmatprep.subr.mxu0 %v11914_v24  ;;  %10461 = vmatprep.subr.mxu1 %v11914_v24 }
 0x3aa   :  { %10435 = vmatpush3.msra.mxu0 %v12011_v35  ;;  %10462 = vmatpush3.msra.mxu1 %v12044_v46 }
 0x3ab   :  { %10436 = vmatprep.subr.mxu0 %v11914_v24  ;;  %10463 = vmatprep.subr.mxu1 %v11914_v24 }
 0x3ac   :  { %10437 = vmatpush3.msra.mxu0 %v12023_v39  ;;  %10464 = vmatpush3.msra.mxu1 %v12069_v56 }
 0x3ad   :  { %10438 = vmatprep.subr.mxu0 %v11914_v24  ;;  %10466 = vmatmul.mubr.f32.vlgmr.msra.gmra.mxu1 %v2179_v12 }
 0x3ae   :  { %10487 = vmatprep.subr.mxu1 %v11914_v24  ;;  %10439 = vmatpush3.msra.mxu0 %v12035_v43 }
 0x3af   :  { %10488 = vmatpush3.msra.mxu1 %v11986_v25  ;;  %10440 = vmatprep.subr.mxu0 %v11914_v24 }
 0x3b0   :  { %10489 = vmatprep.subr.mxu1 %v11914_v24  ;;  %10441 = vmatpush3.msra.mxu0 %v12060_v53 }
 0x3b1   :  { %10490 = vmatpush3.msra.mxu1 %v11989_v26  ;;  %10442 = vmatprep.subr.mxu0 %v11914_v24 }
 0x3b2   :  { %10491 = vmatprep.subr.mxu1 %v11914_v24  ;;  %10443 = vmatpush3.msra.mxu0 %v12075_v58 }
 0x3b3   :  { %10492 = vmatpush3.msra.mxu1 %v11991_v27  ;;  %10444 = vmatprep.subr.mxu0 %v11914_v24 }
 0x3b4   :  { %10493 = vmatprep.subr.mxu1 %v11914_v24  ;;  %10445 = vmatpush3.msra.mxu0 %v12097_v1 }
 0x3b5   :  { %10446 = vmatprep.mubr.msk.f32.mxu0 %vm11915_vm1, %v11914_v24  ;;  %10494 = vmatpush3.msra.mxu1 %v11999_v30 }
 0x3b6   :  { %10447 = vmatmul.mubr.f32.vlgmr.msra.gmra.mxu0 %v2178_v11  ;;  %10468 = vmatprep.subr.mxu0 %v11914_v24 }
 0x3b7   :  { %10495 = vmatprep.subr.mxu1 %v11914_v24  ;;  %10469 = vmatpush3.msra.mxu0 %v12020_v38 }
 0x3b8   :  { %10496 = vmatpush3.msra.mxu1 %v12002_v31  ;;  %10470 = vmatprep.subr.mxu0 %v11914_v24 }
 0x3b9   :  { %10497 = vmatprep.subr.mxu1 %v11914_v24  ;;  %10471 = vmatpush3.msra.mxu0 %v12029_v41 }
 0x3ba   :  { %10498 = vmatpush3.msra.mxu1 %v12026_v40  ;;  %10472 = vmatprep.subr.mxu0 %v11914_v24 }
 0x3bb   :  { %10499 = vmatprep.subr.mxu1 %v11914_v24  ;;  %10473 = vmatpush3.msra.mxu0 %v12032_v42 }
 0x3bc   :  { %10500 = vmatpush3.msra.mxu1 %v12044_v46  ;;  %10474 = vmatprep.subr.mxu0 %v11914_v24 }
 0x3bd   :  { %10501 = vmatprep.subr.mxu1 %v11914_v24  ;;  %10475 = vmatpush3.msra.mxu0 %v12041_v45 }
 0x3be   :  { %10502 = vmatpush3.msra.mxu1 %v12069_v56  ;;  %10503 = vmatprep.mubr.msk.f32.mxu1 %vm11915_vm1, %v11914_v24 }
 0x3bf   :  { %10476 = vmatprep.subr.mxu0 %v11914_v24  ;;  %10504 = vmatmul.mubr.f32.vlgmr.msra.gmra.mxu1 %v12648_v16 }
 0x3c0   :  { %10477 = vmatpush3.msra.mxu0 %v12066_v55  ;;  %10484 = vmatprep.mubr.msk.f32.mxu0 %vm11915_vm1, %v11914_v24 }
 0x3c1   :  { %10478 = vmatprep.subr.mxu0 %v11914_v24  ;;  %10525 = vmatprep.subr.mxu1 %v11914_v24 }
 0x3c2   :  { %10479 = vmatpush3.msra.mxu0 %v12090_v63  ;;  %10526 = vmatpush3.msra.mxu1 %v12055_v51 }
 0x3c3   :  { %10480 = vmatprep.subr.mxu0 %v11914_v24  ;;  %10527 = vmatprep.subr.mxu1 %v11914_v24 }
 0x3c4   :  { %10481 = vmatpush3.msra.mxu0 %v12104_v3  ;;  %10528 = vmatpush3.msra.mxu1 %v12063_v54 }
 0x3c5   :  { %10482 = vmatprep.subr.mxu0 %v11914_v24  ;;  %10529 = vmatprep.subr.mxu1 %v11914_v24 }
 0x3c6   :  { %10483 = vmatpush3.msra.mxu0 %v12120_v9  ;;  %10530 = vmatpush3.msra.mxu1 %v12087_v62 }
 0x3c7   :  { %10485 = vmatmul.mubr.f32.vlgmr.msra.gmra.mxu0 %v12648_v16  ;;  %10531 = vmatprep.subr.mxu1 %v11914_v24 }
 0x3c8   :  { %10532 = vmatpush3.msra.mxu1 %v12101_v2  ;;  %10506 = vmatprep.subr.mxu0 %v11914_v24 }
 0x3c9   :  { %10533 = vmatprep.subr.mxu1 %v11914_v24  ;;  %10507 = vmatpush3.msra.mxu0 %v11986_v25 }
 0x3ca   :  { %10534 = vmatpush3.msra.mxu1 %v12117_v8  ;;  %10508 = vmatprep.subr.mxu0 %v11914_v24 }
 0x3cb   :  { %10535 = vmatprep.subr.mxu1 %v11914_v24  ;;  %10509 = vmatpush3.msra.mxu0 %v11989_v26 }
 0x3cc   :  { %10536 = vmatpush3.msra.mxu1 %v12129_v13  ;;  %10510 = vmatprep.subr.mxu0 %v11914_v24 }
 0x3cd   :  { %10537 = vmatprep.subr.mxu1 %v11914_v24  ;;  %10511 = vmatpush3.msra.mxu0 %v11991_v27 }
 0x3ce   :  { %10538 = vmatpush3.msra.mxu1 %v12137_v15  ;;  %10512 = vmatprep.subr.mxu0 %v11914_v24 }
 0x3cf   :  { %10539 = vmatprep.subr.mxu1 %v11914_v24  ;;  %10513 = vmatpush3.msra.mxu0 %v11999_v30 }
 0x3d0   :  { %10540 = vmatpush3.msra.mxu1 %v12148_v20  ;;  %10514 = vmatprep.subr.mxu0 %v11914_v24 }
 0x3d1   :  { %10541 = vmatprep.mubr.msk.f32.mxu1 %vm11915_vm1, %v11914_v24  ;;  %10563 = vmatprep.subr.mxu1 %v11914_v24 }
 0x3d2   :  { %10515 = vmatpush3.msra.mxu0 %v12002_v31  ;;  %10522 = vmatprep.mubr.msk.f32.mxu0 %vm11915_vm1, %v11914_v24 }
 0x3d3   :  { %10516 = vmatprep.subr.mxu0 %v11914_v24 }
 0x3d4   :  { %10517 = vmatpush3.msra.mxu0 %v12026_v40 }
 0x3d5   :  { %10518 = vmatprep.subr.mxu0 %v11914_v24 }
 0x3d6   :  { %10519 = vmatpush3.msra.mxu0 %v12044_v46 }
 0x3d7   :  { %10520 = vmatprep.subr.mxu0 %v11914_v24 }
 0x3d8   :  { %10521 = vmatpush3.msra.mxu0 %v12069_v56 }
 0x3d9   :  { %10544 = vmatprep.subr.mxu0 %v11914_v24 }
 0x45d   :  { %v2294_v7 = vpop.f32.mrf.mxu1 }
 0x45f   :  { %v10429_v14 = vpop.f32.mrf.mxu1 }
 0x465   :  { %v2183_v17 = vpop.f32.mrf.mxu0 }
 0x466   :  { %v2184_v37 = vadd.f32 %v2183_v17, %v2100_v36 }
 0x467   :  { %v10410_v23 = vpop.f32.mrf.mxu0 }
 0x468   :  { %v2295_v21 = vadd.f32 %v2294_v7, %v2184_v37 }
 0x46d   :  { %v2463_v28 = vpop.f32.mrf.mxu1 }
 0x46f   :  { %v10467_v22 = vpop.f32.mrf.mxu1 }
 0x476   :  { %v2382_v32 = vpop.f32.mrf.mxu0 }
 0x477   :  { %v2383_v18 = vadd.f32 %v2382_v32, %v2295_v21 }
 0x478   :  { %v10448_v33 = vpop.f32.mrf.mxu0 }
 0x479   :  { %v2464_v48 = vadd.f32 %v2463_v28, %v2383_v18  ;;  %v2643_v28 = vld [vmem:[#allocation2 + $0x28] sm:$0xff] }
 0x47f   :  { %v2637_v19 = vpop.f32.mrf.mxu1 }
 0x481   :  { %v10505_v47 = vpop.f32.mrf.mxu1 }
 0x487   :  { %v2558_v49 = vpop.f32.mrf.mxu0 }
 0x488   :  { %v2559_v50 = vadd.f32 %v2558_v49, %v2464_v48 }
 0x489   :  { %v10486_v52 = vpop.f32.mrf.mxu0 }
 0x48a   :  { %v2638_v57 = vadd.f32 %v2637_v19, %v2559_v50 }
 0x48c   :  { %11887 = vtanh.f32 %v2638_v57 }
 0x499   :  { %v11888_v59 = vpop.eup %11887 }
 0x49a   :  { %v12763_v60 = vadd.f32 %v11888_v59, %v12645_v5  ;;  %v2645_v61 = vsel %vm444_vm0, %v11888_v59, 0 }
 0x49b   :  { %v12766_v4 = vand.u32 4294901760, %v2645_v61 }
 0x49d   :  { %v2721_v44 = vsub.f32 %v2645_v61, %v12766_v4  ;;  %10542 = vmatmul.mubr.f32.vlgmr.msra.gmra.mxu1 %v12766_v4 }
 0x49e   :  { %10564 = vmatpush3.msra.mxu1 %v11986_v25  ;;  %10579 = vmatprep.mubr.msk.f32.mxu1 %vm11915_vm1, %v11914_v24 }
 0x49f   :  { %10565 = vmatprep.subr.mxu1 %v11914_v24  ;;  %v2722_v6 = vand.u32 4294901760, %v2721_v44 }
 0x4a0   :  { %10566 = vmatpush3.msra.mxu1 %v11989_v26 }
 0x4a1   :  { %10567 = vmatprep.subr.mxu1 %v11914_v24  ;;  %v2723_v5 = vsub.f32 %v2721_v44, %v2722_v6 }
 0x4a2   :  { %10568 = vmatpush3.msra.mxu1 %v11991_v27 }
 0x4a3   :  { %10569 = vmatprep.subr.mxu1 %v11914_v24  ;;  %v2724_v16 = vand.u32 4294901760, %v2723_v5 }
 0x4a4   :  { %10570 = vmatpush3.msra.mxu1 %v11999_v30 }
 0x4a5   :  { %10571 = vmatprep.subr.mxu1 %v11914_v24  ;;  %10523 = vmatmul.mubr.f32.vlgmr.msra.gmra.mxu0 %v2724_v16 }
 0x4a6   :  { %10545 = vmatpush3.msra.mxu0 %v11997_v29  ;;  %10572 = vmatpush3.msra.mxu1 %v12002_v31 }
 0x4a7   :  { %10546 = vmatprep.subr.mxu0 %v11914_v24  ;;  %10573 = vmatprep.subr.mxu1 %v11914_v24 }
 0x4a8   :  { %10547 = vmatpush3.msra.mxu0 %v12008_v34  ;;  %10574 = vmatpush3.msra.mxu1 %v12026_v40 }
 0x4a9   :  { %10548 = vmatprep.subr.mxu0 %v11914_v24  ;;  %10575 = vmatprep.subr.mxu1 %v11914_v24 }
 0x4aa   :  { %10549 = vmatpush3.msra.mxu0 %v12011_v35  ;;  %10576 = vmatpush3.msra.mxu1 %v12044_v46 }
 0x4ab   :  { %10550 = vmatprep.subr.mxu0 %v11914_v24  ;;  %10577 = vmatprep.subr.mxu1 %v11914_v24 }
 0x4ac   :  { %10551 = vmatpush3.msra.mxu0 %v12023_v39  ;;  %10578 = vmatpush3.msra.mxu1 %v12069_v56 }
 0x4ad   :  { %10552 = vmatprep.subr.mxu0 %v11914_v24  ;;  %10580 = vmatmul.mubr.f32.vlgmr.msra.gmra.mxu1 %v2722_v6 }
 0x4ae   :  { %10601 = vmatprep.subr.mxu1 %v11914_v24  ;;  %10553 = vmatpush3.msra.mxu0 %v12035_v43 }
 0x4af   :  { %10602 = vmatpush3.msra.mxu1 %v11986_v25  ;;  %10554 = vmatprep.subr.mxu0 %v11914_v24 }
 0x4b0   :  { %10603 = vmatprep.subr.mxu1 %v11914_v24  ;;  %10555 = vmatpush3.msra.mxu0 %v12060_v53 }
 0x4b1   :  { %10604 = vmatpush3.msra.mxu1 %v11989_v26  ;;  %10556 = vmatprep.subr.mxu0 %v11914_v24 }
 0x4b2   :  { %10605 = vmatprep.subr.mxu1 %v11914_v24  ;;  %10557 = vmatpush3.msra.mxu0 %v12075_v58 }
 0x4b3   :  { %10606 = vmatpush3.msra.mxu1 %v11991_v27  ;;  %10558 = vmatprep.subr.mxu0 %v11914_v24 }
 0x4b4   :  { %10607 = vmatprep.subr.mxu1 %v11914_v24  ;;  %10559 = vmatpush3.msra.mxu0 %v12097_v1 }
 0x4b5   :  { %10560 = vmatprep.mubr.msk.f32.mxu0 %vm11915_vm1, %v11914_v24  ;;  %10608 = vmatpush3.msra.mxu1 %v11999_v30 }
 0x4b6   :  { %10561 = vmatmul.mubr.f32.vlgmr.msra.gmra.mxu0 %v2721_v44  ;;  %10582 = vmatprep.subr.mxu0 %v11914_v24 }
 0x4b7   :  { %10609 = vmatprep.subr.mxu1 %v11914_v24  ;;  %10583 = vmatpush3.msra.mxu0 %v12020_v38 }
 0x4b8   :  { %10610 = vmatpush3.msra.mxu1 %v12002_v31  ;;  %10584 = vmatprep.subr.mxu0 %v11914_v24 }
 0x4b9   :  { %10611 = vmatprep.subr.mxu1 %v11914_v24  ;;  %10585 = vmatpush3.msra.mxu0 %v12029_v41 }
 0x4ba   :  { %10612 = vmatpush3.msra.mxu1 %v12026_v40  ;;  %10586 = vmatprep.subr.mxu0 %v11914_v24 }
 0x4bb   :  { %10613 = vmatprep.subr.mxu1 %v11914_v24  ;;  %10587 = vmatpush3.msra.mxu0 %v12032_v42 }
 0x4bc   :  { %10614 = vmatpush3.msra.mxu1 %v12044_v46  ;;  %10588 = vmatprep.subr.mxu0 %v11914_v24 }
 0x4bd   :  { %10615 = vmatprep.subr.mxu1 %v11914_v24  ;;  %10589 = vmatpush3.msra.mxu0 %v12041_v45 }
 0x4be   :  { %10616 = vmatpush3.msra.mxu1 %v12069_v56  ;;  %10617 = vmatprep.mubr.msk.f32.mxu1 %vm11915_vm1, %v11914_v24 }
 0x4bf   :  { %10590 = vmatprep.subr.mxu0 %v11914_v24  ;;  %10618 = vmatmul.mubr.f32.vlgmr.msra.gmra.mxu1 %v12766_v4 }
 0x4c0   :  { %10591 = vmatpush3.msra.mxu0 %v12066_v55  ;;  %10598 = vmatprep.mubr.msk.f32.mxu0 %vm11915_vm1, %v11914_v24 }
 0x4c1   :  { %10592 = vmatprep.subr.mxu0 %v11914_v24  ;;  %10639 = vmatprep.subr.mxu1 %v11914_v24 }
 0x4c2   :  { %10593 = vmatpush3.msra.mxu0 %v12090_v63  ;;  %10640 = vmatpush3.msra.mxu1 %v12055_v51 }
 0x4c3   :  { %10594 = vmatprep.subr.mxu0 %v11914_v24  ;;  %10641 = vmatprep.subr.mxu1 %v11914_v24 }
 0x4c4   :  { %10595 = vmatpush3.msra.mxu0 %v12104_v3  ;;  %10642 = vmatpush3.msra.mxu1 %v12063_v54 }
 0x4c5   :  { %10596 = vmatprep.subr.mxu0 %v11914_v24  ;;  %10643 = vmatprep.subr.mxu1 %v11914_v24 }
 0x4c6   :  { %10597 = vmatpush3.msra.mxu0 %v12120_v9  ;;  %10644 = vmatpush3.msra.mxu1 %v12087_v62 }
 0x4c7   :  { %10599 = vmatmul.mubr.f32.vlgmr.msra.gmra.mxu0 %v12766_v4  ;;  %10645 = vmatprep.subr.mxu1 %v11914_v24 }
 0x4c8   :  { %10646 = vmatpush3.msra.mxu1 %v12101_v2  ;;  %10620 = vmatprep.subr.mxu0 %v11914_v24 }
 0x4c9   :  { %10647 = vmatprep.subr.mxu1 %v11914_v24  ;;  %10621 = vmatpush3.msra.mxu0 %v11986_v25 }
 0x4ca   :  { %10648 = vmatpush3.msra.mxu1 %v12117_v8  ;;  %10622 = vmatprep.subr.mxu0 %v11914_v24 }
 0x4cb   :  { %10649 = vmatprep.subr.mxu1 %v11914_v24  ;;  %10623 = vmatpush3.msra.mxu0 %v11989_v26 }
 0x4cc   :  { %10650 = vmatpush3.msra.mxu1 %v12129_v13  ;;  %10624 = vmatprep.subr.mxu0 %v11914_v24 }
 0x4cd   :  { %10651 = vmatprep.subr.mxu1 %v11914_v24  ;;  %10625 = vmatpush3.msra.mxu0 %v11991_v27 }
 0x4ce   :  { %10652 = vmatpush3.msra.mxu1 %v12137_v15  ;;  %10626 = vmatprep.subr.mxu0 %v11914_v24 }
 0x4cf   :  { %10653 = vmatprep.subr.mxu1 %v11914_v24  ;;  %10627 = vmatpush3.msra.mxu0 %v11999_v30 }
 0x4d0   :  { %10654 = vmatpush3.msra.mxu1 %v12148_v20  ;;  %10628 = vmatprep.subr.mxu0 %v11914_v24 }
 0x4d1   :  { %10655 = vmatprep.mubr.msk.f32.mxu1 %vm11915_vm1, %v11914_v24  ;;  %10677 = vmatprep.subr.mxu1 %v11914_v24 }
 0x4d2   :  { %10629 = vmatpush3.msra.mxu0 %v12002_v31  ;;  %10636 = vmatprep.mubr.msk.f32.mxu0 %vm11915_vm1, %v11914_v24 }
 0x4d3   :  { %10630 = vmatprep.subr.mxu0 %v11914_v24 }
 0x4d4   :  { %10631 = vmatpush3.msra.mxu0 %v12026_v40 }
 0x4d5   :  { %10632 = vmatprep.subr.mxu0 %v11914_v24 }
 0x4d6   :  { %10633 = vmatpush3.msra.mxu0 %v12044_v46 }
 0x4d7   :  { %10634 = vmatprep.subr.mxu0 %v11914_v24 }
 0x4d8   :  { %10635 = vmatpush3.msra.mxu0 %v12069_v56 }
 0x4d9   :  { %10658 = vmatprep.subr.mxu0 %v11914_v24 }
 0x55d   :  { %v2837_v11 = vpop.f32.mrf.mxu1 }
 0x55f   :  { %v10543_v12 = vpop.f32.mrf.mxu1 }
 0x565   :  { %v2726_v0 = vpop.f32.mrf.mxu0 }
 0x566   :  { %v2727_v22 = vadd.f32 %v2726_v0, %v2643_v28 }
 0x567   :  { %v10524_v10 = vpop.f32.mrf.mxu0 }
 0x568   :  { %v2838_v33 = vadd.f32 %v2837_v11, %v2727_v22 }
 0x56d   :  { %v3006_v7 = vpop.f32.mrf.mxu1 }
 0x56f   :  { %v10581_v14 = vpop.f32.mrf.mxu1 }
 0x576   :  { %v2925_v17 = vpop.f32.mrf.mxu0 }
 0x577   :  { %v2926_v37 = vadd.f32 %v2925_v17, %v2838_v33 }
 0x578   :  { %v10562_v23 = vpop.f32.mrf.mxu0 }
 0x579   :  { %v3007_v19 = vadd.f32 %v3006_v7, %v2926_v37  ;;  %v3186_v7 = vld [vmem:[#allocation2 + $0x30] sm:$0xff] }
 0x57f   :  { %v3180_v32 = vpop.f32.mrf.mxu1 }
 0x581   :  { %v10619_v36 = vpop.f32.mrf.mxu1 }
 0x587   :  { %v3101_v21 = vpop.f32.mrf.mxu0 }
 0x588   :  { %v3102_v47 = vadd.f32 %v3101_v21, %v3007_v19 }
 0x589   :  { %v10600_v18 = vpop.f32.mrf.mxu0 }
 0x58a   :  { %v3181_v48 = vadd.f32 %v3180_v32, %v3102_v47 }
 0x58c   :  { %11889 = vtanh.f32 %v3181_v48 }
 0x599   :  { %v11890_v49 = vpop.eup %11889 }
 0x59a   :  { %v12881_v50 = vadd.f32 %v11890_v49, %v12763_v60  ;;  %v3188_v52 = vsel %vm444_vm0, %v11890_v49, 0 }
 0x59b   :  { %v12884_v57 = vand.u32 4294901760, %v3188_v52 }
 0x59d   :  { %v3264_v59 = vsub.f32 %v3188_v52, %v12884_v57  ;;  %10656 = vmatmul.mubr.f32.vlgmr.msra.gmra.mxu1 %v12884_v57 }
 0x59e   :  { %10678 = vmatpush3.msra.mxu1 %v11986_v25  ;;  %10693 = vmatprep.mubr.msk.f32.mxu1 %vm11915_vm1, %v11914_v24 }
 0x59f   :  { %10679 = vmatprep.subr.mxu1 %v11914_v24  ;;  %v3265_v61 = vand.u32 4294901760, %v3264_v59 }
 0x5a0   :  { %10680 = vmatpush3.msra.mxu1 %v11989_v26 }
 0x5a1   :  { %10681 = vmatprep.subr.mxu1 %v11914_v24  ;;  %v3266_v60 = vsub.f32 %v3264_v59, %v3265_v61 }
 0x5a2   :  { %10682 = vmatpush3.msra.mxu1 %v11991_v27 }
 0x5a3   :  { %10683 = vmatprep.subr.mxu1 %v11914_v24  ;;  %v3267_v4 = vand.u32 4294901760, %v3266_v60 }
 0x5a4   :  { %10684 = vmatpush3.msra.mxu1 %v11999_v30 }
 0x5a5   :  { %10685 = vmatprep.subr.mxu1 %v11914_v24  ;;  %10637 = vmatmul.mubr.f32.vlgmr.msra.gmra.mxu0 %v3267_v4 }
 0x5a6   :  { %10659 = vmatpush3.msra.mxu0 %v11997_v29  ;;  %10686 = vmatpush3.msra.mxu1 %v12002_v31 }
 0x5a7   :  { %10660 = vmatprep.subr.mxu0 %v11914_v24  ;;  %10687 = vmatprep.subr.mxu1 %v11914_v24 }
 0x5a8   :  { %10661 = vmatpush3.msra.mxu0 %v12008_v34  ;;  %10688 = vmatpush3.msra.mxu1 %v12026_v40 }
 0x5a9   :  { %10662 = vmatprep.subr.mxu0 %v11914_v24  ;;  %10689 = vmatprep.subr.mxu1 %v11914_v24 }
 0x5aa   :  { %10663 = vmatpush3.msra.mxu0 %v12011_v35  ;;  %10690 = vmatpush3.msra.mxu1 %v12044_v46 }
 0x5ab   :  { %10664 = vmatprep.subr.mxu0 %v11914_v24  ;;  %10691 = vmatprep.subr.mxu1 %v11914_v24 }
 0x5ac   :  { %10665 = vmatpush3.msra.mxu0 %v12023_v39  ;;  %10692 = vmatpush3.msra.mxu1 %v12069_v56 }
 0x5ad   :  { %10666 = vmatprep.subr.mxu0 %v11914_v24  ;;  %10694 = vmatmul.mubr.f32.vlgmr.msra.gmra.mxu1 %v3265_v61 }
 0x5ae   :  { %10715 = vmatprep.subr.mxu1 %v11914_v24  ;;  %10667 = vmatpush3.msra.mxu0 %v12035_v43 }
 0x5af   :  { %10716 = vmatpush3.msra.mxu1 %v11986_v25  ;;  %10668 = vmatprep.subr.mxu0 %v11914_v24 }
 0x5b0   :  { %10717 = vmatprep.subr.mxu1 %v11914_v24  ;;  %10669 = vmatpush3.msra.mxu0 %v12060_v53 }
 0x5b1   :  { %10718 = vmatpush3.msra.mxu1 %v11989_v26  ;;  %10670 = vmatprep.subr.mxu0 %v11914_v24 }
 0x5b2   :  { %10719 = vmatprep.subr.mxu1 %v11914_v24  ;;  %10671 = vmatpush3.msra.mxu0 %v12075_v58 }
 0x5b3   :  { %10720 = vmatpush3.msra.mxu1 %v11991_v27  ;;  %10672 = vmatprep.subr.mxu0 %v11914_v24 }
 0x5b4   :  { %10721 = vmatprep.subr.mxu1 %v11914_v24  ;;  %10673 = vmatpush3.msra.mxu0 %v12097_v1 }
 0x5b5   :  { %10674 = vmatprep.mubr.msk.f32.mxu0 %vm11915_vm1, %v11914_v24  ;;  %10722 = vmatpush3.msra.mxu1 %v11999_v30 }
 0x5b6   :  { %10675 = vmatmul.mubr.f32.vlgmr.msra.gmra.mxu0 %v3264_v59  ;;  %10696 = vmatprep.subr.mxu0 %v11914_v24 }
 0x5b7   :  { %10723 = vmatprep.subr.mxu1 %v11914_v24  ;;  %10697 = vmatpush3.msra.mxu0 %v12020_v38 }
 0x5b8   :  { %10724 = vmatpush3.msra.mxu1 %v12002_v31  ;;  %10698 = vmatprep.subr.mxu0 %v11914_v24 }
 0x5b9   :  { %10725 = vmatprep.subr.mxu1 %v11914_v24  ;;  %10699 = vmatpush3.msra.mxu0 %v12029_v41 }
 0x5ba   :  { %10726 = vmatpush3.msra.mxu1 %v12026_v40  ;;  %10700 = vmatprep.subr.mxu0 %v11914_v24 }
 0x5bb   :  { %10727 = vmatprep.subr.mxu1 %v11914_v24  ;;  %10701 = vmatpush3.msra.mxu0 %v12032_v42 }
 0x5bc   :  { %10728 = vmatpush3.msra.mxu1 %v12044_v46  ;;  %10702 = vmatprep.subr.mxu0 %v11914_v24 }
 0x5bd   :  { %10729 = vmatprep.subr.mxu1 %v11914_v24  ;;  %10703 = vmatpush3.msra.mxu0 %v12041_v45 }
 0x5be   :  { %10730 = vmatpush3.msra.mxu1 %v12069_v56  ;;  %10731 = vmatprep.mubr.msk.f32.mxu1 %vm11915_vm1, %v11914_v24 }
 0x5bf   :  { %10704 = vmatprep.subr.mxu0 %v11914_v24  ;;  %10732 = vmatmul.mubr.f32.vlgmr.msra.gmra.mxu1 %v12884_v57 }
 0x5c0   :  { %10705 = vmatpush3.msra.mxu0 %v12066_v55  ;;  %10712 = vmatprep.mubr.msk.f32.mxu0 %vm11915_vm1, %v11914_v24 }
 0x5c1   :  { %10706 = vmatprep.subr.mxu0 %v11914_v24  ;;  %10753 = vmatprep.subr.mxu1 %v11914_v24 }
 0x5c2   :  { %10707 = vmatpush3.msra.mxu0 %v12090_v63  ;;  %10754 = vmatpush3.msra.mxu1 %v12055_v51 }
 0x5c3   :  { %10708 = vmatprep.subr.mxu0 %v11914_v24  ;;  %10755 = vmatprep.subr.mxu1 %v11914_v24 }
 0x5c4   :  { %10709 = vmatpush3.msra.mxu0 %v12104_v3  ;;  %10756 = vmatpush3.msra.mxu1 %v12063_v54 }
 0x5c5   :  { %10710 = vmatprep.subr.mxu0 %v11914_v24  ;;  %10757 = vmatprep.subr.mxu1 %v11914_v24 }
 0x5c6   :  { %10711 = vmatpush3.msra.mxu0 %v12120_v9  ;;  %10758 = vmatpush3.msra.mxu1 %v12087_v62 }
 0x5c7   :  { %10713 = vmatmul.mubr.f32.vlgmr.msra.gmra.mxu0 %v12884_v57  ;;  %10759 = vmatprep.subr.mxu1 %v11914_v24 }
 0x5c8   :  { %10760 = vmatpush3.msra.mxu1 %v12101_v2  ;;  %10734 = vmatprep.subr.mxu0 %v11914_v24 }
 0x5c9   :  { %10761 = vmatprep.subr.mxu1 %v11914_v24  ;;  %10735 = vmatpush3.msra.mxu0 %v11986_v25 }
 0x5ca   :  { %10762 = vmatpush3.msra.mxu1 %v12117_v8  ;;  %10736 = vmatprep.subr.mxu0 %v11914_v24 }
 0x5cb   :  { %10763 = vmatprep.subr.mxu1 %v11914_v24  ;;  %10737 = vmatpush3.msra.mxu0 %v11989_v26 }
 0x5cc   :  { %10764 = vmatpush3.msra.mxu1 %v12129_v13  ;;  %10738 = vmatprep.subr.mxu0 %v11914_v24 }
 0x5cd   :  { %10765 = vmatprep.subr.mxu1 %v11914_v24  ;;  %10739 = vmatpush3.msra.mxu0 %v11991_v27 }
 0x5ce   :  { %10766 = vmatpush3.msra.mxu1 %v12137_v15  ;;  %10740 = vmatprep.subr.mxu0 %v11914_v24 }
 0x5cf   :  { %10767 = vmatprep.subr.mxu1 %v11914_v24  ;;  %10741 = vmatpush3.msra.mxu0 %v11999_v30 }
 0x5d0   :  { %10768 = vmatpush3.msra.mxu1 %v12148_v20  ;;  %10742 = vmatprep.subr.mxu0 %v11914_v24 }
 0x5d1   :  { %10769 = vmatprep.mubr.msk.f32.mxu1 %vm11915_vm1, %v11914_v24  ;;  %10791 = vmatprep.subr.mxu1 %v11914_v24 }
 0x5d2   :  { %10743 = vmatpush3.msra.mxu0 %v12002_v31  ;;  %10750 = vmatprep.mubr.msk.f32.mxu0 %vm11915_vm1, %v11914_v24 }
 0x5d3   :  { %10744 = vmatprep.subr.mxu0 %v11914_v24 }
 0x5d4   :  { %10745 = vmatpush3.msra.mxu0 %v12026_v40 }
 0x5d5   :  { %10746 = vmatprep.subr.mxu0 %v11914_v24 }
 0x5d6   :  { %10747 = vmatpush3.msra.mxu0 %v12044_v46 }
 0x5d7   :  { %10748 = vmatprep.subr.mxu0 %v11914_v24 }
 0x5d8   :  { %10749 = vmatpush3.msra.mxu0 %v12069_v56 }
 0x5d9   :  { %10772 = vmatprep.subr.mxu0 %v11914_v24 }
 0x65d   :  { %v3380_v44 = vpop.f32.mrf.mxu1 }
 0x65f   :  { %v10657_v6 = vpop.f32.mrf.mxu1 }
 0x665   :  { %v3269_v5 = vpop.f32.mrf.mxu0 }
 0x666   :  { %v3270_v14 = vadd.f32 %v3269_v5, %v3186_v7 }
 0x667   :  { %v10638_v16 = vpop.f32.mrf.mxu0 }
 0x668   :  { %v3381_v23 = vadd.f32 %v3380_v44, %v3270_v14 }
 0x66d   :  { %v3549_v11 = vpop.f32.mrf.mxu1 }
 0x66f   :  { %v10695_v12 = vpop.f32.mrf.mxu1 }
 0x676   :  { %v3468_v0 = vpop.f32.mrf.mxu0 }
 0x677   :  { %v3469_v22 = vadd.f32 %v3468_v0, %v3381_v23 }
 0x678   :  { %v10676_v10 = vpop.f32.mrf.mxu0 }
 0x679   :  { %v3550_v32 = vadd.f32 %v3549_v11, %v3469_v22  ;;  %v3729_v11 = vld [vmem:[#allocation2 + $0x38] sm:$0xff] }
 0x67f   :  { %v3723_v17 = vpop.f32.mrf.mxu1 }
 0x681   :  { %v10733_v28 = vpop.f32.mrf.mxu1 }
 0x687   :  { %v3644_v33 = vpop.f32.mrf.mxu0 }
 0x688   :  { %v3645_v36 = vadd.f32 %v3644_v33, %v3550_v32 }
 0x689   :  { %v10714_v37 = vpop.f32.mrf.mxu0 }
 0x68a   :  { %v3724_v19 = vadd.f32 %v3723_v17, %v3645_v36 }
 0x68c   :  { %11891 = vtanh.f32 %v3724_v19 }
 0x699   :  { %v11892_v21 = vpop.eup %11891 }
 0x69a   :  { %v12999_v47 = vadd.f32 %v11892_v21, %v12881_v50  ;;  %v3731_v18 = vsel %vm444_vm0, %v11892_v21, 0 }
 0x69b   :  { %v13002_v48 = vand.u32 4294901760, %v3731_v18 }
 0x69d   :  { %v3807_v49 = vsub.f32 %v3731_v18, %v13002_v48  ;;  %10770 = vmatmul.mubr.f32.vlgmr.msra.gmra.mxu1 %v13002_v48 }
 0x69e   :  { %10792 = vmatpush3.msra.mxu1 %v11986_v25  ;;  %10807 = vmatprep.mubr.msk.f32.mxu1 %vm11915_vm1, %v11914_v24 }
 0x69f   :  { %10793 = vmatprep.subr.mxu1 %v11914_v24  ;;  %v3808_v52 = vand.u32 4294901760, %v3807_v49 }
 0x6a0   :  { %10794 = vmatpush3.msra.mxu1 %v11989_v26 }
 0x6a1   :  { %10795 = vmatprep.subr.mxu1 %v11914_v24  ;;  %v3809_v50 = vsub.f32 %v3807_v49, %v3808_v52 }
 0x6a2   :  { %10796 = vmatpush3.msra.mxu1 %v11991_v27 }
 0x6a3   :  { %10797 = vmatprep.subr.mxu1 %v11914_v24  ;;  %v3810_v57 = vand.u32 4294901760, %v3809_v50 }
 0x6a4   :  { %10798 = vmatpush3.msra.mxu1 %v11999_v30 }
 0x6a5   :  { %10799 = vmatprep.subr.mxu1 %v11914_v24  ;;  %10751 = vmatmul.mubr.f32.vlgmr.msra.gmra.mxu0 %v3810_v57 }
 0x6a6   :  { %10773 = vmatpush3.msra.mxu0 %v11997_v29  ;;  %10800 = vmatpush3.msra.mxu1 %v12002_v31 }
 0x6a7   :  { %10774 = vmatprep.subr.mxu0 %v11914_v24  ;;  %10801 = vmatprep.subr.mxu1 %v11914_v24 }
 0x6a8   :  { %10775 = vmatpush3.msra.mxu0 %v12008_v34  ;;  %10802 = vmatpush3.msra.mxu1 %v12026_v40 }
 0x6a9   :  { %10776 = vmatprep.subr.mxu0 %v11914_v24  ;;  %10803 = vmatprep.subr.mxu1 %v11914_v24 }
 0x6aa   :  { %10777 = vmatpush3.msra.mxu0 %v12011_v35  ;;  %10804 = vmatpush3.msra.mxu1 %v12044_v46 }
 0x6ab   :  { %10778 = vmatprep.subr.mxu0 %v11914_v24  ;;  %10805 = vmatprep.subr.mxu1 %v11914_v24 }
 0x6ac   :  { %10779 = vmatpush3.msra.mxu0 %v12023_v39  ;;  %10806 = vmatpush3.msra.mxu1 %v12069_v56 }
 0x6ad   :  { %10780 = vmatprep.subr.mxu0 %v11914_v24  ;;  %10808 = vmatmul.mubr.f32.vlgmr.msra.gmra.mxu1 %v3808_v52 }
 0x6ae   :  { %10829 = vmatprep.subr.mxu1 %v11914_v24  ;;  %10781 = vmatpush3.msra.mxu0 %v12035_v43 }
 0x6af   :  { %10830 = vmatpush3.msra.mxu1 %v11986_v25  ;;  %10782 = vmatprep.subr.mxu0 %v11914_v24 }
 0x6b0   :  { %10831 = vmatprep.subr.mxu1 %v11914_v24  ;;  %10783 = vmatpush3.msra.mxu0 %v12060_v53 }
 0x6b1   :  { %10832 = vmatpush3.msra.mxu1 %v11989_v26  ;;  %10784 = vmatprep.subr.mxu0 %v11914_v24 }
 0x6b2   :  { %10833 = vmatprep.subr.mxu1 %v11914_v24  ;;  %10785 = vmatpush3.msra.mxu0 %v12075_v58 }
 0x6b3   :  { %10834 = vmatpush3.msra.mxu1 %v11991_v27  ;;  %10786 = vmatprep.subr.mxu0 %v11914_v24 }
 0x6b4   :  { %10835 = vmatprep.subr.mxu1 %v11914_v24  ;;  %10787 = vmatpush3.msra.mxu0 %v12097_v1 }
 0x6b5   :  { %10788 = vmatprep.mubr.msk.f32.mxu0 %vm11915_vm1, %v11914_v24  ;;  %10836 = vmatpush3.msra.mxu1 %v11999_v30 }
 0x6b6   :  { %10789 = vmatmul.mubr.f32.vlgmr.msra.gmra.mxu0 %v3807_v49  ;;  %10810 = vmatprep.subr.mxu0 %v11914_v24 }
 0x6b7   :  { %10837 = vmatprep.subr.mxu1 %v11914_v24  ;;  %10811 = vmatpush3.msra.mxu0 %v12020_v38 }
 0x6b8   :  { %10838 = vmatpush3.msra.mxu1 %v12002_v31  ;;  %10812 = vmatprep.subr.mxu0 %v11914_v24 }
 0x6b9   :  { %10839 = vmatprep.subr.mxu1 %v11914_v24  ;;  %10813 = vmatpush3.msra.mxu0 %v12029_v41 }
 0x6ba   :  { %10840 = vmatpush3.msra.mxu1 %v12026_v40  ;;  %10814 = vmatprep.subr.mxu0 %v11914_v24 }
 0x6bb   :  { %10841 = vmatprep.subr.mxu1 %v11914_v24  ;;  %10815 = vmatpush3.msra.mxu0 %v12032_v42 }
 0x6bc   :  { %10842 = vmatpush3.msra.mxu1 %v12044_v46  ;;  %10816 = vmatprep.subr.mxu0 %v11914_v24 }
 0x6bd   :  { %10843 = vmatprep.subr.mxu1 %v11914_v24  ;;  %10817 = vmatpush3.msra.mxu0 %v12041_v45 }
 0x6be   :  { %10844 = vmatpush3.msra.mxu1 %v12069_v56  ;;  %10845 = vmatprep.mubr.msk.f32.mxu1 %vm11915_vm1, %v11914_v24 }
 0x6bf   :  { %10818 = vmatprep.subr.mxu0 %v11914_v24  ;;  %10846 = vmatmul.mubr.f32.vlgmr.msra.gmra.mxu1 %v13002_v48 }
 0x6c0   :  { %10819 = vmatpush3.msra.mxu0 %v12066_v55  ;;  %10826 = vmatprep.mubr.msk.f32.mxu0 %vm11915_vm1, %v11914_v24 }
 0x6c1   :  { %10820 = vmatprep.subr.mxu0 %v11914_v24  ;;  %10867 = vmatprep.subr.mxu1 %v11914_v24 }
 0x6c2   :  { %10821 = vmatpush3.msra.mxu0 %v12090_v63  ;;  %10868 = vmatpush3.msra.mxu1 %v12055_v51 }
 0x6c3   :  { %10822 = vmatprep.subr.mxu0 %v11914_v24  ;;  %10869 = vmatprep.subr.mxu1 %v11914_v24 }
 0x6c4   :  { %10823 = vmatpush3.msra.mxu0 %v12104_v3  ;;  %10870 = vmatpush3.msra.mxu1 %v12063_v54 }
 0x6c5   :  { %10824 = vmatprep.subr.mxu0 %v11914_v24  ;;  %10871 = vmatprep.subr.mxu1 %v11914_v24 }
 0x6c6   :  { %10825 = vmatpush3.msra.mxu0 %v12120_v9  ;;  %10872 = vmatpush3.msra.mxu1 %v12087_v62 }
 0x6c7   :  { %10827 = vmatmul.mubr.f32.vlgmr.msra.gmra.mxu0 %v13002_v48  ;;  %10873 = vmatprep.subr.mxu1 %v11914_v24 }
 0x6c8   :  { %10874 = vmatpush3.msra.mxu1 %v12101_v2  ;;  %10848 = vmatprep.subr.mxu0 %v11914_v24 }
 0x6c9   :  { %10875 = vmatprep.subr.mxu1 %v11914_v24  ;;  %10849 = vmatpush3.msra.mxu0 %v11986_v25 }
 0x6ca   :  { %10876 = vmatpush3.msra.mxu1 %v12117_v8  ;;  %10850 = vmatprep.subr.mxu0 %v11914_v24 }
 0x6cb   :  { %10877 = vmatprep.subr.mxu1 %v11914_v24  ;;  %10851 = vmatpush3.msra.mxu0 %v11989_v26 }
 0x6cc   :  { %10878 = vmatpush3.msra.mxu1 %v12129_v13  ;;  %10852 = vmatprep.subr.mxu0 %v11914_v24 }
 0x6cd   :  { %10879 = vmatprep.subr.mxu1 %v11914_v24  ;;  %10853 = vmatpush3.msra.mxu0 %v11991_v27 }
 0x6ce   :  { %10880 = vmatpush3.msra.mxu1 %v12137_v15  ;;  %10854 = vmatprep.subr.mxu0 %v11914_v24 }
 0x6cf   :  { %10881 = vmatprep.subr.mxu1 %v11914_v24  ;;  %10855 = vmatpush3.msra.mxu0 %v11999_v30 }
 0x6d0   :  { %10882 = vmatpush3.msra.mxu1 %v12148_v20  ;;  %10856 = vmatprep.subr.mxu0 %v11914_v24 }
 0x6d1   :  { %10883 = vmatprep.mubr.msk.f32.mxu1 %vm11915_vm1, %v11914_v24  ;;  %10905 = vmatprep.subr.mxu1 %v11914_v24 }
 0x6d2   :  { %10857 = vmatpush3.msra.mxu0 %v12002_v31  ;;  %10864 = vmatprep.mubr.msk.f32.mxu0 %vm11915_vm1, %v11914_v24 }
 0x6d3   :  { %10858 = vmatprep.subr.mxu0 %v11914_v24 }
 0x6d4   :  { %10859 = vmatpush3.msra.mxu0 %v12026_v40 }
 0x6d5   :  { %10860 = vmatprep.subr.mxu0 %v11914_v24 }
 0x6d6   :  { %10861 = vmatpush3.msra.mxu0 %v12044_v46 }
 0x6d7   :  { %10862 = vmatprep.subr.mxu0 %v11914_v24 }
 0x6d8   :  { %10863 = vmatpush3.msra.mxu0 %v12069_v56 }
 0x6d9   :  { %10886 = vmatprep.subr.mxu0 %v11914_v24 }
 0x75d   :  { %v3923_v59 = vpop.f32.mrf.mxu1 }
 0x75f   :  { %v10771_v61 = vpop.f32.mrf.mxu1 }
 0x765   :  { %v3812_v60 = vpop.f32.mrf.mxu0 }
 0x766   :  { %v3813_v12 = vadd.f32 %v3812_v60, %v3729_v11 }
 0x767   :  { %v10752_v4 = vpop.f32.mrf.mxu0 }
 0x768   :  { %v3924_v10 = vadd.f32 %v3923_v59, %v3813_v12 }
 0x76d   :  { %v4092_v44 = vpop.f32.mrf.mxu1 }
 0x76f   :  { %v10809_v6 = vpop.f32.mrf.mxu1 }
 0x776   :  { %v4011_v5 = vpop.f32.mrf.mxu0 }
 0x777   :  { %v4012_v14 = vadd.f32 %v4011_v5, %v3924_v10 }
 0x778   :  { %v10790_v16 = vpop.f32.mrf.mxu0 }
 0x779   :  { %v4093_v17 = vadd.f32 %v4092_v44, %v4012_v14  ;;  %v4272_v44 = vld [vmem:[#allocation2 + $0x40] sm:$0xff] }
 0x77f   :  { %v4266_v0 = vpop.f32.mrf.mxu1 }
 0x781   :  { %v10847_v7 = vpop.f32.mrf.mxu1 }
 0x787   :  { %v4187_v23 = vpop.f32.mrf.mxu0 }
 0x788   :  { %v4188_v28 = vadd.f32 %v4187_v23, %v4093_v17 }
 0x789   :  { %v10828_v22 = vpop.f32.mrf.mxu0 }
 0x78a   :  { %v4267_v32 = vadd.f32 %v4266_v0, %v4188_v28 }
 0x78c   :  { %11893 = vtanh.f32 %v4267_v32 }
 0x799   :  { %v11894_v33 = vpop.eup %11893 }
 0x79a   :  { %v13117_v36 = vadd.f32 %v11894_v33, %v12999_v47  ;;  %v4274_v37 = vsel %vm444_vm0, %v11894_v33, 0 }
 0x79b   :  { %v13120_v19 = vand.u32 4294901760, %v4274_v37 }
 0x79d   :  { %v4350_v21 = vsub.f32 %v4274_v37, %v13120_v19  ;;  %10884 = vmatmul.mubr.f32.vlgmr.msra.gmra.mxu1 %v13120_v19 }
 0x79e   :  { %10906 = vmatpush3.msra.mxu1 %v11986_v25  ;;  %10921 = vmatprep.mubr.msk.f32.mxu1 %vm11915_vm1, %v11914_v24 }
 0x79f   :  { %10907 = vmatprep.subr.mxu1 %v11914_v24  ;;  %v4351_v18 = vand.u32 4294901760, %v4350_v21 }
 0x7a0   :  { %10908 = vmatpush3.msra.mxu1 %v11989_v26 }
 0x7a1   :  { %10909 = vmatprep.subr.mxu1 %v11914_v24  ;;  %v4352_v47 = vsub.f32 %v4350_v21, %v4351_v18 }
 0x7a2   :  { %10910 = vmatpush3.msra.mxu1 %v11991_v27 }
 0x7a3   :  { %10911 = vmatprep.subr.mxu1 %v11914_v24  ;;  %v4353_v48 = vand.u32 4294901760, %v4352_v47 }
 0x7a4   :  { %10912 = vmatpush3.msra.mxu1 %v11999_v30 }
 0x7a5   :  { %10913 = vmatprep.subr.mxu1 %v11914_v24  ;;  %10865 = vmatmul.mubr.f32.vlgmr.msra.gmra.mxu0 %v4353_v48 }
 0x7a6   :  { %10887 = vmatpush3.msra.mxu0 %v11997_v29  ;;  %10914 = vmatpush3.msra.mxu1 %v12002_v31 }
 0x7a7   :  { %10888 = vmatprep.subr.mxu0 %v11914_v24  ;;  %10915 = vmatprep.subr.mxu1 %v11914_v24 }
 0x7a8   :  { %10889 = vmatpush3.msra.mxu0 %v12008_v34  ;;  %10916 = vmatpush3.msra.mxu1 %v12026_v40 }
 0x7a9   :  { %10890 = vmatprep.subr.mxu0 %v11914_v24  ;;  %10917 = vmatprep.subr.mxu1 %v11914_v24 }
 0x7aa   :  { %10891 = vmatpush3.msra.mxu0 %v12011_v35  ;;  %10918 = vmatpush3.msra.mxu1 %v12044_v46 }
 0x7ab   :  { %10892 = vmatprep.subr.mxu0 %v11914_v24  ;;  %10919 = vmatprep.subr.mxu1 %v11914_v24 }
 0x7ac   :  { %10893 = vmatpush3.msra.mxu0 %v12023_v39  ;;  %10920 = vmatpush3.msra.mxu1 %v12069_v56 }
 0x7ad   :  { %10894 = vmatprep.subr.mxu0 %v11914_v24  ;;  %10922 = vmatmul.mubr.f32.vlgmr.msra.gmra.mxu1 %v4351_v18 }
 0x7ae   :  { %10943 = vmatprep.subr.mxu1 %v11914_v24  ;;  %10895 = vmatpush3.msra.mxu0 %v12035_v43 }
 0x7af   :  { %10944 = vmatpush3.msra.mxu1 %v11986_v25  ;;  %10896 = vmatprep.subr.mxu0 %v11914_v24 }
 0x7b0   :  { %10945 = vmatprep.subr.mxu1 %v11914_v24  ;;  %10897 = vmatpush3.msra.mxu0 %v12060_v53 }
 0x7b1   :  { %10946 = vmatpush3.msra.mxu1 %v11989_v26  ;;  %10898 = vmatprep.subr.mxu0 %v11914_v24 }
 0x7b2   :  { %10947 = vmatprep.subr.mxu1 %v11914_v24  ;;  %10899 = vmatpush3.msra.mxu0 %v12075_v58 }
 0x7b3   :  { %10948 = vmatpush3.msra.mxu1 %v11991_v27  ;;  %10900 = vmatprep.subr.mxu0 %v11914_v24 }
 0x7b4   :  { %10949 = vmatprep.subr.mxu1 %v11914_v24  ;;  %10901 = vmatpush3.msra.mxu0 %v12097_v1 }
 0x7b5   :  { %10902 = vmatprep.mubr.msk.f32.mxu0 %vm11915_vm1, %v11914_v24  ;;  %10950 = vmatpush3.msra.mxu1 %v11999_v30 }
 0x7b6   :  { %10903 = vmatmul.mubr.f32.vlgmr.msra.gmra.mxu0 %v4350_v21  ;;  %10924 = vmatprep.subr.mxu0 %v11914_v24 }
 0x7b7   :  { %10951 = vmatprep.subr.mxu1 %v11914_v24  ;;  %10925 = vmatpush3.msra.mxu0 %v12020_v38 }
 0x7b8   :  { %10952 = vmatpush3.msra.mxu1 %v12002_v31  ;;  %10926 = vmatprep.subr.mxu0 %v11914_v24 }
 0x7b9   :  { %10953 = vmatprep.subr.mxu1 %v11914_v24  ;;  %10927 = vmatpush3.msra.mxu0 %v12029_v41 }
 0x7ba   :  { %10954 = vmatpush3.msra.mxu1 %v12026_v40  ;;  %10928 = vmatprep.subr.mxu0 %v11914_v24 }
 0x7bb   :  { %10955 = vmatprep.subr.mxu1 %v11914_v24  ;;  %10929 = vmatpush3.msra.mxu0 %v12032_v42 }
 0x7bc   :  { %10956 = vmatpush3.msra.mxu1 %v12044_v46  ;;  %10930 = vmatprep.subr.mxu0 %v11914_v24 }
 0x7bd   :  { %10957 = vmatprep.subr.mxu1 %v11914_v24  ;;  %10931 = vmatpush3.msra.mxu0 %v12041_v45 }
 0x7be   :  { %10958 = vmatpush3.msra.mxu1 %v12069_v56  ;;  %10959 = vmatprep.mubr.msk.f32.mxu1 %vm11915_vm1, %v11914_v24 }
 0x7bf   :  { %10932 = vmatprep.subr.mxu0 %v11914_v24  ;;  %10960 = vmatmul.mubr.f32.vlgmr.msra.gmra.mxu1 %v13120_v19 }
 0x7c0   :  { %10933 = vmatpush3.msra.mxu0 %v12066_v55  ;;  %10940 = vmatprep.mubr.msk.f32.mxu0 %vm11915_vm1, %v11914_v24 }
 0x7c1   :  { %10934 = vmatprep.subr.mxu0 %v11914_v24  ;;  %10981 = vmatprep.subr.mxu1 %v11914_v24 }
 0x7c2   :  { %10935 = vmatpush3.msra.mxu0 %v12090_v63  ;;  %10982 = vmatpush3.msra.mxu1 %v12055_v51 }
 0x7c3   :  { %10936 = vmatprep.subr.mxu0 %v11914_v24  ;;  %10983 = vmatprep.subr.mxu1 %v11914_v24 }
 0x7c4   :  { %10937 = vmatpush3.msra.mxu0 %v12104_v3  ;;  %10984 = vmatpush3.msra.mxu1 %v12063_v54 }
 0x7c5   :  { %10938 = vmatprep.subr.mxu0 %v11914_v24  ;;  %10985 = vmatprep.subr.mxu1 %v11914_v24 }
 0x7c6   :  { %10939 = vmatpush3.msra.mxu0 %v12120_v9  ;;  %10986 = vmatpush3.msra.mxu1 %v12087_v62 }
 0x7c7   :  { %10941 = vmatmul.mubr.f32.vlgmr.msra.gmra.mxu0 %v13120_v19  ;;  %10987 = vmatprep.subr.mxu1 %v11914_v24 }
 0x7c8   :  { %10988 = vmatpush3.msra.mxu1 %v12101_v2  ;;  %10962 = vmatprep.subr.mxu0 %v11914_v24 }
 0x7c9   :  { %10989 = vmatprep.subr.mxu1 %v11914_v24  ;;  %10963 = vmatpush3.msra.mxu0 %v11986_v25 }
 0x7ca   :  { %10990 = vmatpush3.msra.mxu1 %v12117_v8  ;;  %10964 = vmatprep.subr.mxu0 %v11914_v24 }
 0x7cb   :  { %10991 = vmatprep.subr.mxu1 %v11914_v24  ;;  %10965 = vmatpush3.msra.mxu0 %v11989_v26 }
 0x7cc   :  { %10992 = vmatpush3.msra.mxu1 %v12129_v13  ;;  %10966 = vmatprep.subr.mxu0 %v11914_v24 }
 0x7cd   :  { %10993 = vmatprep.subr.mxu1 %v11914_v24  ;;  %10967 = vmatpush3.msra.mxu0 %v11991_v27 }
 0x7ce   :  { %10994 = vmatpush3.msra.mxu1 %v12137_v15  ;;  %10968 = vmatprep.subr.mxu0 %v11914_v24 }
 0x7cf   :  { %10995 = vmatprep.subr.mxu1 %v11914_v24  ;;  %10969 = vmatpush3.msra.mxu0 %v11999_v30 }
 0x7d0   :  { %10996 = vmatpush3.msra.mxu1 %v12148_v20  ;;  %10970 = vmatprep.subr.mxu0 %v11914_v24 }
 0x7d1   :  { %10997 = vmatprep.mubr.msk.f32.mxu1 %vm11915_vm1, %v11914_v24  ;;  %11019 = vmatprep.subr.mxu1 %v11914_v24 }
 0x7d2   :  { %10971 = vmatpush3.msra.mxu0 %v12002_v31  ;;  %10978 = vmatprep.mubr.msk.f32.mxu0 %vm11915_vm1, %v11914_v24 }
 0x7d3   :  { %10972 = vmatprep.subr.mxu0 %v11914_v24 }
 0x7d4   :  { %10973 = vmatpush3.msra.mxu0 %v12026_v40 }
 0x7d5   :  { %10974 = vmatprep.subr.mxu0 %v11914_v24 }
 0x7d6   :  { %10975 = vmatpush3.msra.mxu0 %v12044_v46 }
 0x7d7   :  { %10976 = vmatprep.subr.mxu0 %v11914_v24 }
 0x7d8   :  { %10977 = vmatpush3.msra.mxu0 %v12069_v56 }
 0x7d9   :  { %11000 = vmatprep.subr.mxu0 %v11914_v24 }
 0x85d   :  { %v4466_v49 = vpop.f32.mrf.mxu1 }
 0x85f   :  { %v10885_v52 = vpop.f32.mrf.mxu1 }
 0x865   :  { %v4355_v50 = vpop.f32.mrf.mxu0 }
 0x866   :  { %v4356_v6 = vadd.f32 %v4355_v50, %v4272_v44 }
 0x867   :  { %v10866_v57 = vpop.f32.mrf.mxu0 }
 0x868   :  { %v4467_v16 = vadd.f32 %v4466_v49, %v4356_v6 }
 0x86d   :  { %v4635_v59 = vpop.f32.mrf.mxu1 }
 0x86f   :  { %v10923_v61 = vpop.f32.mrf.mxu1 }
 0x876   :  { %v4554_v60 = vpop.f32.mrf.mxu0 }
 0x877   :  { %v4555_v12 = vadd.f32 %v4554_v60, %v4467_v16 }
 0x878   :  { %v10904_v4 = vpop.f32.mrf.mxu0 }
 0x879   :  { %v4636_v0 = vadd.f32 %v4635_v59, %v4555_v12  ;;  %v4815_v59 = vld [vmem:[#allocation2 + $0x48] sm:$0xff] }
 0x87f   :  { %v4809_v5 = vpop.f32.mrf.mxu1 }
 0x881   :  { %v10961_v11 = vpop.f32.mrf.mxu1 }
 0x887   :  { %v4730_v10 = vpop.f32.mrf.mxu0 }
 0x888   :  { %v4731_v7 = vadd.f32 %v4730_v10, %v4636_v0 }
 0x889   :  { %v10942_v14 = vpop.f32.mrf.mxu0 }
 0x88a   :  { %v4810_v17 = vadd.f32 %v4809_v5, %v4731_v7 }
 0x88c   :  { %11895 = vtanh.f32 %v4810_v17 }
 0x899   :  { %v11896_v23 = vpop.eup %11895 }
 0x89a   :  { %v13235_v28 = vadd.f32 %v11896_v23, %v13117_v36  ;;  %v4817_v22 = vsel %vm444_vm0, %v11896_v23, 0 }
 0x89b   :  { %v13238_v32 = vand.u32 4294901760, %v4817_v22 }
 0x89d   :  { %v4893_v33 = vsub.f32 %v4817_v22, %v13238_v32  ;;  %10998 = vmatmul.mubr.f32.vlgmr.msra.gmra.mxu1 %v13238_v32 }
 0x89e   :  { %11020 = vmatpush3.msra.mxu1 %v11986_v25  ;;  %11035 = vmatprep.mubr.msk.f32.mxu1 %vm11915_vm1, %v11914_v24 }
 0x89f   :  { %11021 = vmatprep.subr.mxu1 %v11914_v24  ;;  %v4894_v37 = vand.u32 4294901760, %v4893_v33 }
 0x8a0   :  { %11022 = vmatpush3.msra.mxu1 %v11989_v26 }
 0x8a1   :  { %11023 = vmatprep.subr.mxu1 %v11914_v24  ;;  %v4895_v36 = vsub.f32 %v4893_v33, %v4894_v37 }
 0x8a2   :  { %11024 = vmatpush3.msra.mxu1 %v11991_v27 }
 0x8a3   :  { %11025 = vmatprep.subr.mxu1 %v11914_v24  ;;  %v4896_v19 = vand.u32 4294901760, %v4895_v36 }
 0x8a4   :  { %11026 = vmatpush3.msra.mxu1 %v11999_v30 }
 0x8a5   :  { %11027 = vmatprep.subr.mxu1 %v11914_v24  ;;  %10979 = vmatmul.mubr.f32.vlgmr.msra.gmra.mxu0 %v4896_v19 }
 0x8a6   :  { %11001 = vmatpush3.msra.mxu0 %v11997_v29  ;;  %11028 = vmatpush3.msra.mxu1 %v12002_v31 }
 0x8a7   :  { %11002 = vmatprep.subr.mxu0 %v11914_v24  ;;  %11029 = vmatprep.subr.mxu1 %v11914_v24 }
 0x8a8   :  { %11003 = vmatpush3.msra.mxu0 %v12008_v34  ;;  %11030 = vmatpush3.msra.mxu1 %v12026_v40 }
 0x8a9   :  { %11004 = vmatprep.subr.mxu0 %v11914_v24  ;;  %11031 = vmatprep.subr.mxu1 %v11914_v24 }
 0x8aa   :  { %11005 = vmatpush3.msra.mxu0 %v12011_v35  ;;  %11032 = vmatpush3.msra.mxu1 %v12044_v46 }
 0x8ab   :  { %11006 = vmatprep.subr.mxu0 %v11914_v24  ;;  %11033 = vmatprep.subr.mxu1 %v11914_v24 }
 0x8ac   :  { %11007 = vmatpush3.msra.mxu0 %v12023_v39  ;;  %11034 = vmatpush3.msra.mxu1 %v12069_v56 }
 0x8ad   :  { %11008 = vmatprep.subr.mxu0 %v11914_v24  ;;  %11036 = vmatmul.mubr.f32.vlgmr.msra.gmra.mxu1 %v4894_v37 }
 0x8ae   :  { %11057 = vmatprep.subr.mxu1 %v11914_v24  ;;  %11009 = vmatpush3.msra.mxu0 %v12035_v43 }
 0x8af   :  { %11058 = vmatpush3.msra.mxu1 %v11986_v25  ;;  %11010 = vmatprep.subr.mxu0 %v11914_v24 }
 0x8b0   :  { %11059 = vmatprep.subr.mxu1 %v11914_v24  ;;  %11011 = vmatpush3.msra.mxu0 %v12060_v53 }
 0x8b1   :  { %11060 = vmatpush3.msra.mxu1 %v11989_v26  ;;  %11012 = vmatprep.subr.mxu0 %v11914_v24 }
 0x8b2   :  { %11061 = vmatprep.subr.mxu1 %v11914_v24  ;;  %11013 = vmatpush3.msra.mxu0 %v12075_v58 }
 0x8b3   :  { %11062 = vmatpush3.msra.mxu1 %v11991_v27  ;;  %11014 = vmatprep.subr.mxu0 %v11914_v24 }
 0x8b4   :  { %11063 = vmatprep.subr.mxu1 %v11914_v24  ;;  %11015 = vmatpush3.msra.mxu0 %v12097_v1 }
 0x8b5   :  { %11016 = vmatprep.mubr.msk.f32.mxu0 %vm11915_vm1, %v11914_v24  ;;  %11064 = vmatpush3.msra.mxu1 %v11999_v30 }
 0x8b6   :  { %11017 = vmatmul.mubr.f32.vlgmr.msra.gmra.mxu0 %v4893_v33  ;;  %11038 = vmatprep.subr.mxu0 %v11914_v24 }
 0x8b7   :  { %11065 = vmatprep.subr.mxu1 %v11914_v24  ;;  %11039 = vmatpush3.msra.mxu0 %v12020_v38 }
 0x8b8   :  { %11066 = vmatpush3.msra.mxu1 %v12002_v31  ;;  %11040 = vmatprep.subr.mxu0 %v11914_v24 }
 0x8b9   :  { %11067 = vmatprep.subr.mxu1 %v11914_v24  ;;  %11041 = vmatpush3.msra.mxu0 %v12029_v41 }
 0x8ba   :  { %11068 = vmatpush3.msra.mxu1 %v12026_v40  ;;  %11042 = vmatprep.subr.mxu0 %v11914_v24 }
 0x8bb   :  { %11069 = vmatprep.subr.mxu1 %v11914_v24  ;;  %11043 = vmatpush3.msra.mxu0 %v12032_v42 }
 0x8bc   :  { %11070 = vmatpush3.msra.mxu1 %v12044_v46  ;;  %11044 = vmatprep.subr.mxu0 %v11914_v24 }
 0x8bd   :  { %11071 = vmatprep.subr.mxu1 %v11914_v24  ;;  %11045 = vmatpush3.msra.mxu0 %v12041_v45 }
 0x8be   :  { %11072 = vmatpush3.msra.mxu1 %v12069_v56  ;;  %11073 = vmatprep.mubr.msk.f32.mxu1 %vm11915_vm1, %v11914_v24 }
 0x8bf   :  { %11046 = vmatprep.subr.mxu0 %v11914_v24  ;;  %11074 = vmatmul.mubr.f32.vlgmr.msra.gmra.mxu1 %v13238_v32 }
 0x8c0   :  { %11047 = vmatpush3.msra.mxu0 %v12066_v55  ;;  %11054 = vmatprep.mubr.msk.f32.mxu0 %vm11915_vm1, %v11914_v24 }
 0x8c1   :  { %11048 = vmatprep.subr.mxu0 %v11914_v24  ;;  %11095 = vmatprep.subr.mxu1 %v11914_v24 }
 0x8c2   :  { %11049 = vmatpush3.msra.mxu0 %v12090_v63  ;;  %11096 = vmatpush3.msra.mxu1 %v12055_v51 }
 0x8c3   :  { %11050 = vmatprep.subr.mxu0 %v11914_v24  ;;  %11097 = vmatprep.subr.mxu1 %v11914_v24 }
 0x8c4   :  { %11051 = vmatpush3.msra.mxu0 %v12104_v3  ;;  %11098 = vmatpush3.msra.mxu1 %v12063_v54 }
 0x8c5   :  { %11052 = vmatprep.subr.mxu0 %v11914_v24  ;;  %11099 = vmatprep.subr.mxu1 %v11914_v24 }
 0x8c6   :  { %11053 = vmatpush3.msra.mxu0 %v12120_v9  ;;  %11100 = vmatpush3.msra.mxu1 %v12087_v62 }
 0x8c7   :  { %11055 = vmatmul.mubr.f32.vlgmr.msra.gmra.mxu0 %v13238_v32  ;;  %11101 = vmatprep.subr.mxu1 %v11914_v24 }
 0x8c8   :  { %11102 = vmatpush3.msra.mxu1 %v12101_v2  ;;  %11076 = vmatprep.subr.mxu0 %v11914_v24 }
 0x8c9   :  { %11103 = vmatprep.subr.mxu1 %v11914_v24  ;;  %11077 = vmatpush3.msra.mxu0 %v11986_v25 }
 0x8ca   :  { %11104 = vmatpush3.msra.mxu1 %v12117_v8  ;;  %11078 = vmatprep.subr.mxu0 %v11914_v24 }
 0x8cb   :  { %11105 = vmatprep.subr.mxu1 %v11914_v24  ;;  %11079 = vmatpush3.msra.mxu0 %v11989_v26 }
 0x8cc   :  { %11106 = vmatpush3.msra.mxu1 %v12129_v13  ;;  %11080 = vmatprep.subr.mxu0 %v11914_v24 }
 0x8cd   :  { %11107 = vmatprep.subr.mxu1 %v11914_v24  ;;  %11081 = vmatpush3.msra.mxu0 %v11991_v27 }
 0x8ce   :  { %11108 = vmatpush3.msra.mxu1 %v12137_v15  ;;  %11082 = vmatprep.subr.mxu0 %v11914_v24 }
 0x8cf   :  { %11109 = vmatprep.subr.mxu1 %v11914_v24  ;;  %11083 = vmatpush3.msra.mxu0 %v11999_v30 }
 0x8d0   :  { %11110 = vmatpush3.msra.mxu1 %v12148_v20  ;;  %11084 = vmatprep.subr.mxu0 %v11914_v24 }
 0x8d1   :  { %11111 = vmatprep.mubr.msk.f32.mxu1 %vm11915_vm1, %v11914_v24  ;;  %11133 = vmatprep.subr.mxu1 %v11914_v24 }
 0x8d2   :  { %11085 = vmatpush3.msra.mxu0 %v12002_v31  ;;  %11092 = vmatprep.mubr.msk.f32.mxu0 %vm11915_vm1, %v11914_v24 }
 0x8d3   :  { %11086 = vmatprep.subr.mxu0 %v11914_v24 }
 0x8d4   :  { %11087 = vmatpush3.msra.mxu0 %v12026_v40 }
 0x8d5   :  { %11088 = vmatprep.subr.mxu0 %v11914_v24 }
 0x8d6   :  { %11089 = vmatpush3.msra.mxu0 %v12044_v46 }
 0x8d7   :  { %11090 = vmatprep.subr.mxu0 %v11914_v24 }
 0x8d8   :  { %11091 = vmatpush3.msra.mxu0 %v12069_v56 }
 0x8d9   :  { %11114 = vmatprep.subr.mxu0 %v11914_v24 }
 0x95d   :  { %v5009_v21 = vpop.f32.mrf.mxu1 }
 0x95f   :  { %v10999_v18 = vpop.f32.mrf.mxu1 }
 0x965   :  { %v4898_v47 = vpop.f32.mrf.mxu0 }
 0x966   :  { %v4899_v61 = vadd.f32 %v4898_v47, %v4815_v59 }
 0x967   :  { %v10980_v48 = vpop.f32.mrf.mxu0 }
 0x968   :  { %v5010_v4 = vadd.f32 %v5009_v21, %v4899_v61 }
 0x96d   :  { %v5178_v49 = vpop.f32.mrf.mxu1 }
 0x96f   :  { %v11037_v52 = vpop.f32.mrf.mxu1 }
 0x976   :  { %v5097_v50 = vpop.f32.mrf.mxu0 }
 0x977   :  { %v5098_v6 = vadd.f32 %v5097_v50, %v5010_v4 }
 0x978   :  { %v11018_v57 = vpop.f32.mrf.mxu0 }
 0x979   :  { %v5179_v5 = vadd.f32 %v5178_v49, %v5098_v6  ;;  %v5358_v49 = vld [vmem:[#allocation2 + $0x50] sm:$0xff] }
 0x97f   :  { %v5352_v60 = vpop.f32.mrf.mxu1 }
 0x981   :  { %v11075_v44 = vpop.f32.mrf.mxu1 }
 0x987   :  { %v5273_v16 = vpop.f32.mrf.mxu0 }
 0x988   :  { %v5274_v11 = vadd.f32 %v5273_v16, %v5179_v5 }
 0x989   :  { %v11056_v12 = vpop.f32.mrf.mxu0 }
 0x98a   :  { %v5353_v0 = vadd.f32 %v5352_v60, %v5274_v11 }
 0x98c   :  { %11897 = vtanh.f32 %v5353_v0 }
 0x999   :  { %v11898_v10 = vpop.eup %11897 }
 0x99a   :  { %v13353_v7 = vadd.f32 %v11898_v10, %v13235_v28  ;;  %v5360_v14 = vsel %vm444_vm0, %v11898_v10, 0 }
 0x99b   :  { %v13356_v17 = vand.u32 4294901760, %v5360_v14 }
 0x99d   :  { %v5436_v23 = vsub.f32 %v5360_v14, %v13356_v17  ;;  %11112 = vmatmul.mubr.f32.vlgmr.msra.gmra.mxu1 %v13356_v17 }
 0x99e   :  { %11134 = vmatpush3.msra.mxu1 %v11986_v25  ;;  %11149 = vmatprep.mubr.msk.f32.mxu1 %vm11915_vm1, %v11914_v24 }
 0x99f   :  { %11135 = vmatprep.subr.mxu1 %v11914_v24  ;;  %v5437_v22 = vand.u32 4294901760, %v5436_v23 }
 0x9a0   :  { %11136 = vmatpush3.msra.mxu1 %v11989_v26 }
 0x9a1   :  { %11137 = vmatprep.subr.mxu1 %v11914_v24  ;;  %v5438_v28 = vsub.f32 %v5436_v23, %v5437_v22 }
 0x9a2   :  { %11138 = vmatpush3.msra.mxu1 %v11991_v27 }
 0x9a3   :  { %11139 = vmatprep.subr.mxu1 %v11914_v24  ;;  %v5439_v32 = vand.u32 4294901760, %v5438_v28 }
 0x9a4   :  { %11140 = vmatpush3.msra.mxu1 %v11999_v30 }
 0x9a5   :  { %11141 = vmatprep.subr.mxu1 %v11914_v24  ;;  %11093 = vmatmul.mubr.f32.vlgmr.msra.gmra.mxu0 %v5439_v32 }
 0x9a6   :  { %11115 = vmatpush3.msra.mxu0 %v11997_v29  ;;  %11142 = vmatpush3.msra.mxu1 %v12002_v31 }
 0x9a7   :  { %11116 = vmatprep.subr.mxu0 %v11914_v24  ;;  %11143 = vmatprep.subr.mxu1 %v11914_v24 }
 0x9a8   :  { %11117 = vmatpush3.msra.mxu0 %v12008_v34  ;;  %11144 = vmatpush3.msra.mxu1 %v12026_v40 }
 0x9a9   :  { %11118 = vmatprep.subr.mxu0 %v11914_v24  ;;  %11145 = vmatprep.subr.mxu1 %v11914_v24 }
 0x9aa   :  { %11119 = vmatpush3.msra.mxu0 %v12011_v35  ;;  %11146 = vmatpush3.msra.mxu1 %v12044_v46 }
 0x9ab   :  { %11120 = vmatprep.subr.mxu0 %v11914_v24  ;;  %11147 = vmatprep.subr.mxu1 %v11914_v24 }
 0x9ac   :  { %11121 = vmatpush3.msra.mxu0 %v12023_v39  ;;  %11148 = vmatpush3.msra.mxu1 %v12069_v56 }
 0x9ad   :  { %11122 = vmatprep.subr.mxu0 %v11914_v24  ;;  %11150 = vmatmul.mubr.f32.vlgmr.msra.gmra.mxu1 %v5437_v22 }
 0x9ae   :  { %11171 = vmatprep.subr.mxu1 %v11914_v24  ;;  %11123 = vmatpush3.msra.mxu0 %v12035_v43 }
 0x9af   :  { %11172 = vmatpush3.msra.mxu1 %v11986_v25  ;;  %11124 = vmatprep.subr.mxu0 %v11914_v24 }
 0x9b0   :  { %11173 = vmatprep.subr.mxu1 %v11914_v24  ;;  %11125 = vmatpush3.msra.mxu0 %v12060_v53 }
 0x9b1   :  { %11174 = vmatpush3.msra.mxu1 %v11989_v26  ;;  %11126 = vmatprep.subr.mxu0 %v11914_v24 }
 0x9b2   :  { %11175 = vmatprep.subr.mxu1 %v11914_v24  ;;  %11127 = vmatpush3.msra.mxu0 %v12075_v58 }
 0x9b3   :  { %11176 = vmatpush3.msra.mxu1 %v11991_v27  ;;  %11128 = vmatprep.subr.mxu0 %v11914_v24 }
 0x9b4   :  { %11177 = vmatprep.subr.mxu1 %v11914_v24  ;;  %11129 = vmatpush3.msra.mxu0 %v12097_v1 }
 0x9b5   :  { %11130 = vmatprep.mubr.msk.f32.mxu0 %vm11915_vm1, %v11914_v24  ;;  %11178 = vmatpush3.msra.mxu1 %v11999_v30 }
 0x9b6   :  { %11131 = vmatmul.mubr.f32.vlgmr.msra.gmra.mxu0 %v5436_v23  ;;  %11152 = vmatprep.subr.mxu0 %v11914_v24 }
 0x9b7   :  { %11179 = vmatprep.subr.mxu1 %v11914_v24  ;;  %11153 = vmatpush3.msra.mxu0 %v12020_v38 }
 0x9b8   :  { %11180 = vmatpush3.msra.mxu1 %v12002_v31  ;;  %11154 = vmatprep.subr.mxu0 %v11914_v24 }
 0x9b9   :  { %11181 = vmatprep.subr.mxu1 %v11914_v24  ;;  %11155 = vmatpush3.msra.mxu0 %v12029_v41 }
 0x9ba   :  { %11182 = vmatpush3.msra.mxu1 %v12026_v40  ;;  %11156 = vmatprep.subr.mxu0 %v11914_v24 }
 0x9bb   :  { %11183 = vmatprep.subr.mxu1 %v11914_v24  ;;  %11157 = vmatpush3.msra.mxu0 %v12032_v42 }
 0x9bc   :  { %11184 = vmatpush3.msra.mxu1 %v12044_v46  ;;  %11158 = vmatprep.subr.mxu0 %v11914_v24 }
 0x9bd   :  { %11185 = vmatprep.subr.mxu1 %v11914_v24  ;;  %11159 = vmatpush3.msra.mxu0 %v12041_v45 }
 0x9be   :  { %11186 = vmatpush3.msra.mxu1 %v12069_v56  ;;  %11187 = vmatprep.mubr.msk.f32.mxu1 %vm11915_vm1, %v11914_v24 }
 0x9bf   :  { %11160 = vmatprep.subr.mxu0 %v11914_v24  ;;  %11188 = vmatmul.mubr.f32.vlgmr.msra.gmra.mxu1 %v13356_v17 }
 0x9c0   :  { %11161 = vmatpush3.msra.mxu0 %v12066_v55  ;;  %11168 = vmatprep.mubr.msk.f32.mxu0 %vm11915_vm1, %v11914_v24 }
 0x9c1   :  { %11162 = vmatprep.subr.mxu0 %v11914_v24  ;;  %11209 = vmatprep.subr.mxu1 %v11914_v24 }
 0x9c2   :  { %11163 = vmatpush3.msra.mxu0 %v12090_v63  ;;  %11210 = vmatpush3.msra.mxu1 %v12055_v51 }
 0x9c3   :  { %11164 = vmatprep.subr.mxu0 %v11914_v24  ;;  %11211 = vmatprep.subr.mxu1 %v11914_v24 }
 0x9c4   :  { %11165 = vmatpush3.msra.mxu0 %v12104_v3  ;;  %11212 = vmatpush3.msra.mxu1 %v12063_v54 }
 0x9c5   :  { %11166 = vmatprep.subr.mxu0 %v11914_v24  ;;  %11213 = vmatprep.subr.mxu1 %v11914_v24 }
 0x9c6   :  { %11167 = vmatpush3.msra.mxu0 %v12120_v9  ;;  %11214 = vmatpush3.msra.mxu1 %v12087_v62 }
 0x9c7   :  { %11169 = vmatmul.mubr.f32.vlgmr.msra.gmra.mxu0 %v13356_v17  ;;  %11215 = vmatprep.subr.mxu1 %v11914_v24 }
 0x9c8   :  { %11216 = vmatpush3.msra.mxu1 %v12101_v2  ;;  %11190 = vmatprep.subr.mxu0 %v11914_v24 }
 0x9c9   :  { %11217 = vmatprep.subr.mxu1 %v11914_v24  ;;  %11191 = vmatpush3.msra.mxu0 %v11986_v25 }
 0x9ca   :  { %11218 = vmatpush3.msra.mxu1 %v12117_v8  ;;  %11192 = vmatprep.subr.mxu0 %v11914_v24 }
 0x9cb   :  { %11219 = vmatprep.subr.mxu1 %v11914_v24  ;;  %11193 = vmatpush3.msra.mxu0 %v11989_v26 }
 0x9cc   :  { %11220 = vmatpush3.msra.mxu1 %v12129_v13  ;;  %11194 = vmatprep.subr.mxu0 %v11914_v24 }
 0x9cd   :  { %11221 = vmatprep.subr.mxu1 %v11914_v24  ;;  %11195 = vmatpush3.msra.mxu0 %v11991_v27 }
 0x9ce   :  { %11222 = vmatpush3.msra.mxu1 %v12137_v15  ;;  %11196 = vmatprep.subr.mxu0 %v11914_v24 }
 0x9cf   :  { %11223 = vmatprep.subr.mxu1 %v11914_v24  ;;  %11197 = vmatpush3.msra.mxu0 %v11999_v30 }
 0x9d0   :  { %11224 = vmatpush3.msra.mxu1 %v12148_v20  ;;  %11198 = vmatprep.subr.mxu0 %v11914_v24 }
 0x9d1   :  { %11225 = vmatprep.mubr.msk.f32.mxu1 %vm11915_vm1, %v11914_v24  ;;  %11247 = vmatprep.subr.mxu1 %v11914_v24 }
 0x9d2   :  { %11199 = vmatpush3.msra.mxu0 %v12002_v31  ;;  %11206 = vmatprep.mubr.msk.f32.mxu0 %vm11915_vm1, %v11914_v24 }
 0x9d3   :  { %11200 = vmatprep.subr.mxu0 %v11914_v24 }
 0x9d4   :  { %11201 = vmatpush3.msra.mxu0 %v12026_v40 }
 0x9d5   :  { %11202 = vmatprep.subr.mxu0 %v11914_v24 }
 0x9d6   :  { %11203 = vmatpush3.msra.mxu0 %v12044_v46 }
 0x9d7   :  { %11204 = vmatprep.subr.mxu0 %v11914_v24 }
 0x9d8   :  { %11205 = vmatpush3.msra.mxu0 %v12069_v56 }
 0x9d9   :  { %11228 = vmatprep.subr.mxu0 %v11914_v24 }
 0xa5d   :  { %v5552_v33 = vpop.f32.mrf.mxu1 }
 0xa5f   :  { %v11113_v37 = vpop.f32.mrf.mxu1 }
 0xa65   :  { %v5441_v36 = vpop.f32.mrf.mxu0 }
 0xa66   :  { %v5442_v52 = vadd.f32 %v5441_v36, %v5358_v49 }
 0xa67   :  { %v11094_v19 = vpop.f32.mrf.mxu0 }
 0xa68   :  { %v5553_v57 = vadd.f32 %v5552_v33, %v5442_v52 }
 0xa6d   :  { %v5721_v21 = vpop.f32.mrf.mxu1 }
 0xa6f   :  { %v11151_v18 = vpop.f32.mrf.mxu1 }
 0xa76   :  { %v5640_v47 = vpop.f32.mrf.mxu0 }
 0xa77   :  { %v5641_v61 = vadd.f32 %v5640_v47, %v5553_v57 }
 0xa78   :  { %v11132_v48 = vpop.f32.mrf.mxu0 }
 0xa79   :  { %v5722_v60 = vadd.f32 %v5721_v21, %v5641_v61  ;;  %v5901_v21 = vld [vmem:[#allocation2 + $0x58] sm:$0xff] }
 0xa7f   :  { %v5895_v50 = vpop.f32.mrf.mxu1 }
 0xa81   :  { %v11189_v59 = vpop.f32.mrf.mxu1 }
 0xa87   :  { %v5816_v4 = vpop.f32.mrf.mxu0 }
 0xa88   :  { %v5817_v44 = vadd.f32 %v5816_v4, %v5722_v60 }
 0xa89   :  { %v11170_v6 = vpop.f32.mrf.mxu0 }
 0xa8a   :  { %v5896_v5 = vadd.f32 %v5895_v50, %v5817_v44 }
 0xa8c   :  { %11899 = vtanh.f32 %v5896_v5 }
 0xa99   :  { %v11900_v16 = vpop.eup %11899 }
 0xa9a   :  { %v5903_v11 = vsel %vm444_vm0, %v11900_v16, 0  ;;  %v13472_v12 = vadd.f32 %v11900_v16, %v13353_v7 }
 0xa9b   :  { %v13474_v0 = vand.u32 4294901760, %v5903_v11 }
 0xa9d   :  { %v5979_v10 = vsub.f32 %v5903_v11, %v13474_v0  ;;  %11226 = vmatmul.mubr.f32.vlgmr.msra.gmra.mxu1 %v13474_v0 }
 0xa9e   :  { %11248 = vmatpush3.msra.mxu1 %v11986_v25  ;;  %11263 = vmatprep.mubr.msk.f32.mxu1 %vm11915_vm1, %v11914_v24 }
 0xa9f   :  { %11249 = vmatprep.subr.mxu1 %v11914_v24  ;;  %v5980_v14 = vand.u32 4294901760, %v5979_v10 }
 0xaa0   :  { %11250 = vmatpush3.msra.mxu1 %v11989_v26 }
 0xaa1   :  { %11251 = vmatprep.subr.mxu1 %v11914_v24  ;;  %v5981_v7 = vsub.f32 %v5979_v10, %v5980_v14 }
 0xaa2   :  { %11252 = vmatpush3.msra.mxu1 %v11991_v27 }
 0xaa3   :  { %11253 = vmatprep.subr.mxu1 %v11914_v24  ;;  %v5982_v17 = vand.u32 4294901760, %v5981_v7 }
 0xaa4   :  { %11254 = vmatpush3.msra.mxu1 %v11999_v30 }
 0xaa5   :  { %11255 = vmatprep.subr.mxu1 %v11914_v24  ;;  %11207 = vmatmul.mubr.f32.vlgmr.msra.gmra.mxu0 %v5982_v17 }
 0xaa6   :  { %11229 = vmatpush3.msra.mxu0 %v11997_v29  ;;  %11256 = vmatpush3.msra.mxu1 %v12002_v31 }
 0xaa7   :  { %11230 = vmatprep.subr.mxu0 %v11914_v24  ;;  %11257 = vmatprep.subr.mxu1 %v11914_v24 }
 0xaa8   :  { %11231 = vmatpush3.msra.mxu0 %v12008_v34  ;;  %11258 = vmatpush3.msra.mxu1 %v12026_v40 }
 0xaa9   :  { %11232 = vmatprep.subr.mxu0 %v11914_v24  ;;  %11259 = vmatprep.subr.mxu1 %v11914_v24 }
 0xaaa   :  { %11233 = vmatpush3.msra.mxu0 %v12011_v35  ;;  %11260 = vmatpush3.msra.mxu1 %v12044_v46 }
 0xaab   :  { %11234 = vmatprep.subr.mxu0 %v11914_v24  ;;  %11261 = vmatprep.subr.mxu1 %v11914_v24 }
 0xaac   :  { %11235 = vmatpush3.msra.mxu0 %v12023_v39  ;;  %11262 = vmatpush3.msra.mxu1 %v12069_v56 }
 0xaad   :  { %11236 = vmatprep.subr.mxu0 %v11914_v24  ;;  %11264 = vmatmul.mubr.f32.vlgmr.msra.gmra.mxu1 %v5980_v14 }
 0xaae   :  { %11285 = vmatprep.subr.mxu1 %v11914_v24  ;;  %11237 = vmatpush3.msra.mxu0 %v12035_v43 }
 0xaaf   :  { %11286 = vmatpush3.msra.mxu1 %v11986_v25  ;;  %11238 = vmatprep.subr.mxu0 %v11914_v24 }
 0xab0   :  { %11287 = vmatprep.subr.mxu1 %v11914_v24  ;;  %11239 = vmatpush3.msra.mxu0 %v12060_v53 }
 0xab1   :  { %11288 = vmatpush3.msra.mxu1 %v11989_v26  ;;  %11240 = vmatprep.subr.mxu0 %v11914_v24 }
 0xab2   :  { %11289 = vmatprep.subr.mxu1 %v11914_v24  ;;  %11241 = vmatpush3.msra.mxu0 %v12075_v58 }
 0xab3   :  { %11290 = vmatpush3.msra.mxu1 %v11991_v27  ;;  %11242 = vmatprep.subr.mxu0 %v11914_v24 }
 0xab4   :  { %11291 = vmatprep.subr.mxu1 %v11914_v24  ;;  %11243 = vmatpush3.msra.mxu0 %v12097_v1 }
 0xab5   :  { %11244 = vmatprep.mubr.msk.f32.mxu0 %vm11915_vm1, %v11914_v24  ;;  %11292 = vmatpush3.msra.mxu1 %v11999_v30 }
 0xab6   :  { %11245 = vmatmul.mubr.f32.vlgmr.msra.gmra.mxu0 %v5979_v10  ;;  %11266 = vmatprep.subr.mxu0 %v11914_v24 }
 0xab7   :  { %11293 = vmatprep.subr.mxu1 %v11914_v24  ;;  %11267 = vmatpush3.msra.mxu0 %v12020_v38 }
 0xab8   :  { %11294 = vmatpush3.msra.mxu1 %v12002_v31  ;;  %11268 = vmatprep.subr.mxu0 %v11914_v24 }
 0xab9   :  { %11295 = vmatprep.subr.mxu1 %v11914_v24  ;;  %11269 = vmatpush3.msra.mxu0 %v12029_v41 }
 0xaba   :  { %11296 = vmatpush3.msra.mxu1 %v12026_v40  ;;  %11270 = vmatprep.subr.mxu0 %v11914_v24 }
 0xabb   :  { %11297 = vmatprep.subr.mxu1 %v11914_v24  ;;  %11271 = vmatpush3.msra.mxu0 %v12032_v42 }
 0xabc   :  { %11298 = vmatpush3.msra.mxu1 %v12044_v46  ;;  %11272 = vmatprep.subr.mxu0 %v11914_v24 }
 0xabd   :  { %11299 = vmatprep.subr.mxu1 %v11914_v24  ;;  %11273 = vmatpush3.msra.mxu0 %v12041_v45 }
 0xabe   :  { %11300 = vmatpush3.msra.mxu1 %v12069_v56  ;;  %11301 = vmatprep.mubr.msk.f32.mxu1 %vm11915_vm1, %v11914_v24 }
 0xabf   :  { %11274 = vmatprep.subr.mxu0 %v11914_v24  ;;  %11302 = vmatmul.mubr.f32.vlgmr.msra.gmra.mxu1 %v13474_v0 }
 0xac0   :  { %11275 = vmatpush3.msra.mxu0 %v12066_v55  ;;  %11282 = vmatprep.mubr.msk.f32.mxu0 %vm11915_vm1, %v11914_v24 }
 0xac1   :  { %11276 = vmatprep.subr.mxu0 %v11914_v24  ;;  %11323 = vmatprep.subr.mxu1 %v11914_v24 }
 0xac2   :  { %11277 = vmatpush3.msra.mxu0 %v12090_v63  ;;  %11324 = vmatpush3.msra.mxu1 %v12055_v51 }
 0xac3   :  { %11278 = vmatprep.subr.mxu0 %v11914_v24  ;;  %11325 = vmatprep.subr.mxu1 %v11914_v24 }
 0xac4   :  { %11279 = vmatpush3.msra.mxu0 %v12104_v3  ;;  %11326 = vmatpush3.msra.mxu1 %v12063_v54 }
 0xac5   :  { %11280 = vmatprep.subr.mxu0 %v11914_v24  ;;  %11327 = vmatprep.subr.mxu1 %v11914_v24 }
 0xac6   :  { %11281 = vmatpush3.msra.mxu0 %v12120_v9  ;;  %11328 = vmatpush3.msra.mxu1 %v12087_v62 }
 0xac7   :  { %11283 = vmatmul.mubr.f32.vlgmr.msra.gmra.mxu0 %v13474_v0  ;;  %11329 = vmatprep.subr.mxu1 %v11914_v24 }
 0xac8   :  { %11330 = vmatpush3.msra.mxu1 %v12101_v2  ;;  %11304 = vmatprep.subr.mxu0 %v11914_v24 }
 0xac9   :  { %11331 = vmatprep.subr.mxu1 %v11914_v24  ;;  %11305 = vmatpush3.msra.mxu0 %v11986_v25 }
 0xaca   :  { %11332 = vmatpush3.msra.mxu1 %v12117_v8  ;;  %11306 = vmatprep.subr.mxu0 %v11914_v24 }
 0xacb   :  { %11333 = vmatprep.subr.mxu1 %v11914_v24  ;;  %11307 = vmatpush3.msra.mxu0 %v11989_v26 }
 0xacc   :  { %11334 = vmatpush3.msra.mxu1 %v12129_v13  ;;  %11308 = vmatprep.subr.mxu0 %v11914_v24 }
 0xacd   :  { %11335 = vmatprep.subr.mxu1 %v11914_v24  ;;  %11309 = vmatpush3.msra.mxu0 %v11991_v27 }
 0xace   :  { %11336 = vmatpush3.msra.mxu1 %v12137_v15  ;;  %11310 = vmatprep.subr.mxu0 %v11914_v24 }
 0xacf   :  { %11337 = vmatprep.subr.mxu1 %v11914_v24  ;;  %11311 = vmatpush3.msra.mxu0 %v11999_v30 }
 0xad0   :  { %11338 = vmatpush3.msra.mxu1 %v12148_v20  ;;  %11312 = vmatprep.subr.mxu0 %v11914_v24 }
 0xad1   :  { %11339 = vmatprep.mubr.msk.f32.mxu1 %vm11915_vm1, %v11914_v24  ;;  %11361 = vmatprep.subr.mxu1 %v11914_v24 }
 0xad2   :  { %11313 = vmatpush3.msra.mxu0 %v12002_v31  ;;  %11320 = vmatprep.mubr.msk.f32.mxu0 %vm11915_vm1, %v11914_v24 }
 0xad3   :  { %11314 = vmatprep.subr.mxu0 %v11914_v24 }
 0xad4   :  { %11315 = vmatpush3.msra.mxu0 %v12026_v40 }
 0xad5   :  { %11316 = vmatprep.subr.mxu0 %v11914_v24 }
 0xad6   :  { %11317 = vmatpush3.msra.mxu0 %v12044_v46 }
 0xad7   :  { %11318 = vmatprep.subr.mxu0 %v11914_v24 }
 0xad8   :  { %11319 = vmatpush3.msra.mxu0 %v12069_v56 }
 0xad9   :  { %11342 = vmatprep.subr.mxu0 %v11914_v24 }
 0xb5d   :  { %v6095_v23 = vpop.f32.mrf.mxu1 }
 0xb5f   :  { %v11227_v22 = vpop.f32.mrf.mxu1 }
 0xb65   :  { %v5984_v28 = vpop.f32.mrf.mxu0 }
 0xb66   :  { %v5985_v18 = vadd.f32 %v5984_v28, %v5901_v21 }
 0xb67   :  { %v11208_v32 = vpop.f32.mrf.mxu0 }
 0xb68   :  { %v6096_v48 = vadd.f32 %v6095_v23, %v5985_v18 }
 0xb6d   :  { %v6264_v33 = vpop.f32.mrf.mxu1 }
 0xb6f   :  { %v11265_v37 = vpop.f32.mrf.mxu1 }
 0xb76   :  { %v6183_v36 = vpop.f32.mrf.mxu0 }
 0xb77   :  { %v6184_v52 = vadd.f32 %v6183_v36, %v6096_v48 }
 0xb78   :  { %v11246_v19 = vpop.f32.mrf.mxu0 }
 0xb79   :  { %v6265_v50 = vadd.f32 %v6264_v33, %v6184_v52  ;;  %v6444_v33 = vld [vmem:[#allocation2 + $0x60] sm:$0xff] }
 0xb7f   :  { %v6438_v47 = vpop.f32.mrf.mxu1 }
 0xb81   :  { %v11303_v49 = vpop.f32.mrf.mxu1 }
 0xb87   :  { %v6359_v57 = vpop.f32.mrf.mxu0 }
 0xb88   :  { %v6360_v59 = vadd.f32 %v6359_v57, %v6265_v50 }
 0xb89   :  { %v11284_v61 = vpop.f32.mrf.mxu0 }
 0xb8a   :  { %v6439_v60 = vadd.f32 %v6438_v47, %v6360_v59 }
 0xb8c   :  { %11901 = vtanh.f32 %v6439_v60 }
 0xb99   :  { %v11902_v4 = vpop.eup %11901 }
 0xb9a   :  { %v6446_v44 = vsel %vm444_vm0, %v11902_v4, 0  ;;  %v13590_v6 = vadd.f32 %v11902_v4, %v13472_v12 }
 0xb9b   :  { %v13592_v5 = vand.u32 4294901760, %v6446_v44 }
 0xb9d   :  { %v6522_v16 = vsub.f32 %v6446_v44, %v13592_v5  ;;  %11340 = vmatmul.mubr.f32.vlgmr.msra.gmra.mxu1 %v13592_v5 }
 0xb9e   :  { %11362 = vmatpush3.msra.mxu1 %v11986_v25  ;;  %11377 = vmatprep.mubr.msk.f32.mxu1 %vm11915_vm1, %v11914_v24 }
 0xb9f   :  { %11363 = vmatprep.subr.mxu1 %v11914_v24  ;;  %v6523_v11 = vand.u32 4294901760, %v6522_v16 }
 0xba0   :  { %11364 = vmatpush3.msra.mxu1 %v11989_v26 }
 0xba1   :  { %11365 = vmatprep.subr.mxu1 %v11914_v24  ;;  %v6524_v12 = vsub.f32 %v6522_v16, %v6523_v11 }
 0xba2   :  { %11366 = vmatpush3.msra.mxu1 %v11991_v27 }
 0xba3   :  { %11367 = vmatprep.subr.mxu1 %v11914_v24  ;;  %v6525_v0 = vand.u32 4294901760, %v6524_v12 }
 0xba4   :  { %11368 = vmatpush3.msra.mxu1 %v11999_v30 }
 0xba5   :  { %11369 = vmatprep.subr.mxu1 %v11914_v24  ;;  %11321 = vmatmul.mubr.f32.vlgmr.msra.gmra.mxu0 %v6525_v0 }
 0xba6   :  { %11343 = vmatpush3.msra.mxu0 %v11997_v29  ;;  %11370 = vmatpush3.msra.mxu1 %v12002_v31 }
 0xba7   :  { %11344 = vmatprep.subr.mxu0 %v11914_v24  ;;  %11371 = vmatprep.subr.mxu1 %v11914_v24 }
 0xba8   :  { %11345 = vmatpush3.msra.mxu0 %v12008_v34  ;;  %11372 = vmatpush3.msra.mxu1 %v12026_v40 }
 0xba9   :  { %11346 = vmatprep.subr.mxu0 %v11914_v24  ;;  %11373 = vmatprep.subr.mxu1 %v11914_v24 }
 0xbaa   :  { %11347 = vmatpush3.msra.mxu0 %v12011_v35  ;;  %11374 = vmatpush3.msra.mxu1 %v12044_v46 }
 0xbab   :  { %11348 = vmatprep.subr.mxu0 %v11914_v24  ;;  %11375 = vmatprep.subr.mxu1 %v11914_v24 }
 0xbac   :  { %11349 = vmatpush3.msra.mxu0 %v12023_v39  ;;  %11376 = vmatpush3.msra.mxu1 %v12069_v56 }
 0xbad   :  { %11350 = vmatprep.subr.mxu0 %v11914_v24  ;;  %11378 = vmatmul.mubr.f32.vlgmr.msra.gmra.mxu1 %v6523_v11 }
 0xbae   :  { %11399 = vmatprep.subr.mxu1 %v11914_v24  ;;  %11351 = vmatpush3.msra.mxu0 %v12035_v43 }
 0xbaf   :  { %11400 = vmatpush3.msra.mxu1 %v11986_v25  ;;  %11352 = vmatprep.subr.mxu0 %v11914_v24 }
 0xbb0   :  { %11401 = vmatprep.subr.mxu1 %v11914_v24  ;;  %11353 = vmatpush3.msra.mxu0 %v12060_v53 }
 0xbb1   :  { %11402 = vmatpush3.msra.mxu1 %v11989_v26  ;;  %11354 = vmatprep.subr.mxu0 %v11914_v24 }
 0xbb2   :  { %11403 = vmatprep.subr.mxu1 %v11914_v24  ;;  %11355 = vmatpush3.msra.mxu0 %v12075_v58 }
 0xbb3   :  { %11404 = vmatpush3.msra.mxu1 %v11991_v27  ;;  %11356 = vmatprep.subr.mxu0 %v11914_v24 }
 0xbb4   :  { %11405 = vmatprep.subr.mxu1 %v11914_v24  ;;  %11357 = vmatpush3.msra.mxu0 %v12097_v1 }
 0xbb5   :  { %11358 = vmatprep.mubr.msk.f32.mxu0 %vm11915_vm1, %v11914_v24  ;;  %11406 = vmatpush3.msra.mxu1 %v11999_v30 }
 0xbb6   :  { %11359 = vmatmul.mubr.f32.vlgmr.msra.gmra.mxu0 %v6522_v16  ;;  %11380 = vmatprep.subr.mxu0 %v11914_v24 }
 0xbb7   :  { %11407 = vmatprep.subr.mxu1 %v11914_v24  ;;  %11381 = vmatpush3.msra.mxu0 %v12020_v38 }
 0xbb8   :  { %11408 = vmatpush3.msra.mxu1 %v12002_v31  ;;  %11382 = vmatprep.subr.mxu0 %v11914_v24 }
 0xbb9   :  { %11409 = vmatprep.subr.mxu1 %v11914_v24  ;;  %11383 = vmatpush3.msra.mxu0 %v12029_v41 }
 0xbba   :  { %11410 = vmatpush3.msra.mxu1 %v12026_v40  ;;  %11384 = vmatprep.subr.mxu0 %v11914_v24 }
 0xbbb   :  { %11411 = vmatprep.subr.mxu1 %v11914_v24  ;;  %11385 = vmatpush3.msra.mxu0 %v12032_v42 }
 0xbbc   :  { %11412 = vmatpush3.msra.mxu1 %v12044_v46  ;;  %11386 = vmatprep.subr.mxu0 %v11914_v24 }
 0xbbd   :  { %11413 = vmatprep.subr.mxu1 %v11914_v24  ;;  %11387 = vmatpush3.msra.mxu0 %v12041_v45 }
 0xbbe   :  { %11414 = vmatpush3.msra.mxu1 %v12069_v56  ;;  %11415 = vmatprep.mubr.msk.f32.mxu1 %vm11915_vm1, %v11914_v24 }
 0xbbf   :  { %11388 = vmatprep.subr.mxu0 %v11914_v24  ;;  %11416 = vmatmul.mubr.f32.vlgmr.msra.gmra.mxu1 %v13592_v5 }
 0xbc0   :  { %11389 = vmatpush3.msra.mxu0 %v12066_v55  ;;  %11396 = vmatprep.mubr.msk.f32.mxu0 %vm11915_vm1, %v11914_v24 }
 0xbc1   :  { %11390 = vmatprep.subr.mxu0 %v11914_v24  ;;  %11437 = vmatprep.subr.mxu1 %v11914_v24 }
 0xbc2   :  { %11391 = vmatpush3.msra.mxu0 %v12090_v63  ;;  %11438 = vmatpush3.msra.mxu1 %v12055_v51 }
 0xbc3   :  { %11392 = vmatprep.subr.mxu0 %v11914_v24  ;;  %11439 = vmatprep.subr.mxu1 %v11914_v24 }
 0xbc4   :  { %11393 = vmatpush3.msra.mxu0 %v12104_v3  ;;  %11440 = vmatpush3.msra.mxu1 %v12063_v54 }
 0xbc5   :  { %11394 = vmatprep.subr.mxu0 %v11914_v24  ;;  %11441 = vmatprep.subr.mxu1 %v11914_v24 }
 0xbc6   :  { %11395 = vmatpush3.msra.mxu0 %v12120_v9  ;;  %11442 = vmatpush3.msra.mxu1 %v12087_v62 }
 0xbc7   :  { %11397 = vmatmul.mubr.f32.vlgmr.msra.gmra.mxu0 %v13592_v5  ;;  %11443 = vmatprep.subr.mxu1 %v11914_v24 }
 0xbc8   :  { %11444 = vmatpush3.msra.mxu1 %v12101_v2  ;;  %11418 = vmatprep.subr.mxu0 %v11914_v24 }
 0xbc9   :  { %11445 = vmatprep.subr.mxu1 %v11914_v24  ;;  %11419 = vmatpush3.msra.mxu0 %v11986_v25 }
 0xbca   :  { %11446 = vmatpush3.msra.mxu1 %v12117_v8  ;;  %11420 = vmatprep.subr.mxu0 %v11914_v24 }
 0xbcb   :  { %11447 = vmatprep.subr.mxu1 %v11914_v24  ;;  %11421 = vmatpush3.msra.mxu0 %v11989_v26 }
 0xbcc   :  { %11448 = vmatpush3.msra.mxu1 %v12129_v13  ;;  %11422 = vmatprep.subr.mxu0 %v11914_v24 }
 0xbcd   :  { %11449 = vmatprep.subr.mxu1 %v11914_v24  ;;  %11423 = vmatpush3.msra.mxu0 %v11991_v27 }
 0xbce   :  { %11450 = vmatpush3.msra.mxu1 %v12137_v15  ;;  %11424 = vmatprep.subr.mxu0 %v11914_v24 }
 0xbcf   :  { %11451 = vmatprep.subr.mxu1 %v11914_v24  ;;  %11425 = vmatpush3.msra.mxu0 %v11999_v30 }
 0xbd0   :  { %11452 = vmatpush3.msra.mxu1 %v12148_v20  ;;  %11426 = vmatprep.subr.mxu0 %v11914_v24 }
 0xbd1   :  { %11453 = vmatprep.mubr.msk.f32.mxu1 %vm11915_vm1, %v11914_v24  ;;  %11475 = vmatprep.subr.mxu1 %v11914_v24 }
 0xbd2   :  { %11427 = vmatpush3.msra.mxu0 %v12002_v31  ;;  %11434 = vmatprep.mubr.msk.f32.mxu0 %vm11915_vm1, %v11914_v24 }
 0xbd3   :  { %11428 = vmatprep.subr.mxu0 %v11914_v24 }
 0xbd4   :  { %11429 = vmatpush3.msra.mxu0 %v12026_v40 }
 0xbd5   :  { %11430 = vmatprep.subr.mxu0 %v11914_v24 }
 0xbd6   :  { %11431 = vmatpush3.msra.mxu0 %v12044_v46 }
 0xbd7   :  { %11432 = vmatprep.subr.mxu0 %v11914_v24 }
 0xbd8   :  { %11433 = vmatpush3.msra.mxu0 %v12069_v56 }
 0xbd9   :  { %11456 = vmatprep.subr.mxu0 %v11914_v24 }
 0xc5d   :  { %v6638_v10 = vpop.f32.mrf.mxu1 }
 0xc5f   :  { %v11341_v14 = vpop.f32.mrf.mxu1 }
 0xc65   :  { %v6527_v7 = vpop.f32.mrf.mxu0 }
 0xc66   :  { %v6528_v37 = vadd.f32 %v6527_v7, %v6444_v33 }
 0xc67   :  { %v11322_v17 = vpop.f32.mrf.mxu0 }
 0xc68   :  { %v6639_v19 = vadd.f32 %v6638_v10, %v6528_v37 }
 0xc6d   :  { %v6807_v23 = vpop.f32.mrf.mxu1 }
 0xc6f   :  { %v11379_v22 = vpop.f32.mrf.mxu1 }
 0xc76   :  { %v6726_v28 = vpop.f32.mrf.mxu0 }
 0xc77   :  { %v6727_v18 = vadd.f32 %v6726_v28, %v6639_v19 }
 0xc78   :  { %v11360_v32 = vpop.f32.mrf.mxu0 }
 0xc79   :  { %v6808_v47 = vadd.f32 %v6807_v23, %v6727_v18  ;;  %v6987_v23 = vld [vmem:[#allocation2 + $0x68] sm:$0xff] }
 0xc7f   :  { %v6981_v36 = vpop.f32.mrf.mxu1 }
 0xc81   :  { %v11417_v21 = vpop.f32.mrf.mxu1 }
 0xc87   :  { %v6902_v48 = vpop.f32.mrf.mxu0 }
 0xc88   :  { %v6903_v49 = vadd.f32 %v6902_v48, %v6808_v47 }
 0xc89   :  { %v11398_v52 = vpop.f32.mrf.mxu0 }
 0xc8a   :  { %v6982_v50 = vadd.f32 %v6981_v36, %v6903_v49 }
 0xc8c   :  { %11903 = vtanh.f32 %v6982_v50 }
 0xc99   :  { %v11904_v57 = vpop.eup %11903 }
 0xc9a   :  { %v6989_v59 = vsel %vm444_vm0, %v11904_v57, 0  ;;  %v13708_v61 = vadd.f32 %v11904_v57, %v13590_v6 }
 0xc9b   :  { %v13710_v60 = vand.u32 4294901760, %v6989_v59 }
 0xc9d   :  { %v7065_v4 = vsub.f32 %v6989_v59, %v13710_v60  ;;  %11454 = vmatmul.mubr.f32.vlgmr.msra.gmra.mxu1 %v13710_v60 }
 0xc9e   :  { %11476 = vmatpush3.msra.mxu1 %v11986_v25  ;;  %11491 = vmatprep.mubr.msk.f32.mxu1 %vm11915_vm1, %v11914_v24 }
 0xc9f   :  { %11477 = vmatprep.subr.mxu1 %v11914_v24  ;;  %v7066_v44 = vand.u32 4294901760, %v7065_v4 }
 0xca0   :  { %11478 = vmatpush3.msra.mxu1 %v11989_v26 }
 0xca1   :  { %11479 = vmatprep.subr.mxu1 %v11914_v24  ;;  %v7067_v6 = vsub.f32 %v7065_v4, %v7066_v44 }
 0xca2   :  { %11480 = vmatpush3.msra.mxu1 %v11991_v27 }
 0xca3   :  { %11481 = vmatprep.subr.mxu1 %v11914_v24  ;;  %v7068_v5 = vand.u32 4294901760, %v7067_v6 }
 0xca4   :  { %11482 = vmatpush3.msra.mxu1 %v11999_v30 }
 0xca5   :  { %11483 = vmatprep.subr.mxu1 %v11914_v24  ;;  %11435 = vmatmul.mubr.f32.vlgmr.msra.gmra.mxu0 %v7068_v5 }
 0xca6   :  { %11457 = vmatpush3.msra.mxu0 %v11997_v29  ;;  %11484 = vmatpush3.msra.mxu1 %v12002_v31 }
 0xca7   :  { %11458 = vmatprep.subr.mxu0 %v11914_v24  ;;  %11485 = vmatprep.subr.mxu1 %v11914_v24 }
 0xca8   :  { %11459 = vmatpush3.msra.mxu0 %v12008_v34  ;;  %11486 = vmatpush3.msra.mxu1 %v12026_v40 }
 0xca9   :  { %11460 = vmatprep.subr.mxu0 %v11914_v24  ;;  %11487 = vmatprep.subr.mxu1 %v11914_v24 }
 0xcaa   :  { %11461 = vmatpush3.msra.mxu0 %v12011_v35  ;;  %11488 = vmatpush3.msra.mxu1 %v12044_v46 }
 0xcab   :  { %11462 = vmatprep.subr.mxu0 %v11914_v24  ;;  %11489 = vmatprep.subr.mxu1 %v11914_v24 }
 0xcac   :  { %11463 = vmatpush3.msra.mxu0 %v12023_v39  ;;  %11490 = vmatpush3.msra.mxu1 %v12069_v56 }
 0xcad   :  { %11464 = vmatprep.subr.mxu0 %v11914_v24  ;;  %11492 = vmatmul.mubr.f32.vlgmr.msra.gmra.mxu1 %v7066_v44 }
 0xcae   :  { %11513 = vmatprep.subr.mxu1 %v11914_v24  ;;  %11465 = vmatpush3.msra.mxu0 %v12035_v43 }
 0xcaf   :  { %11514 = vmatpush3.msra.mxu1 %v11986_v25  ;;  %11466 = vmatprep.subr.mxu0 %v11914_v24 }
 0xcb0   :  { %11515 = vmatprep.subr.mxu1 %v11914_v24  ;;  %11467 = vmatpush3.msra.mxu0 %v12060_v53 }
 0xcb1   :  { %11516 = vmatpush3.msra.mxu1 %v11989_v26  ;;  %11468 = vmatprep.subr.mxu0 %v11914_v24 }
 0xcb2   :  { %11517 = vmatprep.subr.mxu1 %v11914_v24  ;;  %11469 = vmatpush3.msra.mxu0 %v12075_v58 }
 0xcb3   :  { %11518 = vmatpush3.msra.mxu1 %v11991_v27  ;;  %11470 = vmatprep.subr.mxu0 %v11914_v24 }
 0xcb4   :  { %11519 = vmatprep.subr.mxu1 %v11914_v24  ;;  %11471 = vmatpush3.msra.mxu0 %v12097_v1 }
 0xcb5   :  { %11472 = vmatprep.mubr.msk.f32.mxu0 %vm11915_vm1, %v11914_v24  ;;  %11520 = vmatpush3.msra.mxu1 %v11999_v30 }
 0xcb6   :  { %11473 = vmatmul.mubr.f32.vlgmr.msra.gmra.mxu0 %v7065_v4  ;;  %11494 = vmatprep.subr.mxu0 %v11914_v24 }
 0xcb7   :  { %11521 = vmatprep.subr.mxu1 %v11914_v24  ;;  %11495 = vmatpush3.msra.mxu0 %v12020_v38 }
 0xcb8   :  { %11522 = vmatpush3.msra.mxu1 %v12002_v31  ;;  %11496 = vmatprep.subr.mxu0 %v11914_v24 }
 0xcb9   :  { %11523 = vmatprep.subr.mxu1 %v11914_v24  ;;  %11497 = vmatpush3.msra.mxu0 %v12029_v41 }
 0xcba   :  { %11524 = vmatpush3.msra.mxu1 %v12026_v40  ;;  %11498 = vmatprep.subr.mxu0 %v11914_v24 }
 0xcbb   :  { %11525 = vmatprep.subr.mxu1 %v11914_v24  ;;  %11499 = vmatpush3.msra.mxu0 %v12032_v42 }
 0xcbc   :  { %11526 = vmatpush3.msra.mxu1 %v12044_v46  ;;  %11500 = vmatprep.subr.mxu0 %v11914_v24 }
 0xcbd   :  { %11527 = vmatprep.subr.mxu1 %v11914_v24  ;;  %11501 = vmatpush3.msra.mxu0 %v12041_v45 }
 0xcbe   :  { %11528 = vmatpush3.msra.mxu1 %v12069_v56  ;;  %11529 = vmatprep.mubr.msk.f32.mxu1 %vm11915_vm1, %v11914_v24 }
 0xcbf   :  { %11502 = vmatprep.subr.mxu0 %v11914_v24  ;;  %11530 = vmatmul.mubr.f32.vlgmr.msra.gmra.mxu1 %v13710_v60 }
 0xcc0   :  { %11503 = vmatpush3.msra.mxu0 %v12066_v55  ;;  %11510 = vmatprep.mubr.msk.f32.mxu0 %vm11915_vm1, %v11914_v24 }
 0xcc1   :  { %11504 = vmatprep.subr.mxu0 %v11914_v24  ;;  %11551 = vmatprep.subr.mxu1 %v11914_v24 }
 0xcc2   :  { %11505 = vmatpush3.msra.mxu0 %v12090_v63  ;;  %11552 = vmatpush3.msra.mxu1 %v12055_v51 }
 0xcc3   :  { %11506 = vmatprep.subr.mxu0 %v11914_v24  ;;  %11553 = vmatprep.subr.mxu1 %v11914_v24 }
 0xcc4   :  { %11507 = vmatpush3.msra.mxu0 %v12104_v3  ;;  %11554 = vmatpush3.msra.mxu1 %v12063_v54 }
 0xcc5   :  { %11508 = vmatprep.subr.mxu0 %v11914_v24  ;;  %11555 = vmatprep.subr.mxu1 %v11914_v24 }
 0xcc6   :  { %11509 = vmatpush3.msra.mxu0 %v12120_v9  ;;  %11556 = vmatpush3.msra.mxu1 %v12087_v62 }
 0xcc7   :  { %11511 = vmatmul.mubr.f32.vlgmr.msra.gmra.mxu0 %v13710_v60  ;;  %11557 = vmatprep.subr.mxu1 %v11914_v24 }
 0xcc8   :  { %11558 = vmatpush3.msra.mxu1 %v12101_v2  ;;  %11532 = vmatprep.subr.mxu0 %v11914_v24 }
 0xcc9   :  { %11559 = vmatprep.subr.mxu1 %v11914_v24  ;;  %11533 = vmatpush3.msra.mxu0 %v11986_v25 }
 0xcca   :  { %11560 = vmatpush3.msra.mxu1 %v12117_v8  ;;  %11534 = vmatprep.subr.mxu0 %v11914_v24 }
 0xccb   :  { %11561 = vmatprep.subr.mxu1 %v11914_v24  ;;  %11535 = vmatpush3.msra.mxu0 %v11989_v26 }
 0xccc   :  { %11562 = vmatpush3.msra.mxu1 %v12129_v13  ;;  %11536 = vmatprep.subr.mxu0 %v11914_v24 }
 0xccd   :  { %11563 = vmatprep.subr.mxu1 %v11914_v24  ;;  %11537 = vmatpush3.msra.mxu0 %v11991_v27 }
 0xcce   :  { %11564 = vmatpush3.msra.mxu1 %v12137_v15  ;;  %11538 = vmatprep.subr.mxu0 %v11914_v24 }
 0xccf   :  { %11565 = vmatprep.subr.mxu1 %v11914_v24  ;;  %11539 = vmatpush3.msra.mxu0 %v11999_v30 }
 0xcd0   :  { %11566 = vmatpush3.msra.mxu1 %v12148_v20  ;;  %11540 = vmatprep.subr.mxu0 %v11914_v24 }
 0xcd1   :  { %11567 = vmatprep.mubr.msk.f32.mxu1 %vm11915_vm1, %v11914_v24  ;;  %11589 = vmatprep.subr.mxu1 %v11914_v24 }
 0xcd2   :  { %11541 = vmatpush3.msra.mxu0 %v12002_v31  ;;  %11548 = vmatprep.mubr.msk.f32.mxu0 %vm11915_vm1, %v11914_v24 }
 0xcd3   :  { %11542 = vmatprep.subr.mxu0 %v11914_v24 }
 0xcd4   :  { %11543 = vmatpush3.msra.mxu0 %v12026_v40 }
 0xcd5   :  { %11544 = vmatprep.subr.mxu0 %v11914_v24 }
 0xcd6   :  { %11545 = vmatpush3.msra.mxu0 %v12044_v46 }
 0xcd7   :  { %11546 = vmatprep.subr.mxu0 %v11914_v24 }
 0xcd8   :  { %11547 = vmatpush3.msra.mxu0 %v12069_v56 }
 0xcd9   :  { %11570 = vmatprep.subr.mxu0 %v11914_v24 }
 0xd5d   :  { %v7181_v16 = vpop.f32.mrf.mxu1 }
 0xd5f   :  { %v11455_v11 = vpop.f32.mrf.mxu1 }
 0xd65   :  { %v7070_v12 = vpop.f32.mrf.mxu0 }
 0xd66   :  { %v7071_v22 = vadd.f32 %v7070_v12, %v6987_v23 }
 0xd67   :  { %v11436_v0 = vpop.f32.mrf.mxu0 }
 0xd68   :  { %v7182_v32 = vadd.f32 %v7181_v16, %v7071_v22 }
 0xd6d   :  { %v7350_v10 = vpop.f32.mrf.mxu1 }
 0xd6f   :  { %v11493_v14 = vpop.f32.mrf.mxu1 }
 0xd76   :  { %v7269_v7 = vpop.f32.mrf.mxu0 }
 0xd77   :  { %v7270_v37 = vadd.f32 %v7269_v7, %v7182_v32 }
 0xd78   :  { %v11474_v17 = vpop.f32.mrf.mxu0 }
 0xd79   :  { %v7351_v36 = vadd.f32 %v7350_v10, %v7270_v37  ;;  %v7530_v10 = vld [vmem:[#allocation2 + $0x70] sm:$0xff] }
 0xd7f   :  { %v7524_v28 = vpop.f32.mrf.mxu1 }
 0xd81   :  { %v11531_v33 = vpop.f32.mrf.mxu1 }
 0xd87   :  { %v7445_v19 = vpop.f32.mrf.mxu0 }
 0xd88   :  { %v7446_v21 = vadd.f32 %v7445_v19, %v7351_v36 }
 0xd89   :  { %v11512_v18 = vpop.f32.mrf.mxu0 }
 0xd8a   :  { %v7525_v47 = vadd.f32 %v7524_v28, %v7446_v21 }
 0xd8c   :  { %11905 = vtanh.f32 %v7525_v47 }
 0xd99   :  { %v11906_v48 = vpop.eup %11905 }
 0xd9a   :  { %v7532_v49 = vsel %vm444_vm0, %v11906_v48, 0  ;;  %v13826_v52 = vadd.f32 %v11906_v48, %v13708_v61 }
 0xd9b   :  { %v13828_v50 = vand.u32 4294901760, %v7532_v49 }
 0xd9d   :  { %v7608_v57 = vsub.f32 %v7532_v49, %v13828_v50  ;;  %11568 = vmatmul.mubr.f32.vlgmr.msra.gmra.mxu1 %v13828_v50 }
 0xd9e   :  { %11590 = vmatpush3.msra.mxu1 %v11986_v25  ;;  %11605 = vmatprep.mubr.msk.f32.mxu1 %vm11915_vm1, %v11914_v24 }
 0xd9f   :  { %11591 = vmatprep.subr.mxu1 %v11914_v24  ;;  %v7609_v59 = vand.u32 4294901760, %v7608_v57 }
 0xda0   :  { %11592 = vmatpush3.msra.mxu1 %v11989_v26 }
 0xda1   :  { %11593 = vmatprep.subr.mxu1 %v11914_v24  ;;  %v7610_v61 = vsub.f32 %v7608_v57, %v7609_v59 }
 0xda2   :  { %11594 = vmatpush3.msra.mxu1 %v11991_v27 }
 0xda3   :  { %11595 = vmatprep.subr.mxu1 %v11914_v24  ;;  %v7611_v60 = vand.u32 4294901760, %v7610_v61 }
 0xda4   :  { %11596 = vmatpush3.msra.mxu1 %v11999_v30 }
 0xda5   :  { %11597 = vmatprep.subr.mxu1 %v11914_v24  ;;  %11549 = vmatmul.mubr.f32.vlgmr.msra.gmra.mxu0 %v7611_v60 }
 0xda6   :  { %11571 = vmatpush3.msra.mxu0 %v11997_v29  ;;  %11598 = vmatpush3.msra.mxu1 %v12002_v31 }
 0xda7   :  { %11572 = vmatprep.subr.mxu0 %v11914_v24  ;;  %11599 = vmatprep.subr.mxu1 %v11914_v24 }
 0xda8   :  { %11573 = vmatpush3.msra.mxu0 %v12008_v34  ;;  %11600 = vmatpush3.msra.mxu1 %v12026_v40 }
 0xda9   :  { %11574 = vmatprep.subr.mxu0 %v11914_v24  ;;  %11601 = vmatprep.subr.mxu1 %v11914_v24 }
 0xdaa   :  { %11575 = vmatpush3.msra.mxu0 %v12011_v35  ;;  %11602 = vmatpush3.msra.mxu1 %v12044_v46 }
 0xdab   :  { %11576 = vmatprep.subr.mxu0 %v11914_v24  ;;  %11603 = vmatprep.subr.mxu1 %v11914_v24 }
 0xdac   :  { %11577 = vmatpush3.msra.mxu0 %v12023_v39  ;;  %11604 = vmatpush3.msra.mxu1 %v12069_v56 }
 0xdad   :  { %11578 = vmatprep.subr.mxu0 %v11914_v24  ;;  %11606 = vmatmul.mubr.f32.vlgmr.msra.gmra.mxu1 %v7609_v59 }
 0xdae   :  { %11627 = vmatprep.subr.mxu1 %v11914_v24  ;;  %11579 = vmatpush3.msra.mxu0 %v12035_v43 }
 0xdaf   :  { %11628 = vmatpush3.msra.mxu1 %v11986_v25  ;;  %11580 = vmatprep.subr.mxu0 %v11914_v24 }
 0xdb0   :  { %11629 = vmatprep.subr.mxu1 %v11914_v24  ;;  %11581 = vmatpush3.msra.mxu0 %v12060_v53 }
 0xdb1   :  { %11630 = vmatpush3.msra.mxu1 %v11989_v26  ;;  %11582 = vmatprep.subr.mxu0 %v11914_v24 }
 0xdb2   :  { %11631 = vmatprep.subr.mxu1 %v11914_v24  ;;  %11583 = vmatpush3.msra.mxu0 %v12075_v58 }
 0xdb3   :  { %11632 = vmatpush3.msra.mxu1 %v11991_v27  ;;  %11584 = vmatprep.subr.mxu0 %v11914_v24 }
 0xdb4   :  { %11633 = vmatprep.subr.mxu1 %v11914_v24  ;;  %11585 = vmatpush3.msra.mxu0 %v12097_v1 }
 0xdb5   :  { %11586 = vmatprep.mubr.msk.f32.mxu0 %vm11915_vm1, %v11914_v24  ;;  %11634 = vmatpush3.msra.mxu1 %v11999_v30 }
 0xdb6   :  { %11587 = vmatmul.mubr.f32.vlgmr.msra.gmra.mxu0 %v7608_v57  ;;  %11608 = vmatprep.subr.mxu0 %v11914_v24  ;;  %v8073_v57 = vld [vmem:[#allocation2 + $0x78] sm:$0xff] }
 0xdb7   :  { %11635 = vmatprep.subr.mxu1 %v11914_v24  ;;  %11609 = vmatpush3.msra.mxu0 %v12020_v38 }
 0xdb8   :  { %11636 = vmatpush3.msra.mxu1 %v12002_v31  ;;  %11610 = vmatprep.subr.mxu0 %v11914_v24 }
 0xdb9   :  { %11637 = vmatprep.subr.mxu1 %v11914_v24  ;;  %11611 = vmatpush3.msra.mxu0 %v12029_v41 }
 0xdba   :  { %11638 = vmatpush3.msra.mxu1 %v12026_v40  ;;  %11612 = vmatprep.subr.mxu0 %v11914_v24 }
 0xdbb   :  { %11639 = vmatprep.subr.mxu1 %v11914_v24  ;;  %11613 = vmatpush3.msra.mxu0 %v12032_v42 }
 0xdbc   :  { %11640 = vmatpush3.msra.mxu1 %v12044_v46  ;;  %11614 = vmatprep.subr.mxu0 %v11914_v24 }
 0xdbd   :  { %11641 = vmatprep.subr.mxu1 %v11914_v24  ;;  %11615 = vmatpush3.msra.mxu0 %v12041_v45 }
 0xdbe   :  { %11642 = vmatpush3.msra.mxu1 %v12069_v56  ;;  %11643 = vmatprep.mubr.msk.f32.mxu1 %vm11915_vm1, %v11914_v24 }
 0xdbf   :  { %11616 = vmatprep.subr.mxu0 %v11914_v24  ;;  %11644 = vmatmul.mubr.f32.vlgmr.msra.gmra.mxu1 %v13828_v50 }
 0xdc0   :  { %11617 = vmatpush3.msra.mxu0 %v12066_v55  ;;  %11624 = vmatprep.mubr.msk.f32.mxu0 %vm11915_vm1, %v11914_v24 }
 0xdc1   :  { %11618 = vmatprep.subr.mxu0 %v11914_v24  ;;  %11665 = vmatprep.subr.mxu1 %v11914_v24 }
 0xdc2   :  { %11619 = vmatpush3.msra.mxu0 %v12090_v63  ;;  %11666 = vmatpush3.msra.mxu1 %v12055_v51 }
 0xdc3   :  { %11620 = vmatprep.subr.mxu0 %v11914_v24  ;;  %11667 = vmatprep.subr.mxu1 %v11914_v24 }
 0xdc4   :  { %11621 = vmatpush3.msra.mxu0 %v12104_v3  ;;  %11668 = vmatpush3.msra.mxu1 %v12063_v54 }
 0xdc5   :  { %11622 = vmatprep.subr.mxu0 %v11914_v24  ;;  %11669 = vmatprep.subr.mxu1 %v11914_v24 }
 0xdc6   :  { %11623 = vmatpush3.msra.mxu0 %v12120_v9  ;;  %11670 = vmatpush3.msra.mxu1 %v12087_v62 }
 0xdc7   :  { %11625 = vmatmul.mubr.f32.vlgmr.msra.gmra.mxu0 %v13828_v50  ;;  %11671 = vmatprep.subr.mxu1 %v11914_v24 }
 0xdc8   :  { %11672 = vmatpush3.msra.mxu1 %v12101_v2  ;;  %11646 = vmatprep.subr.mxu0 %v11914_v24 }
 0xdc9   :  { %11673 = vmatprep.subr.mxu1 %v11914_v24  ;;  %11647 = vmatpush3.msra.mxu0 %v11986_v25 }
 0xdca   :  { %11674 = vmatpush3.msra.mxu1 %v12117_v8  ;;  %11648 = vmatprep.subr.mxu0 %v11914_v24 }
 0xdcb   :  { %11675 = vmatprep.subr.mxu1 %v11914_v24  ;;  %11649 = vmatpush3.msra.mxu0 %v11989_v26 }
 0xdcc   :  { %11676 = vmatpush3.msra.mxu1 %v12129_v13  ;;  %11650 = vmatprep.subr.mxu0 %v11914_v24 }
 0xdcd   :  { %11677 = vmatprep.subr.mxu1 %v11914_v24  ;;  %11651 = vmatpush3.msra.mxu0 %v11991_v27 }
 0xdce   :  { %11678 = vmatpush3.msra.mxu1 %v12137_v15  ;;  %11652 = vmatprep.subr.mxu0 %v11914_v24 }
 0xdcf   :  { %11679 = vmatprep.subr.mxu1 %v11914_v24  ;;  %11653 = vmatpush3.msra.mxu0 %v11999_v30 }
 0xdd0   :  { %11680 = vmatpush3.msra.mxu1 %v12148_v20  ;;  %11654 = vmatprep.subr.mxu0 %v11914_v24 }
 0xdd1   :  { %11681 = vmatprep.mubr.msk.f32.mxu1 %vm11915_vm1, %v11914_v24  ;;  %11703 = vmatprep.subr.mxu1 %v11914_v24 }
 0xdd2   :  { %11655 = vmatpush3.msra.mxu0 %v12002_v31  ;;  %11662 = vmatprep.mubr.msk.f32.mxu0 %vm11915_vm1, %v11914_v24 }
 0xdd3   :  { %11656 = vmatprep.subr.mxu0 %v11914_v24 }
 0xdd4   :  { %11657 = vmatpush3.msra.mxu0 %v12026_v40 }
 0xdd5   :  { %11658 = vmatprep.subr.mxu0 %v11914_v24 }
 0xdd6   :  { %11659 = vmatpush3.msra.mxu0 %v12044_v46 }
 0xdd7   :  { %11660 = vmatprep.subr.mxu0 %v11914_v24 }
 0xdd8   :  { %11661 = vmatpush3.msra.mxu0 %v12069_v56 }
 0xdd9   :  { %11684 = vmatprep.subr.mxu0 %v11914_v24 }
 0xe5d   :  { %v7724_v4 = vpop.f32.mrf.mxu1 }
 0xe5f   :  { %v11569_v44 = vpop.f32.mrf.mxu1 }
 0xe65   :  { %v7613_v6 = vpop.f32.mrf.mxu0 }
 0xe66   :  { %v7614_v14 = vadd.f32 %v7613_v6, %v7530_v10 }
 0xe67   :  { %v11550_v5 = vpop.f32.mrf.mxu0 }
 0xe68   :  { %v7725_v17 = vadd.f32 %v7724_v4, %v7614_v14 }
 0xe6d   :  { %v7893_v16 = vpop.f32.mrf.mxu1 }
 0xe6f   :  { %v11607_v11 = vpop.f32.mrf.mxu1 }
 0xe76   :  { %v7812_v12 = vpop.f32.mrf.mxu0 }
 0xe77   :  { %v7813_v22 = vadd.f32 %v7812_v12, %v7725_v17 }
 0xe78   :  { %v11588_v0 = vpop.f32.mrf.mxu0 }
 0xe79   :  { %v7894_v28 = vadd.f32 %v7893_v16, %v7813_v22 }
 0xe7f   :  { %v8067_v7 = vpop.f32.mrf.mxu1 }
 0xe81   :  { %v11645_v23 = vpop.f32.mrf.mxu1 }
 0xe87   :  { %v7988_v32 = vpop.f32.mrf.mxu0 }
 0xe88   :  { %v7989_v33 = vadd.f32 %v7988_v32, %v7894_v28 }
 0xe89   :  { %v11626_v37 = vpop.f32.mrf.mxu0 }
 0xe8a   :  { %v8068_v36 = vadd.f32 %v8067_v7, %v7989_v33  ;;  %v20_v33 = vld [vmem:[%s14153_s1 + $0x6] sm:$0x1] }
 0xe8b   :  { %v9167_v37 = vmul.f32 16.0, %v20_v33 }
 0xe8c   :  { %11907 = vtanh.f32 %v8068_v36 }
 0xe99   :  { %v11908_v19 = vpop.eup %11907 }
 0xe9a   :  { %v8075_v21 = vsel %vm444_vm0, %v11908_v19, 0  ;;  %v13944_v18 = vadd.f32 %v11908_v19, %v13826_v52 }
 0xe9b   :  { %v13946_v47 = vand.u32 4294901760, %v8075_v21 }
 0xe9d   :  { %v8151_v48 = vsub.f32 %v8075_v21, %v13946_v47  ;;  %11682 = vmatmul.mubr.f32.vlgmr.msra.gmra.mxu1 %v13946_v47 }
 0xe9e   :  { %11704 = vmatpush3.msra.mxu1 %v11986_v25  ;;  %11719 = vmatprep.mubr.msk.f32.mxu1 %vm11915_vm1, %v11914_v24 }
 0xe9f   :  { %11705 = vmatprep.subr.mxu1 %v11914_v24  ;;  %v8152_v49 = vand.u32 4294901760, %v8151_v48 }
 0xea0   :  { %11706 = vmatpush3.msra.mxu1 %v11989_v26 }
 0xea1   :  { %11707 = vmatprep.subr.mxu1 %v11914_v24  ;;  %v8153_v52 = vsub.f32 %v8151_v48, %v8152_v49 }
 0xea2   :  { %11708 = vmatpush3.msra.mxu1 %v11991_v27 }
 0xea3   :  { %11709 = vmatprep.subr.mxu1 %v11914_v24  ;;  %v8154_v50 = vand.u32 4294901760, %v8153_v52 }
 0xea4   :  { %11710 = vmatpush3.msra.mxu1 %v11999_v30 }
 0xea5   :  { %11711 = vmatprep.subr.mxu1 %v11914_v24  ;;  %11663 = vmatmul.mubr.f32.vlgmr.msra.gmra.mxu0 %v8154_v50 }
 0xea6   :  { %11685 = vmatpush3.msra.mxu0 %v11997_v29  ;;  %11712 = vmatpush3.msra.mxu1 %v12002_v31 }
 0xea7   :  { %11686 = vmatprep.subr.mxu0 %v11914_v24  ;;  %11713 = vmatprep.subr.mxu1 %v11914_v24 }
 0xea8   :  { %11687 = vmatpush3.msra.mxu0 %v12008_v34  ;;  %11714 = vmatpush3.msra.mxu1 %v12026_v40 }
 0xea9   :  { %11688 = vmatprep.subr.mxu0 %v11914_v24  ;;  %11715 = vmatprep.subr.mxu1 %v11914_v24 }
 0xeaa   :  { %11689 = vmatpush3.msra.mxu0 %v12011_v35  ;;  %11716 = vmatpush3.msra.mxu1 %v12044_v46 }
 0xeab   :  { %11690 = vmatprep.subr.mxu0 %v11914_v24  ;;  %11717 = vmatprep.subr.mxu1 %v11914_v24 }
 0xeac   :  { %11691 = vmatpush3.msra.mxu0 %v12023_v39  ;;  %11718 = vmatpush3.msra.mxu1 %v12069_v56 }
 0xead   :  { %11692 = vmatprep.subr.mxu0 %v11914_v24  ;;  %11720 = vmatmul.mubr.f32.vlgmr.msra.gmra.mxu1 %v8152_v49 }
 0xeae   :  { %11741 = vmatprep.subr.mxu1 %v11914_v24  ;;  %11693 = vmatpush3.msra.mxu0 %v12035_v43 }
 0xeaf   :  { %11742 = vmatpush3.msra.mxu1 %v11986_v25  ;;  %11694 = vmatprep.subr.mxu0 %v11914_v24 }
 0xeb0   :  { %11743 = vmatprep.subr.mxu1 %v11914_v24  ;;  %11695 = vmatpush3.msra.mxu0 %v12060_v53 }
 0xeb1   :  { %11744 = vmatpush3.msra.mxu1 %v11989_v26  ;;  %11696 = vmatprep.subr.mxu0 %v11914_v24 }
 0xeb2   :  { %11745 = vmatprep.subr.mxu1 %v11914_v24  ;;  %11697 = vmatpush3.msra.mxu0 %v12075_v58 }
 0xeb3   :  { %11746 = vmatpush3.msra.mxu1 %v11991_v27  ;;  %11698 = vmatprep.subr.mxu0 %v11914_v24 }
 0xeb4   :  { %11747 = vmatprep.subr.mxu1 %v11914_v24  ;;  %11699 = vmatpush3.msra.mxu0 %v12097_v1 }
 0xeb5   :  { %11700 = vmatprep.mubr.msk.f32.mxu0 %vm11915_vm1, %v11914_v24  ;;  %11748 = vmatpush3.msra.mxu1 %v11999_v30 }
 0xeb6   :  { %11701 = vmatmul.mubr.f32.vlgmr.msra.gmra.mxu0 %v8151_v48  ;;  %11722 = vmatprep.subr.mxu0 %v11914_v24 }
 0xeb7   :  { %11749 = vmatprep.subr.mxu1 %v11914_v24  ;;  %11723 = vmatpush3.msra.mxu0 %v12020_v38 }
 0xeb8   :  { %11750 = vmatpush3.msra.mxu1 %v12002_v31  ;;  %11724 = vmatprep.subr.mxu0 %v11914_v24 }
 0xeb9   :  { %11751 = vmatprep.subr.mxu1 %v11914_v24  ;;  %11725 = vmatpush3.msra.mxu0 %v12029_v41 }
 0xeba   :  { %11752 = vmatpush3.msra.mxu1 %v12026_v40  ;;  %11726 = vmatprep.subr.mxu0 %v11914_v24 }
 0xebb   :  { %11753 = vmatprep.subr.mxu1 %v11914_v24  ;;  %11727 = vmatpush3.msra.mxu0 %v12032_v42 }
 0xebc   :  { %11754 = vmatpush3.msra.mxu1 %v12044_v46  ;;  %11728 = vmatprep.subr.mxu0 %v11914_v24 }
 0xebd   :  { %11755 = vmatprep.subr.mxu1 %v11914_v24  ;;  %11729 = vmatpush3.msra.mxu0 %v12041_v45 }
 0xebe   :  { %11756 = vmatpush3.msra.mxu1 %v12069_v56  ;;  %11757 = vmatprep.mubr.msk.f32.mxu1 %vm11915_vm1, %v11914_v24 }
 0xebf   :  { %11730 = vmatprep.subr.mxu0 %v11914_v24  ;;  %11758 = vmatmul.mubr.f32.vlgmr.msra.gmra.mxu1 %v13946_v47 }
 0xec0   :  { %11731 = vmatpush3.msra.mxu0 %v12066_v55  ;;  %11738 = vmatprep.mubr.msk.f32.mxu0 %vm11915_vm1, %v11914_v24 }
 0xec1   :  { %11732 = vmatprep.subr.mxu0 %v11914_v24  ;;  %11779 = vmatprep.subr.mxu1 %v11914_v24 }
 0xec2   :  { %11733 = vmatpush3.msra.mxu0 %v12090_v63  ;;  %11780 = vmatpush3.msra.mxu1 %v12055_v51 }
 0xec3   :  { %11734 = vmatprep.subr.mxu0 %v11914_v24  ;;  %11781 = vmatprep.subr.mxu1 %v11914_v24 }
 0xec4   :  { %11735 = vmatpush3.msra.mxu0 %v12104_v3  ;;  %11782 = vmatpush3.msra.mxu1 %v12063_v54 }
 0xec5   :  { %11736 = vmatprep.subr.mxu0 %v11914_v24  ;;  %11783 = vmatprep.subr.mxu1 %v11914_v24 }
 0xec6   :  { %11737 = vmatpush3.msra.mxu0 %v12120_v9  ;;  %11784 = vmatpush3.msra.mxu1 %v12087_v62 }
 0xec7   :  { %11739 = vmatmul.mubr.f32.vlgmr.msra.gmra.mxu0 %v13946_v47  ;;  %11785 = vmatprep.subr.mxu1 %v11914_v24 }
 0xec8   :  { %11786 = vmatpush3.msra.mxu1 %v12101_v2  ;;  %11760 = vmatprep.subr.mxu0 %v11914_v24 }
 0xec9   :  { %11787 = vmatprep.subr.mxu1 %v11914_v24  ;;  %11761 = vmatpush3.msra.mxu0 %v11986_v25 }
 0xeca   :  { %11788 = vmatpush3.msra.mxu1 %v12117_v8  ;;  %11762 = vmatprep.subr.mxu0 %v11914_v24 }
 0xecb   :  { %11789 = vmatprep.subr.mxu1 %v11914_v24  ;;  %11763 = vmatpush3.msra.mxu0 %v11989_v26 }
 0xecc   :  { %11790 = vmatpush3.msra.mxu1 %v12129_v13  ;;  %11764 = vmatprep.subr.mxu0 %v11914_v24 }
 0xecd   :  { %11791 = vmatprep.subr.mxu1 %v11914_v24  ;;  %11765 = vmatpush3.msra.mxu0 %v11991_v27 }
 0xece   :  { %11792 = vmatpush3.msra.mxu1 %v12137_v15  ;;  %11766 = vmatprep.subr.mxu0 %v11914_v24 }
 0xecf   :  { %11793 = vmatprep.subr.mxu1 %v11914_v24  ;;  %11767 = vmatpush3.msra.mxu0 %v11999_v30 }
 0xed0   :  { %11794 = vmatpush3.msra.mxu1 %v12148_v20  ;;  %11768 = vmatprep.subr.mxu0 %v11914_v24 }
 0xed1   :  { %11795 = vmatprep.mubr.msk.f32.mxu1 %vm11915_vm1, %v11914_v24  ;;  %11817 = vmatprep.subr.mxu1 %v11914_v24 }
 0xed2   :  { %11769 = vmatpush3.msra.mxu0 %v12002_v31  ;;  %11776 = vmatprep.mubr.msk.f32.mxu0 %vm11915_vm1, %v11914_v24 }
 0xed3   :  { %11770 = vmatprep.subr.mxu0 %v11914_v24 }
 0xed4   :  { %11771 = vmatpush3.msra.mxu0 %v12026_v40 }
 0xed5   :  { %11772 = vmatprep.subr.mxu0 %v11914_v24 }
 0xed6   :  { %11773 = vmatpush3.msra.mxu0 %v12044_v46 }
 0xed7   :  { %11774 = vmatprep.subr.mxu0 %v11914_v24 }
 0xed8   :  { %11775 = vmatpush3.msra.mxu0 %v12069_v56 }
 0xed9   :  { %11798 = vmatprep.subr.mxu0 %v11914_v24 }
 0xf5d   :  { %v8267_v51 = vpop.f32.mrf.mxu1 }
 0xf5f   :  { %v11683_v54 = vpop.f32.mrf.mxu1 }
 0xf65   :  { %v8156_v62 = vpop.f32.mrf.mxu0 }
 0xf66   :  { %v8157_v59 = vadd.f32 %v8156_v62, %v8073_v57 }
 0xf67   :  { %v11664_v2 = vpop.f32.mrf.mxu0 }
 0xf68   :  { %v8268_v60 = vadd.f32 %v8267_v51, %v8157_v59 }
 0xf6d   :  { %v8436_v8 = vpop.f32.mrf.mxu1 }
 0xf6f   :  { %v11721_v13 = vpop.f32.mrf.mxu1 }
 0xf76   :  { %v8355_v15 = vpop.f32.mrf.mxu0 }
 0xf77   :  { %v8356_v44 = vadd.f32 %v8355_v15, %v8268_v60 }
 0xf78   :  { %v11702_v20 = vpop.f32.mrf.mxu0 }
 0xf79   :  { %v8437_v6 = vadd.f32 %v8436_v8, %v8356_v44 }
 0xf7f   :  { %v8610_v61 = vpop.f32.mrf.mxu1 }
 0xf81   :  { %v11759_v4 = vpop.f32.mrf.mxu1 }
 0xf87   :  { %v8531_v5 = vpop.f32.mrf.mxu0 }
 0xf88   :  { %v8532_v16 = vadd.f32 %v8531_v5, %v8437_v6 }
 0xf89   :  { %v11740_v11 = vpop.f32.mrf.mxu0 }
 0xf8a   :  { %v8611_v12 = vadd.f32 %v8610_v61, %v8532_v16 }
 0xf8c   :  { %11909 = vtanh.f32 %v8611_v12 }
 0xf99   :  { %v11910_v0 = vpop.eup %11909 }
 0xf9a   :  { %v8618_v10 = vsel %vm444_vm0, %v11910_v0, 0  ;;  %v14062_v14 = vadd.f32 %v11910_v0, %v13944_v18 }
 0xf9b   :  { %v14064_v7 = vand.u32 4294901760, %v8618_v10 }
 0xf9d   :  { %v8694_v17 = vsub.f32 %v8618_v10, %v14064_v7  ;;  %11796 = vmatmul.mubr.f32.vlgmr.msra.gmra.mxu1 %v14064_v7 }
 0xf9e   :  { %11818 = vmatpush3.msra.mxu1 %v11986_v25  ;;  %11833 = vmatprep.mubr.msk.f32.mxu1 %vm11915_vm1, %v11914_v24 }
 0xf9f   :  { %11819 = vmatprep.subr.mxu1 %v11914_v24  ;;  %v8695_v23 = vand.u32 4294901760, %v8694_v17 }
 0xfa0   :  { %11820 = vmatpush3.msra.mxu1 %v11989_v26 }
 0xfa1   :  { %11821 = vmatprep.subr.mxu1 %v11914_v24  ;;  %v8696_v22 = vsub.f32 %v8694_v17, %v8695_v23 }
 0xfa2   :  { %11822 = vmatpush3.msra.mxu1 %v11991_v27 }
 0xfa3   :  { %11823 = vmatprep.subr.mxu1 %v11914_v24  ;;  %v8697_v28 = vand.u32 4294901760, %v8696_v22 }
 0xfa4   :  { %11824 = vmatpush3.msra.mxu1 %v11999_v30 }
 0xfa5   :  { %11825 = vmatprep.subr.mxu1 %v11914_v24  ;;  %11777 = vmatmul.mubr.f32.vlgmr.msra.gmra.mxu0 %v8697_v28 }
 0xfa6   :  { %11799 = vmatpush3.msra.mxu0 %v11997_v29  ;;  %11826 = vmatpush3.msra.mxu1 %v12002_v31 }
 0xfa7   :  { %11800 = vmatprep.subr.mxu0 %v11914_v24  ;;  %11827 = vmatprep.subr.mxu1 %v11914_v24 }
 0xfa8   :  { %11801 = vmatpush3.msra.mxu0 %v12008_v34  ;;  %11828 = vmatpush3.msra.mxu1 %v12026_v40 }
 0xfa9   :  { %11802 = vmatprep.subr.mxu0 %v11914_v24  ;;  %11829 = vmatprep.subr.mxu1 %v11914_v24 }
 0xfaa   :  { %11803 = vmatpush3.msra.mxu0 %v12011_v35  ;;  %11830 = vmatpush3.msra.mxu1 %v12044_v46 }
 0xfab   :  { %11804 = vmatprep.subr.mxu0 %v11914_v24  ;;  %11831 = vmatprep.subr.mxu1 %v11914_v24 }
 0xfac   :  { %11805 = vmatpush3.msra.mxu0 %v12023_v39  ;;  %11832 = vmatpush3.msra.mxu1 %v12069_v56 }
 0xfad   :  { %11806 = vmatprep.subr.mxu0 %v11914_v24  ;;  %11834 = vmatmul.mubr.f32.vlgmr.msra.gmra.mxu1 %v8695_v23 }
 0xfae   :  { %11855 = vmatprep.subr.mxu1 %v11914_v24  ;;  %11807 = vmatpush3.msra.mxu0 %v12035_v43 }
 0xfaf   :  { %11856 = vmatpush3.msra.mxu1 %v11986_v25  ;;  %11808 = vmatprep.subr.mxu0 %v11914_v24 }
 0xfb0   :  { %11857 = vmatprep.subr.mxu1 %v11914_v24  ;;  %11809 = vmatpush3.msra.mxu0 %v12060_v53 }
 0xfb1   :  { %11858 = vmatpush3.msra.mxu1 %v11989_v26  ;;  %11810 = vmatprep.subr.mxu0 %v11914_v24 }
 0xfb2   :  { %11859 = vmatprep.subr.mxu1 %v11914_v24  ;;  %11811 = vmatpush3.msra.mxu0 %v12075_v58  ;;  %v9185_v58 = vld [vmem:[%s14153_s1 + $0x5] ss:$0 sm:$0xff] }
 0xfb3   :  { %11860 = vmatpush3.msra.mxu1 %v11991_v27  ;;  %11812 = vmatprep.subr.mxu0 %v11914_v24 }
 0xfb4   :  { %11861 = vmatprep.subr.mxu1 %v11914_v24  ;;  %11813 = vmatpush3.msra.mxu0 %v12097_v1 }
 0xfb5   :  { %11814 = vmatprep.mubr.msk.f32.mxu0 %vm11915_vm1, %v11914_v24  ;;  %11862 = vmatpush3.msra.mxu1 %v11999_v30 }
 0xfb6   :  { %11815 = vmatmul.mubr.f32.vlgmr.msra.gmra.mxu0 %v8694_v17  ;;  %11836 = vmatprep.subr.mxu0 %v11914_v24 }
 0xfb7   :  { %11863 = vmatprep.subr.mxu1 %v11914_v24  ;;  %11837 = vmatpush3.msra.mxu0 %v12020_v38  ;;  %v8616_v38 = vld [vmem:[#allocation2 + $0x80] sm:$0xff] }
 0xfb8   :  { %11864 = vmatpush3.msra.mxu1 %v12002_v31  ;;  %11838 = vmatprep.subr.mxu0 %v11914_v24 }
 0xfb9   :  { %11865 = vmatprep.subr.mxu1 %v11914_v24  ;;  %11839 = vmatpush3.msra.mxu0 %v12029_v41 }
 0xfba   :  { %11866 = vmatpush3.msra.mxu1 %v12026_v40  ;;  %11840 = vmatprep.subr.mxu0 %v11914_v24 }
 0xfbb   :  { %11867 = vmatprep.subr.mxu1 %v11914_v24  ;;  %11841 = vmatpush3.msra.mxu0 %v12032_v42 }
 0xfbc   :  { %11868 = vmatpush3.msra.mxu1 %v12044_v46  ;;  %11842 = vmatprep.subr.mxu0 %v11914_v24 }
 0xfbd   :  { %11869 = vmatprep.subr.mxu1 %v11914_v24  ;;  %11843 = vmatpush3.msra.mxu0 %v12041_v45 }
 0xfbe   :  { %11870 = vmatpush3.msra.mxu1 %v12069_v56  ;;  %11871 = vmatprep.mubr.msk.f32.mxu1 %vm11915_vm1, %v11914_v24 }
 0xfbf   :  { %11844 = vmatprep.subr.mxu0 %v11914_v24  ;;  %11872 = vmatmul.mubr.f32.vlgmr.msra.gmra.mxu1 %v14064_v7 }
 0xfc0   :  { %11845 = vmatpush3.msra.mxu0 %v12066_v55  ;;  %11852 = vmatprep.mubr.msk.f32.mxu0 %vm11915_vm1, %v11914_v24 }
 0xfc1   :  { %11846 = vmatprep.subr.mxu0 %v11914_v24 }
 0xfc2   :  { %11847 = vmatpush3.msra.mxu0 %v12090_v63 }
 0xfc3   :  { %11848 = vmatprep.subr.mxu0 %v11914_v24 }
 0xfc4   :  { %11849 = vmatpush3.msra.mxu0 %v12104_v3 }
 0xfc5   :  { %11850 = vmatprep.subr.mxu0 %v11914_v24 }
 0xfc6   :  { %11851 = vmatpush3.msra.mxu0 %v12120_v9  ;;  %v9168_v9 = vlaneseq }
 0xfc7   :  { %11853 = vmatmul.mubr.f32.vlgmr.msra.gmra.mxu0 %v14064_v7 }
 0xfc8   :  { %v9169_v32 = vshrl.u32 %v9168_v9, 7 }
 0xfca   :  { %v9170_v36 = vsub.s32 0, %v9169_v32 }
 0xfcc   :  { %v9171_v19 = vrot.slane %v9167_v37, %v9170_v36 }
0x105d   :  { %v8810_v25 = vpop.f32.mrf.mxu1 }
0x105f   :  { %v11797_v26 = vpop.f32.mrf.mxu1 }
0x1065   :  { %v8699_v27 = vpop.f32.mrf.mxu0 }
0x1066   :  { %v8700_v39 = vadd.f32 %v8699_v27, %v8616_v38 }
0x1067   :  { %v11778_v29 = vpop.f32.mrf.mxu0 }
0x1068   :  { %v8811_v41 = vadd.f32 %v8810_v25, %v8700_v39 }
0x106d   :  { %v8979_v30 = vpop.f32.mrf.mxu1 }
0x106f   :  { %v11835_v31 = vpop.f32.mrf.mxu1 }
0x1076   :  { %v8898_v34 = vpop.f32.mrf.mxu0 }
0x1077   :  { %v8899_v43 = vadd.f32 %v8898_v34, %v8811_v41 }
0x1078   :  { %v11816_v35 = vpop.f32.mrf.mxu0 }
0x1079   :  { %v8980_v45 = vadd.f32 %v8979_v30, %v8899_v43 }
0x107f   :  { %v9153_v40 = vpop.f32.mrf.mxu1 }
0x1081   :  { %v11873_v42 = vpop.f32.mrf.mxu1 }
0x1087   :  { %v9074_v24 = vpop.f32.mrf.mxu0 }
0x1088   :  { %v9075_v46 = vadd.f32 %v9074_v24, %v8980_v45 }
0x1089   :  { %v11854_v53 = vpop.f32.mrf.mxu0 }
0x108a   :  { %v9154_v55 = vadd.f32 %v9153_v40, %v9075_v46 }
0x108c   :  { %11911 = vtanh.f32 %v9154_v55 }
0x1099   :  { %v11912_v56 = vpop.eup %11911 }
0x109a   :  { %v9158_v63 = vadd.f32 %v11912_v56, %v14062_v14 }
0x109c   :  { %v9163_v1 = vmul.f32 %v9185_v58, %v9158_v63 }
0x109e   :  { %v9164_v3 = vsel %vm444_vm0, %v9163_v1, 0.0 }
0x109f   :  { %9165 = vadd.xlane.f32.xlu1 %v9164_v3 }
0x1128   :  { %v9166_v21 = vpop.xlane.xlu1 %9165 }
0x1129   :  { %v9172_v18 = vadd.f32 %v9171_v19, %v9166_v21 }
0x112b   :  { %v9173_v47 = vmul.f32 0.0001, %v9172_v18 }
0x112d   :  { %9175 = vst.msk [vmem:[%s14154_s3] sm:$0xff] %vm9174_vm2, %v9173_v47 }

</bundles_post_ra>
